<compile_context>
chip_gen: v7x
topology: tpu7x:2x2x1
jax: 0.10.0
libtpu: 0.0.40
codegen_flags: <defaults>
</compile_context>

<pallas_src>
import functools

import jax
import jax.numpy as jnp
from jax import lax
from jax.experimental import pallas as pl
from jax.experimental.pallas import tpu as pltpu

_NEG = -1e30  # matches util.masked_softmax's -1e30 fill


def _round_up(x, m):
    return ((x + m - 1) // m) * m


# ----------------------------------------------------------------------------
# Generic row-tiled matmul + bias (used for the hoisted LSTM input projection)
# ----------------------------------------------------------------------------
def _matmul_bias_kernel(x_ref, w_ref, b_ref, o_ref):
    o_ref[...] = (jnp.dot(x_ref[...], w_ref[...],
                          preferred_element_type=jnp.float32) + b_ref[...])


def matmul_bias(x, w, b, tm=512):
    N, Din = x.shape
    Dout = w.shape[1]
    tm = min(tm, _round_up(N, 8))
    n_pad = _round_up(N, tm)
    if n_pad != N:
        x = jnp.pad(x, ((0, n_pad - N), (0, 0)))
    out = pl.pallas_call(
        _matmul_bias_kernel,
        out_shape=jax.ShapeDtypeStruct((n_pad, Dout), jnp.float32),
        grid_spec=pltpu.PrefetchScalarGridSpec(
            num_scalar_prefetch=0,
            grid=(n_pad // tm,),
            in_specs=[pl.BlockSpec((tm, Din), lambda i: (i, 0)),
                      pl.BlockSpec((Din, Dout), lambda i: (0, 0)),
                      pl.BlockSpec((1, Dout), lambda i: (0, 0))],
            out_specs=pl.BlockSpec((tm, Dout), lambda i: (i, 0)),
        ),
        compiler_params=pltpu.CompilerParams(dimension_semantics=("parallel",)),
    )(x, w, b)
    return out[:N]


# ----------------------------------------------------------------------------
# Embedding: projection (no bias) + 2-layer highway encoder (row-tiled,
# shared by context and question rows)
# ----------------------------------------------------------------------------
def _emb_kernel(x_ref, wp_ref, wt1_ref, bt1_ref, wg1_ref, bg1_ref,
                wt2_ref, bt2_ref, wg2_ref, bg2_ref, o_ref):
    x = jnp.dot(x_ref[...], wp_ref[...], preferred_element_type=jnp.float32)
    for wt, bt, wg, bg in ((wt1_ref, bt1_ref, wg1_ref, bg1_ref),
                           (wt2_ref, bt2_ref, wg2_ref, bg2_ref)):
        t = jnp.maximum(
            jnp.dot(x, wt[...], preferred_element_type=jnp.float32) + bt[...], 0.0)
        g = jax.nn.sigmoid(
            jnp.dot(x, wg[...], preferred_element_type=jnp.float32) + bg[...])
        x = g * t + (1.0 - g) * x
    o_ref[...] = x


def embedding_apply(rows, p, tm=512):
    """rows: (N, E) gathered word vectors -> (N, H) highway output."""
    N, E = rows.shape
    H = p['wp'].shape[1]
    tm = min(tm, _round_up(N, 8))
    n_pad = _round_up(N, tm)
    if n_pad != N:
        rows = jnp.pad(rows, ((0, n_pad - N), (0, 0)))
    (wt1, bt1), (wg1, bg1) = p['hwy'][0]
    (wt2, bt2), (wg2, bg2) = p['hwy'][1]

    def wfull(shape):
        return pl.BlockSpec(shape, lambda i, n=len(shape): (0,) * n)

    out = pl.pallas_call(
        _emb_kernel,
        out_shape=jax.ShapeDtypeStruct((n_pad, H), jnp.float32),
        grid_spec=pltpu.PrefetchScalarGridSpec(
            num_scalar_prefetch=0,
            grid=(n_pad // tm,),
            in_specs=[pl.BlockSpec((tm, E), lambda i: (i, 0)),
                      wfull(p['wp'].shape),
                      wfull(wt1.shape), wfull(bt1.shape),
                      wfull(wg1.shape), wfull(bg1.shape),
                      wfull(wt2.shape), wfull(bt2.shape),
                      wfull(wg2.shape), wfull(bg2.shape)],
            out_specs=pl.BlockSpec((tm, H), lambda i: (i, 0)),
        ),
        compiler_params=pltpu.CompilerParams(dimension_semantics=("parallel",)),
    )(rows, p['wp'], wt1, bt1, wg1, bg1, wt2, bt2, wg2, bg2)
    return out[:N]


# ----------------------------------------------------------------------------
# Bidirectional LSTM layer (packed-sequence semantics via length masking)
#   - input projection hoisted (done via matmul_bias, both directions fused)
#   - one pallas_call: grid = (2 directions, time-chunks); time loop in-kernel
# ----------------------------------------------------------------------------
def _bilstm_rec_kernel(xg_ref, mask_ref, whh_ref, out_ref, h_sc, c_sc,
                       *, hidden, tc):
    d = pl.program_id(0)        # 0 = forward, 1 = backward
    j = pl.program_id(1)        # time-chunk (chunks already direction-ordered)

    @pl.when(j == 0)
    def _():
        h_sc[...] = jnp.zeros_like(h_sc)
        c_sc[...] = jnp.zeros_like(c_sc)

    whh = whh_ref[...]          # (H, 4H), resident for the whole chunk

    def step(i, carry):
        h, c = carry
        # forward walks the chunk 0..tc-1, backward walks it tc-1..0
        loc = i * (1 - d) + (tc - 1 - i) * d
        xg = xg_ref[loc]        # (B, 4H) = x @ W_ih + b_ih + b_hh (precomputed)
        valid = mask_ref[loc]   # (B, 1) float {0,1}: position < seq length
        gates = xg + jnp.dot(h, whh, preferred_element_type=jnp.float32)
        i_g = jax.nn.sigmoid(gates[:, 0:hidden])
        f_g = jax.nn.sigmoid(gates[:, hidden:2 * hidden])
        g_g = jnp.tanh(gates[:, 2 * hidden:3 * hidden])
        o_g = jax.nn.sigmoid(gates[:, 3 * hidden:4 * hidden])
        c_new = f_g * c + i_g * g_g
        h_new = o_g * jnp.tanh(c_new)
        out_ref[loc] = valid * h_new              # zero output past seq end
        h = valid * h_new + (1.0 - valid) * h     # freeze state past seq end
        c = valid * c_new + (1.0 - valid) * c
        return h, c

    h, c = lax.fori_loop(0, tc, step, (h_sc[...], c_sc[...]))
    h_sc[...] = h
    c_sc[...] = c


def bilstm_layer(x, vmask_tm, p):
    """x: (B, T, Din), vmask_tm: (T, B, 1) float validity -> (B, T, 2H)."""
    B, T, Din = x.shape
    H = p['whh'].shape[1]

    # 1) Hoisted input projection for both directions in one big MXU matmul.
    x_tm = jnp.transpose(x, (1, 0, 2))                          # (T, B, Din)
    xg = matmul_bias(x_tm.reshape(T * B, Din), p['wih'], p['b'])  # (T*B, 8H)
    xg = xg.reshape(T, B, 2, 4 * H).transpose(2, 0, 1, 3)       # (2, T, B, 4H)

    # 2) Recurrent kernel over time-chunks; pad T so chunks tile evenly
    #    (padded positions have mask 0 -> state frozen, output zero).
    tc = min(T, 64)
    t_pad = _round_up(T, tc)
    if t_pad != T:
        xg = jnp.pad(xg, ((0, 0), (0, t_pad - T), (0, 0), (0, 0)))
        vmask_tm = jnp.pad(vmask_tm, ((0, t_pad - T), (0, 0), (0, 0)))
    nc = t_pad // tc

    def x_map(d, j):
        sel = j * (1 - d) + (nc - 1 - j) * d     # backward walks chunks reversed
        return (d, sel, 0, 0)

    def m_map(d, j):
        sel = j * (1 - d) + (nc - 1 - j) * d
        return (sel, 0, 0)

    out = pl.pallas_call(
        functools.partial(_bilstm_rec_kernel, hidden=H, tc=tc),
        out_shape=jax.ShapeDtypeStruct((2, t_pad, B, H), jnp.float32),
        grid_spec=pltpu.PrefetchScalarGridSpec(
            num_scalar_prefetch=0,
            grid=(2, nc),
            in_specs=[
                pl.BlockSpec((None, tc, B, 4 * H), x_map),
                pl.BlockSpec((tc, B, 1), m_map),
                pl.BlockSpec((None, H, 4 * H), lambda d, j: (d, 0, 0)),
            ],
            out_specs=pl.BlockSpec((None, tc, B, H), x_map),
            scratch_shapes=[pltpu.VMEM((B, H), jnp.float32),
                            pltpu.VMEM((B, H), jnp.float32)],
        ),
        compiler_params=pltpu.CompilerParams(
            dimension_semantics=("parallel", "arbitrary")),
    )(xg, vmask_tm, p['whh'])

    out = out[:, :T]                                            # (2, T, B, H)
    return jnp.transpose(out, (2, 1, 0, 3)).reshape(B, T, 2 * H)


# ----------------------------------------------------------------------------
# BiDAF attention (per-batch grid; dot_general contractions, no q.T relayout)
# ----------------------------------------------------------------------------
def _attention_kernel(c_ref, q_ref, cmask_ref, qmask_ref,
                      cw_ref, qw_ref, cqw_ref, bias_ref, o_ref):
    c = c_ref[0]                                       # (Lc, 2H)
    q = q_ref[0]                                       # (Lq, 2H)
    cmask = cmask_ref[0]                               # (Lc, 1) float
    qmask = qmask_ref[0]                               # (1, Lq) float
    dn = (((1,), (1,)), ((), ()))                      # contract last dims

    s0 = lax.dot_general(c, cw_ref[...], dn,
                         preferred_element_type=jnp.float32)            # (Lc, 1)
    s1 = lax.dot_general(qw_ref[...], q, dn,
                         preferred_element_type=jnp.float32)            # (1, Lq)
    s2 = lax.dot_general(c * cqw_ref[...], q, dn,
                         preferred_element_type=jnp.float32)            # (Lc, Lq)
    s = s0 + s1 + s2 + bias_ref[...]

    # masked softmax over question positions (dim=2 in torch)
    sq = qmask * s + (1.0 - qmask) * _NEG
    sq = sq - jnp.max(sq, axis=1, keepdims=True)
    eq = jnp.exp(sq)
    s1_soft = eq * pl.reciprocal(jnp.sum(eq, axis=1, keepdims=True), approx=True)

    # masked softmax over context positions (dim=1 in torch)
    sc = cmask * s + (1.0 - cmask) * _NEG
    sc = sc - jnp.max(sc, axis=0, keepdims=True)
    ec = jnp.exp(sc)
    s2_soft = ec * pl.reciprocal(jnp.sum(ec, axis=0, keepdims=True), approx=True)

    a = jnp.dot(s1_soft, q, preferred_element_type=jnp.float32)          # (Lc, 2H)
    ss = lax.dot_general(s1_soft, s2_soft, dn,
                         preferred_element_type=jnp.float32)             # (Lc, Lc)
    b = jnp.dot(ss, c, preferred_element_type=jnp.float32)               # (Lc, 2H)

    o_ref[0] = jnp.concatenate([c, a, c * a, c * b], axis=1)             # (Lc, 8H)


def attention_apply(c_enc, q_enc, c_mask, q_mask, p):
    B, Lc, D2 = c_enc.shape
    Lq = q_enc.shape[1]
    cmask3 = c_mask.reshape(B, Lc, 1)
    qmask3 = q_mask.reshape(B, 1, Lq)
    bmap = lambda b: (b, 0, 0)
    wmap = lambda b: (0, 0)
    return pl.pallas_call(
        _attention_kernel,
        out_shape=jax.ShapeDtypeStruct((B, Lc, 4 * D2), jnp.float32),
        grid_spec=pltpu.PrefetchScalarGridSpec(
            num_scalar_prefetch=0,
            grid=(B,),
            in_specs=[
                pl.BlockSpec((1, Lc, D2), bmap),
                pl.BlockSpec((1, Lq, D2), bmap),
                pl.BlockSpec((1, Lc, 1), bmap),
                pl.BlockSpec((1, 1, Lq), bmap),
                pl.BlockSpec((1, D2), wmap),
                pl.BlockSpec((1, D2), wmap),
                pl.BlockSpec((1, D2), wmap),
                pl.BlockSpec((1, 1), wmap),
            ],
            out_specs=pl.BlockSpec((1, Lc, 4 * D2), bmap),
        ),
        compiler_params=pltpu.CompilerParams(dimension_semantics=("parallel",)),
    )(c_enc, q_enc, cmask3, qmask3, p['c_w'], p['q_w'], p['cq_w'], p['bias'])


# ----------------------------------------------------------------------------
# Output layer: MXU logits (lane-dense (1, Lc) rows) + masked log-softmax
# ----------------------------------------------------------------------------
def _output_kernel(att_ref, mod_ref, mod2_ref, cmask_ref,
                   w1a_ref, w1m_ref, w2a_ref, w2m_ref, b_ref, o_ref):
    att = att_ref[0]                                   # (Lc, 8H)
    mod = mod_ref[0]                                   # (Lc, 2H)
    mod2 = mod2_ref[0]                                 # (Lc, 2H)
    mask = cmask_ref[0]                                # (1, Lc) float
    b = b_ref[...]                                     # (1, 2)
    dn = (((1,), (1,)), ((), ()))

    l1 = (lax.dot_general(w1a_ref[...], att, dn, preferred_element_type=jnp.float32)
          + lax.dot_general(w1m_ref[...], mod, dn, preferred_element_type=jnp.float32)
          + b[:, 0:1])                                                   # (1, Lc)
    l2 = (lax.dot_general(w2a_ref[...], att, dn, preferred_element_type=jnp.float32)
          + lax.dot_general(w2m_ref[...], mod2, dn, preferred_element_type=jnp.float32)
          + b[:, 1:2])                                                   # (1, Lc)

    def masked_log_softmax(logits):
        ml = mask * logits + (1.0 - mask) * _NEG
        m = jnp.max(ml, axis=1, keepdims=True)
        lse = m + jnp.log(jnp.sum(jnp.exp(ml - m), axis=1, keepdims=True))
        return ml - lse

    o_ref[0] = jnp.concatenate([masked_log_softmax(l1),
                                masked_log_softmax(l2)], axis=0)         # (2, Lc)


def output_apply(att, mod, mod2, c_mask, p):
    B, Lc, D8 = att.shape
    D2 = mod.shape[2]
    cmask3 = c_mask.reshape(B, 1, Lc)
    bias = jnp.concatenate([p['ba1'] + p['bm1'], p['ba2'] + p['bm2']], axis=1)  # (1,2)
    bmap = lambda b: (b, 0, 0)
    wmap = lambda b: (0, 0)
    out = pl.pallas_call(
        _output_kernel,
        out_shape=jax.ShapeDtypeStruct((B, 2, Lc), jnp.float32),
        grid_spec=pltpu.PrefetchScalarGridSpec(
            num_scalar_prefetch=0,
            grid=(B,),
            in_specs=[
                pl.BlockSpec((1, Lc, D8), bmap),
                pl.BlockSpec((1, Lc, D2), bmap),
                pl.BlockSpec((1, Lc, D2), bmap),
                pl.BlockSpec((1, 1, Lc), bmap),
                pl.BlockSpec((1, D8), wmap),
                pl.BlockSpec((1, D2), wmap),
                pl.BlockSpec((1, D8), wmap),
                pl.BlockSpec((1, D2), wmap),
                pl.BlockSpec((1, 2), wmap),
            ],
            out_specs=pl.BlockSpec((1, 2, Lc), bmap),
        ),
        compiler_params=pltpu.CompilerParams(dimension_semantics=("parallel",)),
    )(att, mod, mod2, cmask3, p['wa1'], p['wm1'], p['wa2'], p['wm2'], bias)
    return out[:, 0, :], out[:, 1, :]


# ----------------------------------------------------------------------------
# Parameters (deterministic synthetic init; drop_prob = 0)
# ----------------------------------------------------------------------------
def make_bilstm_params(key, din, hidden, scale=0.1):
    kf, kb = jax.random.split(key)

    def direction(k):
        k1, k2, k3, k4 = jax.random.split(k, 4)
        wih = jax.random.normal(k1, (4 * hidden, din), jnp.float32) * scale
        whh = jax.random.normal(k2, (4 * hidden, hidden), jnp.float32) * scale
        bih = jax.random.normal(k3, (4 * hidden,), jnp.float32) * scale
        bhh = jax.random.normal(k4, (4 * hidden,), jnp.float32) * scale
        # pre-transposed for x @ W; PyTorch biases b_ih + b_hh summed
        return wih.T, whh.T, (bih + bhh).reshape(1, 4 * hidden)

    f = direction(kf)
    b = direction(kb)
    return {'wih': jnp.concatenate([f[0], b[0]], axis=1),   # (Din, 8H) [fwd|bwd]
            'whh': jnp.stack([f[1], b[1]], axis=0),         # (2, H, 4H)
            'b': jnp.concatenate([f[2], b[2]], axis=1)}     # (1, 8H)


def init_params(key, vocab, emb_dim, hidden):
    kit = iter(jax.random.split(key, 24))
    nxt = lambda: next(kit)

    def linear(k, din, dout, scale=0.1):
        k1, k2 = jax.random.split(k)
        return (jax.random.normal(k1, (din, dout), jnp.float32) * scale,
                jax.random.normal(k2, (1, dout), jnp.float32) * scale)

    def row_linear(k, din, scale=0.1):
        k1, k2 = jax.random.split(k)
        return (jax.random.normal(k1, (1, din), jnp.float32) * scale,
                jax.random.normal(k2, (1, 1), jnp.float32) * scale)

    wv = jax.random.normal(nxt(), (vocab, emb_dim), jnp.float32) * 0.5
    wv = wv.at[0].set(0.0)   # padding index 0

    params = {
        'word_vectors': wv,
        'emb': {
            'wp': jax.random.normal(nxt(), (emb_dim, hidden), jnp.float32) * 0.1,
            'hwy': [(linear(nxt(), hidden, hidden), linear(nxt(), hidden, hidden))
                    for _ in range(2)],
        },
        'enc': [make_bilstm_params(nxt(), hidden, hidden)],
        'att': {
            'c_w': jax.random.normal(nxt(), (1, 2 * hidden), jnp.float32) * 0.1,
            'q_w': jax.random.normal(nxt(), (1, 2 * hidden), jnp.float32) * 0.1,
            'cq_w': jax.random.normal(nxt(), (1, 2 * hidden), jnp.float32) * 0.1,
            'bias': jnp.zeros((1, 1), jnp.float32),
        },
        'mod': [make_bilstm_params(nxt(), 8 * hidden, hidden),
                make_bilstm_params(nxt(), 2 * hidden, hidden)],
        'out_rnn': make_bilstm_params(nxt(), 2 * hidden, hidden),
    }
    wa1, ba1 = row_linear(nxt(), 8 * hidden)
    wm1, bm1 = row_linear(nxt(), 2 * hidden)
    wa2, ba2 = row_linear(nxt(), 8 * hidden)
    wm2, bm2 = row_linear(nxt(), 2 * hidden)
    params['out'] = {'wa1': wa1, 'ba1': ba1, 'wm1': wm1, 'bm1': bm1,
                     'wa2': wa2, 'ba2': ba2, 'wm2': wm2, 'bm2': bm2}
    return params


# ----------------------------------------------------------------------------
# Full BiDAF forward
# ----------------------------------------------------------------------------
def bidaf_forward(params, cw_idxs, qw_idxs):
    B, Lc = cw_idxs.shape
    Lq = qw_idxs.shape[1]
    c_mask_b = cw_idxs != 0
    q_mask_b = qw_idxs != 0
    c_len = c_mask_b.sum(-1).astype(jnp.int32)
    q_len = q_mask_b.sum(-1).astype(jnp.int32)
    c_mask = c_mask_b.astype(jnp.float32)
    q_mask = q_mask_b.astype(jnp.float32)

    # time-major {0,1} validity masks for packed-sequence LSTM semantics
    c_vmask = (jnp.arange(Lc)[:, None] < c_len[None, :]
               ).astype(jnp.float32)[:, :, None]                # (Lc, B, 1)
    q_vmask = (jnp.arange(Lq)[:, None] < q_len[None, :]
               ).astype(jnp.float32)[:, :, None]                # (Lq, B, 1)

    # embedding gather (glue) + one fused projection/highway kernel for c & q
    c_rows = jnp.take(params['word_vectors'], cw_idxs, axis=0).reshape(B * Lc, -1)
    q_rows = jnp.take(params['word_vectors'], qw_idxs, axis=0).reshape(B * Lq, -1)
    emb = embedding_apply(jnp.concatenate([c_rows, q_rows], axis=0), params['emb'])
    H = emb.shape[1]
    c_emb = emb[:B * Lc].reshape(B, Lc, H)
    q_emb = emb[B * Lc:].reshape(B, Lq, H)

    # shared encoder (1-layer biLSTM)
    c_enc = bilstm_layer(c_emb, c_vmask, params['enc'][0])      # (B, Lc, 2H)
    q_enc = bilstm_layer(q_emb, q_vmask, params['enc'][0])      # (B, Lq, 2H)

    # BiDAF attention -> (B, Lc, 8H)
    att = attention_apply(c_enc, q_enc, c_mask, q_mask, params['att'])

    # modeling encoder (2-layer biLSTM)
    m = bilstm_layer(att, c_vmask, params['mod'][0])
    m = bilstm_layer(m, c_vmask, params['mod'][1])              # (B, Lc, 2H)

    # output layer RNN + logits + masked log-softmax
    mod2 = bilstm_layer(m, c_vmask, params['out_rnn'])          # (B, Lc, 2H)
    log_p1, log_p2 = output_apply(att, m, mod2, c_mask, params['out'])
    return log_p1, log_p2


if __name__ == "__main__":
    VOCAB, EMB, HIDDEN = 40, 12, 16
    B, LC, LQ = 2, 16, 10

    key = jax.random.PRNGKey(0)
    kp, kc, kq = jax.random.split(key, 3)
    params = init_params(kp, VOCAB, EMB, HIDDEN)

    cw = jax.random.randint(kc, (B, LC), 1, VOCAB)
    qw = jax.random.randint(kq, (B, LQ), 1, VOCAB)
    c_lengths = jnp.array([LC, 12], dtype=jnp.int32)
    q_lengths = jnp.array([LQ, 7], dtype=jnp.int32)
    cw_idxs = jnp.where(jnp.arange(LC)[None, :] < c_lengths[:, None], cw, 0)
    qw_idxs = jnp.where(jnp.arange(LQ)[None, :] < q_lengths[:, None], qw, 0)

    fwd = jax.jit(bidaf_forward)
    log_p1, log_p2 = fwd(params, cw_idxs, qw_idxs)
    jax.block_until_ready((log_p1, log_p2))

    assert log_p1.shape == (B, LC) and log_p2.shape == (B, LC)
    assert bool(jnp.all(jnp.isfinite(log_p1))) and bool(jnp.all(jnp.isfinite(log_p2)))
    print("KERNEL_OK")
</pallas_src>

<mosaic_0001>
module attributes {stable_mosaic.version = 11 : i64} {
  func.func @_matmul_bias_kernel(%arg0: i32, %arg1: memref<32x16xf32, #tpu.memory_space<vmem>>, %arg2: memref<16x128xf32, #tpu.memory_space<vmem>>, %arg3: memref<1x128xf32, #tpu.memory_space<vmem>>, %arg4: memref<32x128xf32, #tpu.memory_space<vmem>>) attributes {dimension_semantics = [#tpu.dimension_semantics<parallel>], iteration_bounds = array<i64: 1>, scalar_prefetch = 0 : i64, scratch_operands = 0 : i64, tpu.core_type = #tpu.core_type<tc>, window_params = [{transform_indices = @transform_0, window_bounds = array<i64: 32, 16>}, {pipeline_mode = #tpu.pipeline_mode<synchronous>, transform_indices = @transform_1, window_bounds = array<i64: 16, 128>}, {pipeline_mode = #tpu.pipeline_mode<synchronous>, transform_indices = @transform_2, window_bounds = array<i64: 1, 128>}, {transform_indices = @transform_3, window_bounds = array<i64: 32, 128>}]} {
    %c0 = arith.constant 0 : index
    %c0_0 = arith.constant 0 : index
    %0 = vector.load %arg1[%c0, %c0_0] : memref<32x16xf32, #tpu.memory_space<vmem>>, vector<32x16xf32>
    %c0_1 = arith.constant 0 : index
    %c0_2 = arith.constant 0 : index
    %1 = vector.load %arg2[%c0_1, %c0_2] : memref<16x128xf32, #tpu.memory_space<vmem>>, vector<16x128xf32>
    %cst = arith.constant dense<0.000000e+00> : vector<32x128xf32>
    %2 = tpu.matmul %0, %1, %cst {dimension_numbers = #tpu.dot_dimension_numbers<[1], [0], [0], [1], [0, 0, 1, 1], [], []>} : vector<32x16xf32>, vector<16x128xf32>, vector<32x128xf32> -> vector<32x128xf32>
    %c0_3 = arith.constant 0 : index
    %c0_4 = arith.constant 0 : index
    %3 = vector.load %arg3[%c0_3, %c0_4] : memref<1x128xf32, #tpu.memory_space<vmem>>, vector<1x128xf32>
    %4 = vector.broadcast %3 : vector<1x128xf32> to vector<32x128xf32>
    %5 = arith.addf %2, %4 : vector<32x128xf32>
    %c0_5 = arith.constant 0 : index
    %c0_6 = arith.constant 0 : index
    %6 = vector.load %arg4[%c0_5, %c0_6] : memref<32x128xf32, #tpu.memory_space<vmem>>, vector<32x128xf32>
    tpu.vector_store %arg4[%c0_5, %c0_6], %5 {strides = array<i32>} : memref<32x128xf32, #tpu.memory_space<vmem>>, vector<32x128xf32>,
    return
  }
  func.func @transform_0(%arg0: i32) -> (i32, i32) {
    %c0_i32 = arith.constant 0 : i32
    %c0_i32_0 = arith.constant 0 : i32
    return %arg0, %c0_i32 : i32, i32
  }
  func.func @transform_1(%arg0: i32) -> (i32, i32) {
    %c0_i32 = arith.constant 0 : i32
    %c0_i32_0 = arith.constant 0 : i32
    %c0_i32_1 = arith.constant 0 : i32
    return %c0_i32, %c0_i32_0 : i32, i32
  }
  func.func @transform_2(%arg0: i32) -> (i32, i32) {
    %c0_i32 = arith.constant 0 : i32
    %c0_i32_0 = arith.constant 0 : i32
    %c0_i32_1 = arith.constant 0 : i32
    return %c0_i32, %c0_i32_0 : i32, i32
  }
  func.func @transform_3(%arg0: i32) -> (i32, i32) {
    %c0_i32 = arith.constant 0 : i32
    %c0_i32_0 = arith.constant 0 : i32
    return %arg0, %c0_i32 : i32, i32
  }
}

module attributes {stable_mosaic.version = 11 : i64} {
  func.func @_emb_kernel(%arg0: i32, %arg1: memref<56x12xf32, #tpu.memory_space<vmem>>, %arg2: memref<12x16xf32, #tpu.memory_space<vmem>>, %arg3: memref<16x16xf32, #tpu.memory_space<vmem>>, %arg4: memref<1x16xf32, #tpu.memory_space<vmem>>, %arg5: memref<16x16xf32, #tpu.memory_space<vmem>>, %arg6: memref<1x16xf32, #tpu.memory_space<vmem>>, %arg7: memref<16x16xf32, #tpu.memory_space<vmem>>, %arg8: memref<1x16xf32, #tpu.memory_space<vmem>>, %arg9: memref<16x16xf32, #tpu.memory_space<vmem>>, %arg10: memref<1x16xf32, #tpu.memory_space<vmem>>, %arg11: memref<56x16xf32, #tpu.memory_space<vmem>>) attributes {dimension_semantics = [#tpu.dimension_semantics<parallel>], iteration_bounds = array<i64: 1>, scalar_prefetch = 0 : i64, scratch_operands = 0 : i64, tpu.core_type = #tpu.core_type<tc>, window_params = [{transform_indices = @transform_0, window_bounds = array<i64: 56, 12>}, {pipeline_mode = #tpu.pipeline_mode<synchronous>, transform_indices = @transform_1, window_bounds = array<i64: 12, 16>}, {pipeline_mode = #tpu.pipeline_mode<synchronous>, transform_indices = @transform_2, window_bounds = array<i64: 16, 16>}, {pipeline_mode = #tpu.pipeline_mode<synchronous>, transform_indices = @transform_3, window_bounds = array<i64: 1, 16>}, {pipeline_mode = #tpu.pipeline_mode<synchronous>, transform_indices = @transform_4, window_bounds = array<i64: 16, 16>}, {pipeline_mode = #tpu.pipeline_mode<synchronous>, transform_indices = @transform_5, window_bounds = array<i64: 1, 16>}, {pipeline_mode = #tpu.pipeline_mode<synchronous>, transform_indices = @transform_6, window_bounds = array<i64: 16, 16>}, {pipeline_mode = #tpu.pipeline_mode<synchronous>, transform_indices = @transform_7, window_bounds = array<i64: 1, 16>}, {pipeline_mode = #tpu.pipeline_mode<synchronous>, transform_indices = @transform_8, window_bounds = array<i64: 16, 16>}, {pipeline_mode = #tpu.pipeline_mode<synchronous>, transform_indices = @transform_9, window_bounds = array<i64: 1, 16>}, {transform_indices = @transform_10, window_bounds = array<i64: 56, 16>}]} {
    %c0 = arith.constant 0 : index
    %c0_0 = arith.constant 0 : index
    %0 = vector.load %arg1[%c0, %c0_0] : memref<56x12xf32, #tpu.memory_space<vmem>>, vector<56x12xf32>
    %c0_1 = arith.constant 0 : index
    %c0_2 = arith.constant 0 : index
    %1 = vector.load %arg2[%c0_1, %c0_2] : memref<12x16xf32, #tpu.memory_space<vmem>>, vector<12x16xf32>
    %cst = arith.constant dense<0.000000e+00> : vector<56x16xf32>
    %2 = tpu.matmul %0, %1, %cst {dimension_numbers = #tpu.dot_dimension_numbers<[1], [0], [0], [1], [0, 0, 1, 1], [], []>} : vector<56x12xf32>, vector<12x16xf32>, vector<56x16xf32> -> vector<56x16xf32>
    %c0_3 = arith.constant 0 : index
    %c0_4 = arith.constant 0 : index
    %3 = vector.load %arg3[%c0_3, %c0_4] : memref<16x16xf32, #tpu.memory_space<vmem>>, vector<16x16xf32>
    %cst_5 = arith.constant dense<0.000000e+00> : vector<56x16xf32>
    %4 = tpu.matmul %2, %3, %cst_5 {dimension_numbers = #tpu.dot_dimension_numbers<[1], [0], [0], [1], [0, 0, 1, 1], [], []>} : vector<56x16xf32>, vector<16x16xf32>, vector<56x16xf32> -> vector<56x16xf32>
    %c0_6 = arith.constant 0 : index
    %c0_7 = arith.constant 0 : index
    %5 = vector.load %arg4[%c0_6, %c0_7] : memref<1x16xf32, #tpu.memory_space<vmem>>, vector<1x16xf32>
    %6 = vector.broadcast %5 : vector<1x16xf32> to vector<56x16xf32>
    %7 = arith.addf %4, %6 : vector<56x16xf32>
    %cst_8 = arith.constant 0.000000e+00 : f32
    %8 = vector.broadcast %cst_8 : f32 to vector<56x16xf32>
    %9 = arith.maximumf %7, %8 : vector<56x16xf32>
    %c0_9 = arith.constant 0 : index
    %c0_10 = arith.constant 0 : index
    %10 = vector.load %arg5[%c0_9, %c0_10] : memref<16x16xf32, #tpu.memory_space<vmem>>, vector<16x16xf32>
    %cst_11 = arith.constant dense<0.000000e+00> : vector<56x16xf32>
    %11 = tpu.matmul %2, %10, %cst_11 {dimension_numbers = #tpu.dot_dimension_numbers<[1], [0], [0], [1], [0, 0, 1, 1], [], []>} : vector<56x16xf32>, vector<16x16xf32>, vector<56x16xf32> -> vector<56x16xf32>
    %c0_12 = arith.constant 0 : index
    %c0_13 = arith.constant 0 : index
    %12 = vector.load %arg6[%c0_12, %c0_13] : memref<1x16xf32, #tpu.memory_space<vmem>>, vector<1x16xf32>
    %13 = vector.broadcast %12 : vector<1x16xf32> to vector<56x16xf32>
    %14 = arith.addf %11, %13 : vector<56x16xf32>
    %15 = arith.negf %14 : vector<56x16xf32>
    %16 = math.exp %15 : vector<56x16xf32>
    %cst_14 = arith.constant 1.000000e+00 : f32
    %17 = vector.broadcast %cst_14 : f32 to vector<56x16xf32>
    %18 = arith.addf %17, %16 : vector<56x16xf32>
    %19 = arith.divf %17, %18 : vector<56x16xf32>
    %20 = arith.mulf %19, %9 : vector<56x16xf32>
    %cst_15 = arith.constant 1.000000e+00 : f32
    %21 = vector.broadcast %cst_15 : f32 to vector<56x16xf32>
    %22 = arith.subf %21, %19 : vector<56x16xf32>
    %23 = arith.mulf %22, %2 : vector<56x16xf32>
    %24 = arith.addf %20, %23 : vector<56x16xf32>
    %c0_16 = arith.constant 0 : index
    %c0_17 = arith.constant 0 : index
    %25 = vector.load %arg7[%c0_16, %c0_17] : memref<16x16xf32, #tpu.memory_space<vmem>>, vector<16x16xf32>
    %cst_18 = arith.constant dense<0.000000e+00> : vector<56x16xf32>
    %26 = tpu.matmul %24, %25, %cst_18 {dimension_numbers = #tpu.dot_dimension_numbers<[1], [0], [0], [1], [0, 0, 1, 1], [], []>} : vector<56x16xf32>, vector<16x16xf32>, vector<56x16xf32> -> vector<56x16xf32>
    %c0_19 = arith.constant 0 : index
    %c0_20 = arith.constant 0 : index
    %27 = vector.load %arg8[%c0_19, %c0_20] : memref<1x16xf32, #tpu.memory_space<vmem>>, vector<1x16xf32>
    %28 = vector.broadcast %27 : vector<1x16xf32> to vector<56x16xf32>
    %29 = arith.addf %26, %28 : vector<56x16xf32>
    %cst_21 = arith.constant 0.000000e+00 : f32
    %30 = vector.broadcast %cst_21 : f32 to vector<56x16xf32>
    %31 = arith.maximumf %29, %30 : vector<56x16xf32>
    %c0_22 = arith.constant 0 : index
    %c0_23 = arith.constant 0 : index
    %32 = vector.load %arg9[%c0_22, %c0_23] : memref<16x16xf32, #tpu.memory_space<vmem>>, vector<16x16xf32>
    %cst_24 = arith.constant dense<0.000000e+00> : vector<56x16xf32>
    %33 = tpu.matmul %24, %32, %cst_24 {dimension_numbers = #tpu.dot_dimension_numbers<[1], [0], [0], [1], [0, 0, 1, 1], [], []>} : vector<56x16xf32>, vector<16x16xf32>, vector<56x16xf32> -> vector<56x16xf32>
    %c0_25 = arith.constant 0 : index
    %c0_26 = arith.constant 0 : index
    %34 = vector.load %arg10[%c0_25, %c0_26] : memref<1x16xf32, #tpu.memory_space<vmem>>, vector<1x16xf32>
    %35 = vector.broadcast %34 : vector<1x16xf32> to vector<56x16xf32>
    %36 = arith.addf %33, %35 : vector<56x16xf32>
    %37 = arith.negf %36 : vector<56x16xf32>
    %38 = math.exp %37 : vector<56x16xf32>
    %cst_27 = arith.constant 1.000000e+00 : f32
    %39 = vector.broadcast %cst_27 : f32 to vector<56x16xf32>
    %40 = arith.addf %39, %38 : vector<56x16xf32>
    %41 = arith.divf %39, %40 : vector<56x16xf32>
    %42 = arith.mulf %41, %31 : vector<56x16xf32>
    %cst_28 = arith.constant 1.000000e+00 : f32
    %43 = vector.broadcast %cst_28 : f32 to vector<56x16xf32>
    %44 = arith.subf %43, %41 : vector<56x16xf32>
    %45 = arith.mulf %44, %24 : vector<56x16xf32>
    %46 = arith.addf %42, %45 : vector<56x16xf32>
    %c0_29 = arith.constant 0 : index
    %c0_30 = arith.constant 0 : index
    %47 = vector.load %arg11[%c0_29, %c0_30] : memref<56x16xf32, #tpu.memory_space<vmem>>, vector<56x16xf32>
    tpu.vector_store %arg11[%c0_29, %c0_30], %46 {strides = array<i32>} : memref<56x16xf32, #tpu.memory_space<vmem>>, vector<56x16xf32>,
    return
  }
  func.func @transform_0(%arg0: i32) -> (i32, i32) {
    %c0_i32 = arith.constant 0 : i32
    %c0_i32_0 = arith.constant 0 : i32
    return %arg0, %c0_i32 : i32, i32
  }
  func.func @transform_1(%arg0: i32) -> (i32, i32) {
    %c0_i32 = arith.constant 0 : i32
    %c0_i32_0 = arith.constant 0 : i32
    %c0_i32_1 = arith.constant 0 : i32
    return %c0_i32, %c0_i32_0 : i32, i32
  }
  func.func @transform_2(%arg0: i32) -> (i32, i32) {
    %c0_i32 = arith.constant 0 : i32
    %c0_i32_0 = arith.constant 0 : i32
    %c0_i32_1 = arith.constant 0 : i32
    return %c0_i32, %c0_i32_0 : i32, i32
  }
  func.func @transform_3(%arg0: i32) -> (i32, i32) {
    %c0_i32 = arith.constant 0 : i32
    %c0_i32_0 = arith.constant 0 : i32
    %c0_i32_1 = arith.constant 0 : i32
    return %c0_i32, %c0_i32_0 : i32, i32
  }
  func.func @transform_4(%arg0: i32) -> (i32, i32) {
    %c0_i32 = arith.constant 0 : i32
    %c0_i32_0 = arith.constant 0 : i32
    %c0_i32_1 = arith.constant 0 : i32
    return %c0_i32, %c0_i32_0 : i32, i32
  }
  func.func @transform_5(%arg0: i32) -> (i32, i32) {
    %c0_i32 = arith.constant 0 : i32
    %c0_i32_0 = arith.constant 0 : i32
    %c0_i32_1 = arith.constant 0 : i32
    return %c0_i32, %c0_i32_0 : i32, i32
  }
  func.func @transform_6(%arg0: i32) -> (i32, i32) {
    %c0_i32 = arith.constant 0 : i32
    %c0_i32_0 = arith.constant 0 : i32
    %c0_i32_1 = arith.constant 0 : i32
    return %c0_i32, %c0_i32_0 : i32, i32
  }
  func.func @transform_7(%arg0: i32) -> (i32, i32) {
    %c0_i32 = arith.constant 0 : i32
    %c0_i32_0 = arith.constant 0 : i32
    %c0_i32_1 = arith.constant 0 : i32
    return %c0_i32, %c0_i32_0 : i32, i32
  }
  func.func @transform_8(%arg0: i32) -> (i32, i32) {
    %c0_i32 = arith.constant 0 : i32
    %c0_i32_0 = arith.constant 0 : i32
    %c0_i32_1 = arith.constant 0 : i32
    return %c0_i32, %c0_i32_0 : i32, i32
  }
  func.func @transform_9(%arg0: i32) -> (i32, i32) {
    %c0_i32 = arith.constant 0 : i32
    %c0_i32_0 = arith.constant 0 : i32
    %c0_i32_1 = arith.constant 0 : i32
    return %c0_i32, %c0_i32_0 : i32, i32
  }
  func.func @transform_10(%arg0: i32) -> (i32, i32) {
    %c0_i32 = arith.constant 0 : i32
    %c0_i32_0 = arith.constant 0 : i32
    return %arg0, %c0_i32 : i32, i32
  }
}

module attributes {stable_mosaic.version = 11 : i64} {
  func.func @_bilstm_rec_kernel(%arg0: i32, %arg1: i32, %arg2: memref<1x16x2x64xf32, #tpu.memory_space<vmem>>, %arg3: memref<16x2x1xf32, #tpu.memory_space<vmem>>, %arg4: memref<1x16x64xf32, #tpu.memory_space<vmem>>, %arg5: memref<1x16x2x16xf32, #tpu.memory_space<vmem>>, %arg6: memref<2x16xf32, #tpu.memory_space<vmem>>, %arg7: memref<2x16xf32, #tpu.memory_space<vmem>>) attributes {dimension_semantics = [#tpu.dimension_semantics<parallel>, #tpu.dimension_semantics<arbitrary>], iteration_bounds = array<i64: 2, 1>, scalar_prefetch = 0 : i64, scratch_operands = 2 : i64, tpu.core_type = #tpu.core_type<tc>, window_params = [{transform_indices = @transform_0, window_bounds = array<i64: 1, 16, 2, 64>}, {transform_indices = @transform_1, window_bounds = array<i64: 16, 2, 1>}, {transform_indices = @transform_2, window_bounds = array<i64: 1, 16, 64>}, {transform_indices = @transform_3, window_bounds = array<i64: 1, 16, 2, 16>}]} {
    %c0_i32 = arith.constant 0 : i32
    %0 = arith.cmpi eq, %arg1, %c0_i32 : i32
    %1 = arith.extui %0 : i1 to i32
    %c0_i32_0 = arith.constant 0 : i32
    %2 = arith.cmpi ne, %1, %c0_i32_0 : i32
    scf.if %2 {
      %cst = arith.constant 0.000000e+00 : f32
      %11 = vector.broadcast %cst : f32 to vector<2x16xf32>
      %c0_13 = arith.constant 0 : index
      %c0_14 = arith.constant 0 : index
      %12 = vector.load %arg6[%c0_13, %c0_14] : memref<2x16xf32, #tpu.memory_space<vmem>>, vector<2x16xf32>
      tpu.vector_store %arg6[%c0_13, %c0_14], %11 {strides = array<i32>} : memref<2x16xf32, #tpu.memory_space<vmem>>, vector<2x16xf32>,
      %cst_15 = arith.constant 0.000000e+00 : f32
      %13 = vector.broadcast %cst_15 : f32 to vector<2x16xf32>
      %c0_16 = arith.constant 0 : index
      %c0_17 = arith.constant 0 : index
      %14 = vector.load %arg7[%c0_16, %c0_17] : memref<2x16xf32, #tpu.memory_space<vmem>>, vector<2x16xf32>
      tpu.vector_store %arg7[%c0_16, %c0_17], %13 {strides = array<i32>} : memref<2x16xf32, #tpu.memory_space<vmem>>, vector<2x16xf32>,
    } else {
    }
    %c0 = arith.constant 0 : index
    %c0_1 = arith.constant 0 : index
    %c0_2 = arith.constant 0 : index
    %3 = vector.load %arg4[%c0, %c0_1, %c0_2] : memref<1x16x64xf32, #tpu.memory_space<vmem>>, vector<1x16x64xf32>
    %4 = vector.shape_cast %3 : vector<1x16x64xf32> to vector<16x64xf32>
    %c0_3 = arith.constant 0 : index
    %c0_4 = arith.constant 0 : index
    %5 = vector.load %arg6[%c0_3, %c0_4] : memref<2x16xf32, #tpu.memory_space<vmem>>, vector<2x16xf32>
    %c0_5 = arith.constant 0 : index
    %c0_6 = arith.constant 0 : index
    %6 = vector.load %arg7[%c0_5, %c0_6] : memref<2x16xf32, #tpu.memory_space<vmem>>, vector<2x16xf32>
    %c0_i32_7 = arith.constant 0 : i32
    %c16_i32 = arith.constant 16 : i32
    %7 = arith.addi %c0_i32_7, %c16_i32 : i32
    %c1_i32 = arith.constant 1 : i32
    %8:2 = scf.for %arg8 = %c0_i32_7 to %7 step %c1_i32 iter_args(%arg9 = %5, %arg10 = %6) -> (vector<2x16xf32>, vector<2x16xf32>)  : i32 {
      %c1_i32_13 = arith.constant 1 : i32
      %11 = arith.subi %c1_i32_13, %arg0 : i32
      %12 = arith.muli %arg8, %11 : i32
      %c15_i32 = arith.constant 15 : i32
      %13 = arith.subi %c15_i32, %arg8 : i32
      %14 = arith.muli %13, %arg0 : i32
      %15 = arith.addi %12, %14 : i32
      %c0_14 = arith.constant 0 : index
      %16 = arith.index_cast %15 : i32 to index
      %c0_15 = arith.constant 0 : index
      %c0_16 = arith.constant 0 : index
      %17 = vector.load %arg2[%c0_14, %16, %c0_15, %c0_16] : memref<1x16x2x64xf32, #tpu.memory_space<vmem>>, vector<1x1x2x64xf32>
      %18 = vector.shape_cast %17 : vector<1x1x2x64xf32> to vector<2x64xf32>
      %19 = arith.index_cast %15 : i32 to index
      %c0_17 = arith.constant 0 : index
      %c0_18 = arith.constant 0 : index
      %20 = vector.load %arg3[%19, %c0_17, %c0_18] : memref<16x2x1xf32, #tpu.memory_space<vmem>>, vector<1x2x1xf32>
      %21 = vector.shape_cast %20 : vector<1x2x1xf32> to vector<2x1xf32>
      %cst = arith.constant dense<0.000000e+00> : vector<2x64xf32>
      %22 = tpu.matmul %arg9, %4, %cst {dimension_numbers = #tpu.dot_dimension_numbers<[1], [0], [0], [1], [0, 0, 1, 1], [], []>} : vector<2x16xf32>, vector<16x64xf32>, vector<2x64xf32> -> vector<2x64xf32>
      %23 = arith.addf %18, %22 : vector<2x64xf32>
      %24 = vector.extract_strided_slice %23 {offsets = [0, 0], sizes = [2, 16], strides = [1, 1]} : vector<2x64xf32> to vector<2x16xf32>
      %25 = arith.negf %24 : vector<2x16xf32>
      %26 = math.exp %25 : vector<2x16xf32>
      %cst_19 = arith.constant 1.000000e+00 : f32
      %27 = vector.broadcast %cst_19 : f32 to vector<2x16xf32>
      %28 = arith.addf %27, %26 : vector<2x16xf32>
      %29 = arith.divf %27, %28 : vector<2x16xf32>
      %30 = vector.extract_strided_slice %23 {offsets = [0, 16], sizes = [2, 16], strides = [1, 1]} : vector<2x64xf32> to vector<2x16xf32>
      %31 = arith.negf %30 : vector<2x16xf32>
      %32 = math.exp %31 : vector<2x16xf32>
      %cst_20 = arith.constant 1.000000e+00 : f32
      %33 = vector.broadcast %cst_20 : f32 to vector<2x16xf32>
      %34 = arith.addf %33, %32 : vector<2x16xf32>
      %35 = arith.divf %33, %34 : vector<2x16xf32>
      %36 = vector.extract_strided_slice %23 {offsets = [0, 32], sizes = [2, 16], strides = [1, 1]} : vector<2x64xf32> to vector<2x16xf32>
      %37 = math.tanh %36 : vector<2x16xf32>
      %38 = vector.extract_strided_slice %23 {offsets = [0, 48], sizes = [2, 16], strides = [1, 1]} : vector<2x64xf32> to vector<2x16xf32>
      %39 = arith.negf %38 : vector<2x16xf32>
      %40 = math.exp %39 : vector<2x16xf32>
      %cst_21 = arith.constant 1.000000e+00 : f32
      %41 = vector.broadcast %cst_21 : f32 to vector<2x16xf32>
      %42 = arith.addf %41, %40 : vector<2x16xf32>
      %43 = arith.divf %41, %42 : vector<2x16xf32>
      %44 = arith.mulf %35, %arg10 : vector<2x16xf32>
      %45 = arith.mulf %29, %37 : vector<2x16xf32>
      %46 = arith.addf %44, %45 : vector<2x16xf32>
      %47 = math.tanh %46 : vector<2x16xf32>
      %48 = arith.mulf %43, %47 : vector<2x16xf32>
      %49 = vector.broadcast %21 : vector<2x1xf32> to vector<2x16xf32>
      %50 = arith.mulf %49, %48 : vector<2x16xf32>
      %c0_22 = arith.constant 0 : index
      %51 = arith.index_cast %15 : i32 to index
      %c0_23 = arith.constant 0 : index
      %c0_24 = arith.constant 0 : index
      %52 = vector.load %arg5[%c0_22, %51, %c0_23, %c0_24] : memref<1x16x2x16xf32, #tpu.memory_space<vmem>>, vector<1x1x2x16xf32>
      %53 = vector.shape_cast %52 : vector<1x1x2x16xf32> to vector<2x16xf32>
      %54 = vector.shape_cast %50 : vector<2x16xf32> to vector<1x1x2x16xf32>
      tpu.vector_store %arg5[%c0_22, %51, %c0_23, %c0_24], %54 {strides = array<i32>} : memref<1x16x2x16xf32, #tpu.memory_space<vmem>>, vector<1x1x2x16xf32>,
      %55 = vector.broadcast %21 : vector<2x1xf32> to vector<2x16xf32>
      %56 = arith.mulf %55, %48 : vector<2x16xf32>
      %cst_25 = arith.constant 1.000000e+00 : f32
      %57 = vector.broadcast %cst_25 : f32 to vector<2x1xf32>
      %58 = arith.subf %57, %21 : vector<2x1xf32>
      %59 = vector.broadcast %58 : vector<2x1xf32> to vector<2x16xf32>
      %60 = arith.mulf %59, %arg9 : vector<2x16xf32>
      %61 = arith.addf %56, %60 : vector<2x16xf32>
      %62 = vector.broadcast %21 : vector<2x1xf32> to vector<2x16xf32>
      %63 = arith.mulf %62, %46 : vector<2x16xf32>
      %cst_26 = arith.constant 1.000000e+00 : f32
      %64 = vector.broadcast %cst_26 : f32 to vector<2x1xf32>
      %65 = arith.subf %64, %21 : vector<2x1xf32>
      %66 = vector.broadcast %65 : vector<2x1xf32> to vector<2x16xf32>
      %67 = arith.mulf %66, %arg10 : vector<2x16xf32>
      %68 = arith.addf %63, %67 : vector<2x16xf32>
      scf.yield %61, %68 : vector<2x16xf32>, vector<2x16xf32>
    }
    %c16_i32_8 = arith.constant 16 : i32
    %c0_9 = arith.constant 0 : index
    %c0_10 = arith.constant 0 : index
    %9 = vector.load %arg6[%c0_9, %c0_10] : memref<2x16xf32, #tpu.memory_space<vmem>>, vector<2x16xf32>
    tpu.vector_store %arg6[%c0_9, %c0_10], %8#0 {strides = array<i32>} : memref<2x16xf32, #tpu.memory_space<vmem>>, vector<2x16xf32>,
    %c0_11 = arith.constant 0 : index
    %c0_12 = arith.constant 0 : index
    %10 = vector.load %arg7[%c0_11, %c0_12] : memref<2x16xf32, #tpu.memory_space<vmem>>, vector<2x16xf32>
    tpu.vector_store %arg7[%c0_11, %c0_12], %8#1 {strides = array<i32>} : memref<2x16xf32, #tpu.memory_space<vmem>>, vector<2x16xf32>,
    return
  }
  func.func @transform_0(%arg0: i32, %arg1: i32) -> (i32, i32, i32, i32) {
    %c1_i32 = arith.constant 1 : i32
    %0 = arith.subi %c1_i32, %arg0 : i32
    %1 = arith.muli %arg1, %0 : i32
    %c0_i32 = arith.constant 0 : i32
    %2 = arith.subi %c0_i32, %arg1 : i32
    %3 = arith.muli %2, %arg0 : i32
    %4 = arith.addi %1, %3 : i32
    %c0_i32_0 = arith.constant 0 : i32
    %c0_i32_1 = arith.constant 0 : i32
    %c0_i32_2 = arith.constant 0 : i32
    return %arg0, %4, %c0_i32_0, %c0_i32_1 : i32, i32, i32, i32
  }
  func.func @transform_1(%arg0: i32, %arg1: i32) -> (i32, i32, i32) {
    %c1_i32 = arith.constant 1 : i32
    %0 = arith.subi %c1_i32, %arg0 : i32
    %1 = arith.muli %arg1, %0 : i32
    %c0_i32 = arith.constant 0 : i32
    %2 = arith.subi %c0_i32, %arg1 : i32
    %3 = arith.muli %2, %arg0 : i32
    %4 = arith.addi %1, %3 : i32
    %c0_i32_0 = arith.constant 0 : i32
    %c0_i32_1 = arith.constant 0 : i32
    %c0_i32_2 = arith.constant 0 : i32
    return %4, %c0_i32_0, %c0_i32_1 : i32, i32, i32
  }
  func.func @transform_2(%arg0: i32, %arg1: i32) -> (i32, i32, i32) {
    %c0_i32 = arith.constant 0 : i32
    %c0_i32_0 = arith.constant 0 : i32
    %c0_i32_1 = arith.constant 0 : i32
    return %arg0, %c0_i32, %c0_i32_0 : i32, i32, i32
  }
  func.func @transform_3(%arg0: i32, %arg1: i32) -> (i32, i32, i32, i32) {
    %c1_i32 = arith.constant 1 : i32
    %0 = arith.subi %c1_i32, %arg0 : i32
    %1 = arith.muli %arg1, %0 : i32
    %c0_i32 = arith.constant 0 : i32
    %2 = arith.subi %c0_i32, %arg1 : i32
    %3 = arith.muli %2, %arg0 : i32
    %4 = arith.addi %1, %3 : i32
    %c0_i32_0 = arith.constant 0 : i32
    %c0_i32_1 = arith.constant 0 : i32
    %c0_i32_2 = arith.constant 0 : i32
    return %arg0, %4, %c0_i32_0, %c0_i32_1 : i32, i32, i32, i32
  }
}

module attributes {stable_mosaic.version = 11 : i64} {
  func.func @_matmul_bias_kernel(%arg0: i32, %arg1: memref<24x16xf32, #tpu.memory_space<vmem>>, %arg2: memref<16x128xf32, #tpu.memory_space<vmem>>, %arg3: memref<1x128xf32, #tpu.memory_space<vmem>>, %arg4: memref<24x128xf32, #tpu.memory_space<vmem>>) attributes {dimension_semantics = [#tpu.dimension_semantics<parallel>], iteration_bounds = array<i64: 1>, scalar_prefetch = 0 : i64, scratch_operands = 0 : i64, tpu.core_type = #tpu.core_type<tc>, window_params = [{transform_indices = @transform_0, window_bounds = array<i64: 24, 16>}, {pipeline_mode = #tpu.pipeline_mode<synchronous>, transform_indices = @transform_1, window_bounds = array<i64: 16, 128>}, {pipeline_mode = #tpu.pipeline_mode<synchronous>, transform_indices = @transform_2, window_bounds = array<i64: 1, 128>}, {transform_indices = @transform_3, window_bounds = array<i64: 24, 128>}]} {
    %c0 = arith.constant 0 : index
    %c0_0 = arith.constant 0 : index
    %0 = vector.load %arg1[%c0, %c0_0] : memref<24x16xf32, #tpu.memory_space<vmem>>, vector<24x16xf32>
    %c0_1 = arith.constant 0 : index
    %c0_2 = arith.constant 0 : index
    %1 = vector.load %arg2[%c0_1, %c0_2] : memref<16x128xf32, #tpu.memory_space<vmem>>, vector<16x128xf32>
    %cst = arith.constant dense<0.000000e+00> : vector<24x128xf32>
    %2 = tpu.matmul %0, %1, %cst {dimension_numbers = #tpu.dot_dimension_numbers<[1], [0], [0], [1], [0, 0, 1, 1], [], []>} : vector<24x16xf32>, vector<16x128xf32>, vector<24x128xf32> -> vector<24x128xf32>
    %c0_3 = arith.constant 0 : index
    %c0_4 = arith.constant 0 : index
    %3 = vector.load %arg3[%c0_3, %c0_4] : memref<1x128xf32, #tpu.memory_space<vmem>>, vector<1x128xf32>
    %4 = vector.broadcast %3 : vector<1x128xf32> to vector<24x128xf32>
    %5 = arith.addf %2, %4 : vector<24x128xf32>
    %c0_5 = arith.constant 0 : index
    %c0_6 = arith.constant 0 : index
    %6 = vector.load %arg4[%c0_5, %c0_6] : memref<24x128xf32, #tpu.memory_space<vmem>>, vector<24x128xf32>
    tpu.vector_store %arg4[%c0_5, %c0_6], %5 {strides = array<i32>} : memref<24x128xf32, #tpu.memory_space<vmem>>, vector<24x128xf32>,
    return
  }
  func.func @transform_0(%arg0: i32) -> (i32, i32) {
    %c0_i32 = arith.constant 0 : i32
    %c0_i32_0 = arith.constant 0 : i32
    return %arg0, %c0_i32 : i32, i32
  }
  func.func @transform_1(%arg0: i32) -> (i32, i32) {
    %c0_i32 = arith.constant 0 : i32
    %c0_i32_0 = arith.constant 0 : i32
    %c0_i32_1 = arith.constant 0 : i32
    return %c0_i32, %c0_i32_0 : i32, i32
  }
  func.func @transform_2(%arg0: i32) -> (i32, i32) {
    %c0_i32 = arith.constant 0 : i32
    %c0_i32_0 = arith.constant 0 : i32
    %c0_i32_1 = arith.constant 0 : i32
    return %c0_i32, %c0_i32_0 : i32, i32
  }
  func.func @transform_3(%arg0: i32) -> (i32, i32) {
    %c0_i32 = arith.constant 0 : i32
    %c0_i32_0 = arith.constant 0 : i32
    return %arg0, %c0_i32 : i32, i32
  }
}

module attributes {stable_mosaic.version = 11 : i64} {
  func.func @_bilstm_rec_kernel(%arg0: i32, %arg1: i32, %arg2: memref<1x10x2x64xf32, #tpu.memory_space<vmem>>, %arg3: memref<10x2x1xf32, #tpu.memory_space<vmem>>, %arg4: memref<1x16x64xf32, #tpu.memory_space<vmem>>, %arg5: memref<1x10x2x16xf32, #tpu.memory_space<vmem>>, %arg6: memref<2x16xf32, #tpu.memory_space<vmem>>, %arg7: memref<2x16xf32, #tpu.memory_space<vmem>>) attributes {dimension_semantics = [#tpu.dimension_semantics<parallel>, #tpu.dimension_semantics<arbitrary>], iteration_bounds = array<i64: 2, 1>, scalar_prefetch = 0 : i64, scratch_operands = 2 : i64, tpu.core_type = #tpu.core_type<tc>, window_params = [{transform_indices = @transform_0, window_bounds = array<i64: 1, 10, 2, 64>}, {transform_indices = @transform_1, window_bounds = array<i64: 10, 2, 1>}, {transform_indices = @transform_2, window_bounds = array<i64: 1, 16, 64>}, {transform_indices = @transform_3, window_bounds = array<i64: 1, 10, 2, 16>}]} {
    %c0_i32 = arith.constant 0 : i32
    %0 = arith.cmpi eq, %arg1, %c0_i32 : i32
    %1 = arith.extui %0 : i1 to i32
    %c0_i32_0 = arith.constant 0 : i32
    %2 = arith.cmpi ne, %1, %c0_i32_0 : i32
    scf.if %2 {
      %cst = arith.constant 0.000000e+00 : f32
      %11 = vector.broadcast %cst : f32 to vector<2x16xf32>
      %c0_13 = arith.constant 0 : index
      %c0_14 = arith.constant 0 : index
      %12 = vector.load %arg6[%c0_13, %c0_14] : memref<2x16xf32, #tpu.memory_space<vmem>>, vector<2x16xf32>
      tpu.vector_store %arg6[%c0_13, %c0_14], %11 {strides = array<i32>} : memref<2x16xf32, #tpu.memory_space<vmem>>, vector<2x16xf32>,
      %cst_15 = arith.constant 0.000000e+00 : f32
      %13 = vector.broadcast %cst_15 : f32 to vector<2x16xf32>
      %c0_16 = arith.constant 0 : index
      %c0_17 = arith.constant 0 : index
      %14 = vector.load %arg7[%c0_16, %c0_17] : memref<2x16xf32, #tpu.memory_space<vmem>>, vector<2x16xf32>
      tpu.vector_store %arg7[%c0_16, %c0_17], %13 {strides = array<i32>} : memref<2x16xf32, #tpu.memory_space<vmem>>, vector<2x16xf32>,
    } else {
    }
    %c0 = arith.constant 0 : index
    %c0_1 = arith.constant 0 : index
    %c0_2 = arith.constant 0 : index
    %3 = vector.load %arg4[%c0, %c0_1, %c0_2] : memref<1x16x64xf32, #tpu.memory_space<vmem>>, vector<1x16x64xf32>
    %4 = vector.shape_cast %3 : vector<1x16x64xf32> to vector<16x64xf32>
    %c0_3 = arith.constant 0 : index
    %c0_4 = arith.constant 0 : index
    %5 = vector.load %arg6[%c0_3, %c0_4] : memref<2x16xf32, #tpu.memory_space<vmem>>, vector<2x16xf32>
    %c0_5 = arith.constant 0 : index
    %c0_6 = arith.constant 0 : index
    %6 = vector.load %arg7[%c0_5, %c0_6] : memref<2x16xf32, #tpu.memory_space<vmem>>, vector<2x16xf32>
    %c0_i32_7 = arith.constant 0 : i32
    %c10_i32 = arith.constant 10 : i32
    %7 = arith.addi %c0_i32_7, %c10_i32 : i32
    %c1_i32 = arith.constant 1 : i32
    %8:2 = scf.for %arg8 = %c0_i32_7 to %7 step %c1_i32 iter_args(%arg9 = %5, %arg10 = %6) -> (vector<2x16xf32>, vector<2x16xf32>)  : i32 {
      %c1_i32_13 = arith.constant 1 : i32
      %11 = arith.subi %c1_i32_13, %arg0 : i32
      %12 = arith.muli %arg8, %11 : i32
      %c9_i32 = arith.constant 9 : i32
      %13 = arith.subi %c9_i32, %arg8 : i32
      %14 = arith.muli %13, %arg0 : i32
      %15 = arith.addi %12, %14 : i32
      %c0_14 = arith.constant 0 : index
      %16 = arith.index_cast %15 : i32 to index
      %c0_15 = arith.constant 0 : index
      %c0_16 = arith.constant 0 : index
      %17 = vector.load %arg2[%c0_14, %16, %c0_15, %c0_16] : memref<1x10x2x64xf32, #tpu.memory_space<vmem>>, vector<1x1x2x64xf32>
      %18 = vector.shape_cast %17 : vector<1x1x2x64xf32> to vector<2x64xf32>
      %19 = arith.index_cast %15 : i32 to index
      %c0_17 = arith.constant 0 : index
      %c0_18 = arith.constant 0 : index
      %20 = vector.load %arg3[%19, %c0_17, %c0_18] : memref<10x2x1xf32, #tpu.memory_space<vmem>>, vector<1x2x1xf32>
      %21 = vector.shape_cast %20 : vector<1x2x1xf32> to vector<2x1xf32>
      %cst = arith.constant dense<0.000000e+00> : vector<2x64xf32>
      %22 = tpu.matmul %arg9, %4, %cst {dimension_numbers = #tpu.dot_dimension_numbers<[1], [0], [0], [1], [0, 0, 1, 1], [], []>} : vector<2x16xf32>, vector<16x64xf32>, vector<2x64xf32> -> vector<2x64xf32>
      %23 = arith.addf %18, %22 : vector<2x64xf32>
      %24 = vector.extract_strided_slice %23 {offsets = [0, 0], sizes = [2, 16], strides = [1, 1]} : vector<2x64xf32> to vector<2x16xf32>
      %25 = arith.negf %24 : vector<2x16xf32>
      %26 = math.exp %25 : vector<2x16xf32>
      %cst_19 = arith.constant 1.000000e+00 : f32
      %27 = vector.broadcast %cst_19 : f32 to vector<2x16xf32>
      %28 = arith.addf %27, %26 : vector<2x16xf32>
      %29 = arith.divf %27, %28 : vector<2x16xf32>
      %30 = vector.extract_strided_slice %23 {offsets = [0, 16], sizes = [2, 16], strides = [1, 1]} : vector<2x64xf32> to vector<2x16xf32>
      %31 = arith.negf %30 : vector<2x16xf32>
      %32 = math.exp %31 : vector<2x16xf32>
      %cst_20 = arith.constant 1.000000e+00 : f32
      %33 = vector.broadcast %cst_20 : f32 to vector<2x16xf32>
      %34 = arith.addf %33, %32 : vector<2x16xf32>
      %35 = arith.divf %33, %34 : vector<2x16xf32>
      %36 = vector.extract_strided_slice %23 {offsets = [0, 32], sizes = [2, 16], strides = [1, 1]} : vector<2x64xf32> to vector<2x16xf32>
      %37 = math.tanh %36 : vector<2x16xf32>
      %38 = vector.extract_strided_slice %23 {offsets = [0, 48], sizes = [2, 16], strides = [1, 1]} : vector<2x64xf32> to vector<2x16xf32>
      %39 = arith.negf %38 : vector<2x16xf32>
      %40 = math.exp %39 : vector<2x16xf32>
      %cst_21 = arith.constant 1.000000e+00 : f32
      %41 = vector.broadcast %cst_21 : f32 to vector<2x16xf32>
      %42 = arith.addf %41, %40 : vector<2x16xf32>
      %43 = arith.divf %41, %42 : vector<2x16xf32>
      %44 = arith.mulf %35, %arg10 : vector<2x16xf32>
      %45 = arith.mulf %29, %37 : vector<2x16xf32>
      %46 = arith.addf %44, %45 : vector<2x16xf32>
      %47 = math.tanh %46 : vector<2x16xf32>
      %48 = arith.mulf %43, %47 : vector<2x16xf32>
      %49 = vector.broadcast %21 : vector<2x1xf32> to vector<2x16xf32>
      %50 = arith.mulf %49, %48 : vector<2x16xf32>
      %c0_22 = arith.constant 0 : index
      %51 = arith.index_cast %15 : i32 to index
      %c0_23 = arith.constant 0 : index
      %c0_24 = arith.constant 0 : index
      %52 = vector.load %arg5[%c0_22, %51, %c0_23, %c0_24] : memref<1x10x2x16xf32, #tpu.memory_space<vmem>>, vector<1x1x2x16xf32>
      %53 = vector.shape_cast %52 : vector<1x1x2x16xf32> to vector<2x16xf32>
      %54 = vector.shape_cast %50 : vector<2x16xf32> to vector<1x1x2x16xf32>
      tpu.vector_store %arg5[%c0_22, %51, %c0_23, %c0_24], %54 {strides = array<i32>} : memref<1x10x2x16xf32, #tpu.memory_space<vmem>>, vector<1x1x2x16xf32>,
      %55 = vector.broadcast %21 : vector<2x1xf32> to vector<2x16xf32>
      %56 = arith.mulf %55, %48 : vector<2x16xf32>
      %cst_25 = arith.constant 1.000000e+00 : f32
      %57 = vector.broadcast %cst_25 : f32 to vector<2x1xf32>
      %58 = arith.subf %57, %21 : vector<2x1xf32>
      %59 = vector.broadcast %58 : vector<2x1xf32> to vector<2x16xf32>
      %60 = arith.mulf %59, %arg9 : vector<2x16xf32>
      %61 = arith.addf %56, %60 : vector<2x16xf32>
      %62 = vector.broadcast %21 : vector<2x1xf32> to vector<2x16xf32>
      %63 = arith.mulf %62, %46 : vector<2x16xf32>
      %cst_26 = arith.constant 1.000000e+00 : f32
      %64 = vector.broadcast %cst_26 : f32 to vector<2x1xf32>
      %65 = arith.subf %64, %21 : vector<2x1xf32>
      %66 = vector.broadcast %65 : vector<2x1xf32> to vector<2x16xf32>
      %67 = arith.mulf %66, %arg10 : vector<2x16xf32>
      %68 = arith.addf %63, %67 : vector<2x16xf32>
      scf.yield %61, %68 : vector<2x16xf32>, vector<2x16xf32>
    }
    %c10_i32_8 = arith.constant 10 : i32
    %c0_9 = arith.constant 0 : index
    %c0_10 = arith.constant 0 : index
    %9 = vector.load %arg6[%c0_9, %c0_10] : memref<2x16xf32, #tpu.memory_space<vmem>>, vector<2x16xf32>
    tpu.vector_store %arg6[%c0_9, %c0_10], %8#0 {strides = array<i32>} : memref<2x16xf32, #tpu.memory_space<vmem>>, vector<2x16xf32>,
    %c0_11 = arith.constant 0 : index
    %c0_12 = arith.constant 0 : index
    %10 = vector.load %arg7[%c0_11, %c0_12] : memref<2x16xf32, #tpu.memory_space<vmem>>, vector<2x16xf32>
    tpu.vector_store %arg7[%c0_11, %c0_12], %8#1 {strides = array<i32>} : memref<2x16xf32, #tpu.memory_space<vmem>>, vector<2x16xf32>,
    return
  }
  func.func @transform_0(%arg0: i32, %arg1: i32) -> (i32, i32, i32, i32) {
    %c1_i32 = arith.constant 1 : i32
    %0 = arith.subi %c1_i32, %arg0 : i32
    %1 = arith.muli %arg1, %0 : i32
    %c0_i32 = arith.constant 0 : i32
    %2 = arith.subi %c0_i32, %arg1 : i32
    %3 = arith.muli %2, %arg0 : i32
    %4 = arith.addi %1, %3 : i32
    %c0_i32_0 = arith.constant 0 : i32
    %c0_i32_1 = arith.constant 0 : i32
    %c0_i32_2 = arith.constant 0 : i32
    return %arg0, %4, %c0_i32_0, %c0_i32_1 : i32, i32, i32, i32
  }
  func.func @transform_1(%arg0: i32, %arg1: i32) -> (i32, i32, i32) {
    %c1_i32 = arith.constant 1 : i32
    %0 = arith.subi %c1_i32, %arg0 : i32
    %1 = arith.muli %arg1, %0 : i32
    %c0_i32 = arith.constant 0 : i32
    %2 = arith.subi %c0_i32, %arg1 : i32
    %3 = arith.muli %2, %arg0 : i32
    %4 = arith.addi %1, %3 : i32
    %c0_i32_0 = arith.constant 0 : i32
    %c0_i32_1 = arith.constant 0 : i32
    %c0_i32_2 = arith.constant 0 : i32
    return %4, %c0_i32_0, %c0_i32_1 : i32, i32, i32
  }
  func.func @transform_2(%arg0: i32, %arg1: i32) -> (i32, i32, i32) {
    %c0_i32 = arith.constant 0 : i32
    %c0_i32_0 = arith.constant 0 : i32
    %c0_i32_1 = arith.constant 0 : i32
    return %arg0, %c0_i32, %c0_i32_0 : i32, i32, i32
  }
  func.func @transform_3(%arg0: i32, %arg1: i32) -> (i32, i32, i32, i32) {
    %c1_i32 = arith.constant 1 : i32
    %0 = arith.subi %c1_i32, %arg0 : i32
    %1 = arith.muli %arg1, %0 : i32
    %c0_i32 = arith.constant 0 : i32
    %2 = arith.subi %c0_i32, %arg1 : i32
    %3 = arith.muli %2, %arg0 : i32
    %4 = arith.addi %1, %3 : i32
    %c0_i32_0 = arith.constant 0 : i32
    %c0_i32_1 = arith.constant 0 : i32
    %c0_i32_2 = arith.constant 0 : i32
    return %arg0, %4, %c0_i32_0, %c0_i32_1 : i32, i32, i32, i32
  }
}

module attributes {stable_mosaic.version = 11 : i64} {
  func.func @_attention_kernel(%arg0: i32, %arg1: memref<1x16x32xf32, #tpu.memory_space<vmem>>, %arg2: memref<1x10x32xf32, #tpu.memory_space<vmem>>, %arg3: memref<1x16x1xf32, #tpu.memory_space<vmem>>, %arg4: memref<1x1x10xf32, #tpu.memory_space<vmem>>, %arg5: memref<1x32xf32, #tpu.memory_space<vmem>>, %arg6: memref<1x32xf32, #tpu.memory_space<vmem>>, %arg7: memref<1x32xf32, #tpu.memory_space<vmem>>, %arg8: memref<1x1xf32, #tpu.memory_space<vmem>>, %arg9: memref<1x16x128xf32, #tpu.memory_space<vmem>>) attributes {dimension_semantics = [#tpu.dimension_semantics<parallel>], iteration_bounds = array<i64: 2>, scalar_prefetch = 0 : i64, scratch_operands = 0 : i64, tpu.core_type = #tpu.core_type<tc>, window_params = [{transform_indices = @transform_0, window_bounds = array<i64: 1, 16, 32>}, {transform_indices = @transform_1, window_bounds = array<i64: 1, 10, 32>}, {transform_indices = @transform_2, window_bounds = array<i64: 1, 16, 1>}, {transform_indices = @transform_3, window_bounds = array<i64: 1, 1, 10>}, {pipeline_mode = #tpu.pipeline_mode<synchronous>, transform_indices = @transform_4, window_bounds = array<i64: 1, 32>}, {pipeline_mode = #tpu.pipeline_mode<synchronous>, transform_indices = @transform_5, window_bounds = array<i64: 1, 32>}, {pipeline_mode = #tpu.pipeline_mode<synchronous>, transform_indices = @transform_6, window_bounds = array<i64: 1, 32>}, {pipeline_mode = #tpu.pipeline_mode<synchronous>, transform_indices = @transform_7, window_bounds = array<i64: 1, 1>}, {transform_indices = @transform_8, window_bounds = array<i64: 1, 16, 128>}]} {
    %c0 = arith.constant 0 : index
    %c0_0 = arith.constant 0 : index
    %c0_1 = arith.constant 0 : index
    %0 = vector.load %arg1[%c0, %c0_0, %c0_1] : memref<1x16x32xf32, #tpu.memory_space<vmem>>, vector<1x16x32xf32>
    %1 = vector.shape_cast %0 : vector<1x16x32xf32> to vector<16x32xf32>
    %c0_2 = arith.constant 0 : index
    %c0_3 = arith.constant 0 : index
    %c0_4 = arith.constant 0 : index
    %2 = vector.load %arg2[%c0_2, %c0_3, %c0_4] : memref<1x10x32xf32, #tpu.memory_space<vmem>>, vector<1x10x32xf32>
    %3 = vector.shape_cast %2 : vector<1x10x32xf32> to vector<10x32xf32>
    %c0_5 = arith.constant 0 : index
    %c0_6 = arith.constant 0 : index
    %c0_7 = arith.constant 0 : index
    %4 = vector.load %arg3[%c0_5, %c0_6, %c0_7] : memref<1x16x1xf32, #tpu.memory_space<vmem>>, vector<1x16x1xf32>
    %5 = vector.shape_cast %4 : vector<1x16x1xf32> to vector<16x1xf32>
    %c0_8 = arith.constant 0 : index
    %c0_9 = arith.constant 0 : index
    %c0_10 = arith.constant 0 : index
    %6 = vector.load %arg4[%c0_8, %c0_9, %c0_10] : memref<1x1x10xf32, #tpu.memory_space<vmem>>, vector<1x1x10xf32>
    %7 = vector.shape_cast %6 : vector<1x1x10xf32> to vector<1x10xf32>
    %c0_11 = arith.constant 0 : index
    %c0_12 = arith.constant 0 : index
    %8 = vector.load %arg5[%c0_11, %c0_12] : memref<1x32xf32, #tpu.memory_space<vmem>>, vector<1x32xf32>
    %cst = arith.constant dense<0.000000e+00> : vector<16x1xf32>
    %9 = tpu.matmul %1, %8, %cst {dimension_numbers = #tpu.dot_dimension_numbers<[1], [1], [0], [0], [0, 0, 1, 0], [], []>} : vector<16x32xf32>, vector<1x32xf32>, vector<16x1xf32> -> vector<16x1xf32>
    %c0_13 = arith.constant 0 : index
    %c0_14 = arith.constant 0 : index
    %10 = vector.load %arg6[%c0_13, %c0_14] : memref<1x32xf32, #tpu.memory_space<vmem>>, vector<1x32xf32>
    %cst_15 = arith.constant dense<0.000000e+00> : vector<1x10xf32>
    %11 = tpu.matmul %10, %3, %cst_15 {dimension_numbers = #tpu.dot_dimension_numbers<[1], [1], [0], [0], [0, 0, 1, 0], [], []>} : vector<1x32xf32>, vector<10x32xf32>, vector<1x10xf32> -> vector<1x10xf32>
    %c0_16 = arith.constant 0 : index
    %c0_17 = arith.constant 0 : index
    %12 = vector.load %arg7[%c0_16, %c0_17] : memref<1x32xf32, #tpu.memory_space<vmem>>, vector<1x32xf32>
    %13 = vector.broadcast %12 : vector<1x32xf32> to vector<16x32xf32>
    %14 = arith.mulf %1, %13 : vector<16x32xf32>
    %cst_18 = arith.constant dense<0.000000e+00> : vector<16x10xf32>
    %15 = tpu.matmul %14, %3, %cst_18 {dimension_numbers = #tpu.dot_dimension_numbers<[1], [1], [0], [0], [0, 0, 1, 0], [], []>} : vector<16x32xf32>, vector<10x32xf32>, vector<16x10xf32> -> vector<16x10xf32>
    %16 = vector.broadcast %9 : vector<16x1xf32> to vector<16x10xf32>
    %17 = vector.broadcast %11 : vector<1x10xf32> to vector<16x10xf32>
    %18 = arith.addf %16, %17 : vector<16x10xf32>
    %19 = arith.addf %18, %15 : vector<16x10xf32>
    %c0_19 = arith.constant 0 : index
    %c0_20 = arith.constant 0 : index
    %20 = vector.load %arg8[%c0_19, %c0_20] : memref<1x1xf32, #tpu.memory_space<vmem>>, vector<1x1xf32>
    %21 = vector.broadcast %20 : vector<1x1xf32> to vector<16x10xf32>
    %22 = arith.addf %19, %21 : vector<16x10xf32>
    %23 = vector.broadcast %7 : vector<1x10xf32> to vector<16x10xf32>
    %24 = arith.mulf %23, %22 : vector<16x10xf32>
    %cst_21 = arith.constant 1.000000e+00 : f32
    %25 = vector.broadcast %cst_21 : f32 to vector<1x10xf32>
    %26 = arith.subf %25, %7 : vector<1x10xf32>
    %cst_22 = arith.constant -1.000000e+30 : f32
    %27 = vector.broadcast %cst_22 : f32 to vector<1x10xf32>
    %28 = arith.mulf %26, %27 : vector<1x10xf32>
    %29 = vector.broadcast %28 : vector<1x10xf32> to vector<16x10xf32>
    %30 = arith.addf %24, %29 : vector<16x10xf32>
    %cst_23 = arith.constant dense<0xFF800000> : vector<16xf32>
    %31 = vector.multi_reduction <maximumf>, %30, %cst_23 [1] : vector<16x10xf32> to vector<16xf32>
    %32 = vector.shape_cast %31 : vector<16xf32> to vector<16x1xf32>
    %33 = vector.broadcast %32 : vector<16x1xf32> to vector<16x10xf32>
    %34 = arith.subf %30, %33 : vector<16x10xf32>
    %35 = math.exp %34 : vector<16x10xf32>
    %cst_24 = arith.constant dense<0.000000e+00> : vector<16xf32>
    %36 = vector.multi_reduction <add>, %35, %cst_24 [1] : vector<16x10xf32> to vector<16xf32>
    %37 = vector.shape_cast %36 : vector<16xf32> to vector<16x1xf32>
    %38 = tpu.reciprocal %37 {approx = true} : vector<16x1xf32> -> vector<16x1xf32>
    %39 = vector.broadcast %38 : vector<16x1xf32> to vector<16x10xf32>
    %40 = arith.mulf %35, %39 : vector<16x10xf32>
    %41 = vector.broadcast %5 : vector<16x1xf32> to vector<16x10xf32>
    %42 = arith.mulf %41, %22 : vector<16x10xf32>
    %cst_25 = arith.constant 1.000000e+00 : f32
    %43 = vector.broadcast %cst_25 : f32 to vector<16x1xf32>
    %44 = arith.subf %43, %5 : vector<16x1xf32>
    %cst_26 = arith.constant -1.000000e+30 : f32
    %45 = vector.broadcast %cst_26 : f32 to vector<16x1xf32>
    %46 = arith.mulf %44, %45 : vector<16x1xf32>
    %47 = vector.broadcast %46 : vector<16x1xf32> to vector<16x10xf32>
    %48 = arith.addf %42, %47 : vector<16x10xf32>
    %cst_27 = arith.constant dense<0xFF800000> : vector<10xf32>
    %49 = vector.multi_reduction <maximumf>, %48, %cst_27 [0] : vector<16x10xf32> to vector<10xf32>
    %50 = vector.shape_cast %49 : vector<10xf32> to vector<1x10xf32>
    %51 = vector.broadcast %50 : vector<1x10xf32> to vector<16x10xf32>
    %52 = arith.subf %48, %51 : vector<16x10xf32>
    %53 = math.exp %52 : vector<16x10xf32>
    %cst_28 = arith.constant dense<0.000000e+00> : vector<10xf32>
    %54 = vector.multi_reduction <add>, %53, %cst_28 [0] : vector<16x10xf32> to vector<10xf32>
    %55 = vector.shape_cast %54 : vector<10xf32> to vector<1x10xf32>
    %56 = tpu.reciprocal %55 {approx = true} : vector<1x10xf32> -> vector<1x10xf32>
    %57 = vector.broadcast %56 : vector<1x10xf32> to vector<16x10xf32>
    %58 = arith.mulf %53, %57 : vector<16x10xf32>
    %cst_29 = arith.constant dense<0.000000e+00> : vector<16x32xf32>
    %59 = tpu.matmul %40, %3, %cst_29 {dimension_numbers = #tpu.dot_dimension_numbers<[1], [0], [0], [1], [0, 0, 1, 1], [], []>} : vector<16x10xf32>, vector<10x32xf32>, vector<16x32xf32> -> vector<16x32xf32>
    %cst_30 = arith.constant dense<0.000000e+00> : vector<16x16xf32>
    %60 = tpu.matmul %40, %58, %cst_30 {dimension_numbers = #tpu.dot_dimension_numbers<[1], [1], [0], [0], [0, 0, 1, 0], [], []>} : vector<16x10xf32>, vector<16x10xf32>, vector<16x16xf32> -> vector<16x16xf32>
    %cst_31 = arith.constant dense<0.000000e+00> : vector<16x32xf32>
    %61 = tpu.matmul %60, %1, %cst_31 {dimension_numbers = #tpu.dot_dimension_numbers<[1], [0], [0], [1], [0, 0, 1, 1], [], []>} : vector<16x16xf32>, vector<16x32xf32>, vector<16x32xf32> -> vector<16x32xf32>
    %62 = arith.mulf %1, %59 : vector<16x32xf32>
    %63 = arith.mulf %1, %61 : vector<16x32xf32>
    %64 = tpu.concatenate %1, %59, %62, %63 in 1 : vector<16x32xf32>, vector<16x32xf32>, vector<16x32xf32>, vector<16x32xf32> -> vector<16x128xf32>
    %c0_32 = arith.constant 0 : index
    %c0_33 = arith.constant 0 : index
    %c0_34 = arith.constant 0 : index
    %65 = vector.load %arg9[%c0_32, %c0_33, %c0_34] : memref<1x16x128xf32, #tpu.memory_space<vmem>>, vector<1x16x128xf32>
    %66 = vector.shape_cast %65 : vector<1x16x128xf32> to vector<16x128xf32>
    %67 = vector.shape_cast %64 : vector<16x128xf32> to vector<1x16x128xf32>
    tpu.vector_store %arg9[%c0_32, %c0_33, %c0_34], %67 {strides = array<i32>} : memref<1x16x128xf32, #tpu.memory_space<vmem>>, vector<1x16x128xf32>,
    return
  }
  func.func @transform_0(%arg0: i32) -> (i32, i32, i32) {
    %c0_i32 = arith.constant 0 : i32
    %c0_i32_0 = arith.constant 0 : i32
    %c0_i32_1 = arith.constant 0 : i32
    return %arg0, %c0_i32, %c0_i32_0 : i32, i32, i32
  }
  func.func @transform_1(%arg0: i32) -> (i32, i32, i32) {
    %c0_i32 = arith.constant 0 : i32
    %c0_i32_0 = arith.constant 0 : i32
    %c0_i32_1 = arith.constant 0 : i32
    return %arg0, %c0_i32, %c0_i32_0 : i32, i32, i32
  }
  func.func @transform_2(%arg0: i32) -> (i32, i32, i32) {
    %c0_i32 = arith.constant 0 : i32
    %c0_i32_0 = arith.constant 0 : i32
    %c0_i32_1 = arith.constant 0 : i32
    return %arg0, %c0_i32, %c0_i32_0 : i32, i32, i32
  }
  func.func @transform_3(%arg0: i32) -> (i32, i32, i32) {
    %c0_i32 = arith.constant 0 : i32
    %c0_i32_0 = arith.constant 0 : i32
    %c0_i32_1 = arith.constant 0 : i32
    return %arg0, %c0_i32, %c0_i32_0 : i32, i32, i32
  }
  func.func @transform_4(%arg0: i32) -> (i32, i32) {
    %c0_i32 = arith.constant 0 : i32
    %c0_i32_0 = arith.constant 0 : i32
    %c0_i32_1 = arith.constant 0 : i32
    return %c0_i32, %c0_i32_0 : i32, i32
  }
  func.func @transform_5(%arg0: i32) -> (i32, i32) {
    %c0_i32 = arith.constant 0 : i32
    %c0_i32_0 = arith.constant 0 : i32
    %c0_i32_1 = arith.constant 0 : i32
    return %c0_i32, %c0_i32_0 : i32, i32
  }
  func.func @transform_6(%arg0: i32) -> (i32, i32) {
    %c0_i32 = arith.constant 0 : i32
    %c0_i32_0 = arith.constant 0 : i32
    %c0_i32_1 = arith.constant 0 : i32
    return %c0_i32, %c0_i32_0 : i32, i32
  }
  func.func @transform_7(%arg0: i32) -> (i32, i32) {
    %c0_i32 = arith.constant 0 : i32
    %c0_i32_0 = arith.constant 0 : i32
    %c0_i32_1 = arith.constant 0 : i32
    return %c0_i32, %c0_i32_0 : i32, i32
  }
  func.func @transform_8(%arg0: i32) -> (i32, i32, i32) {
    %c0_i32 = arith.constant 0 : i32
    %c0_i32_0 = arith.constant 0 : i32
    %c0_i32_1 = arith.constant 0 : i32
    return %arg0, %c0_i32, %c0_i32_0 : i32, i32, i32
  }
}

module attributes {stable_mosaic.version = 11 : i64} {
  func.func @_matmul_bias_kernel(%arg0: i32, %arg1: memref<32x32xf32, #tpu.memory_space<vmem>>, %arg2: memref<32x128xf32, #tpu.memory_space<vmem>>, %arg3: memref<1x128xf32, #tpu.memory_space<vmem>>, %arg4: memref<32x128xf32, #tpu.memory_space<vmem>>) attributes {dimension_semantics = [#tpu.dimension_semantics<parallel>], iteration_bounds = array<i64: 1>, scalar_prefetch = 0 : i64, scratch_operands = 0 : i64, tpu.core_type = #tpu.core_type<tc>, window_params = [{transform_indices = @transform_0, window_bounds = array<i64: 32, 32>}, {pipeline_mode = #tpu.pipeline_mode<synchronous>, transform_indices = @transform_1, window_bounds = array<i64: 32, 128>}, {pipeline_mode = #tpu.pipeline_mode<synchronous>, transform_indices = @transform_2, window_bounds = array<i64: 1, 128>}, {transform_indices = @transform_3, window_bounds = array<i64: 32, 128>}]} {
    %c0 = arith.constant 0 : index
    %c0_0 = arith.constant 0 : index
    %0 = vector.load %arg1[%c0, %c0_0] : memref<32x32xf32, #tpu.memory_space<vmem>>, vector<32x32xf32>
    %c0_1 = arith.constant 0 : index
    %c0_2 = arith.constant 0 : index
    %1 = vector.load %arg2[%c0_1, %c0_2] : memref<32x128xf32, #tpu.memory_space<vmem>>, vector<32x128xf32>
    %cst = arith.constant dense<0.000000e+00> : vector<32x128xf32>
    %2 = tpu.matmul %0, %1, %cst {dimension_numbers = #tpu.dot_dimension_numbers<[1], [0], [0], [1], [0, 0, 1, 1], [], []>} : vector<32x32xf32>, vector<32x128xf32>, vector<32x128xf32> -> vector<32x128xf32>
    %c0_3 = arith.constant 0 : index
    %c0_4 = arith.constant 0 : index
    %3 = vector.load %arg3[%c0_3, %c0_4] : memref<1x128xf32, #tpu.memory_space<vmem>>, vector<1x128xf32>
    %4 = vector.broadcast %3 : vector<1x128xf32> to vector<32x128xf32>
    %5 = arith.addf %2, %4 : vector<32x128xf32>
    %c0_5 = arith.constant 0 : index
    %c0_6 = arith.constant 0 : index
    %6 = vector.load %arg4[%c0_5, %c0_6] : memref<32x128xf32, #tpu.memory_space<vmem>>, vector<32x128xf32>
    tpu.vector_store %arg4[%c0_5, %c0_6], %5 {strides = array<i32>} : memref<32x128xf32, #tpu.memory_space<vmem>>, vector<32x128xf32>,
    return
  }
  func.func @transform_0(%arg0: i32) -> (i32, i32) {
    %c0_i32 = arith.constant 0 : i32
    %c0_i32_0 = arith.constant 0 : i32
    return %arg0, %c0_i32 : i32, i32
  }
  func.func @transform_1(%arg0: i32) -> (i32, i32) {
    %c0_i32 = arith.constant 0 : i32
    %c0_i32_0 = arith.constant 0 : i32
    %c0_i32_1 = arith.constant 0 : i32
    return %c0_i32, %c0_i32_0 : i32, i32
  }
  func.func @transform_2(%arg0: i32) -> (i32, i32) {
    %c0_i32 = arith.constant 0 : i32
    %c0_i32_0 = arith.constant 0 : i32
    %c0_i32_1 = arith.constant 0 : i32
    return %c0_i32, %c0_i32_0 : i32, i32
  }
  func.func @transform_3(%arg0: i32) -> (i32, i32) {
    %c0_i32 = arith.constant 0 : i32
    %c0_i32_0 = arith.constant 0 : i32
    return %arg0, %c0_i32 : i32, i32
  }
}

module attributes {stable_mosaic.version = 11 : i64} {
  func.func @_matmul_bias_kernel(%arg0: i32, %arg1: memref<32x128xf32, #tpu.memory_space<vmem>>, %arg2: memref<128x128xf32, #tpu.memory_space<vmem>>, %arg3: memref<1x128xf32, #tpu.memory_space<vmem>>, %arg4: memref<32x128xf32, #tpu.memory_space<vmem>>) attributes {dimension_semantics = [#tpu.dimension_semantics<parallel>], iteration_bounds = array<i64: 1>, scalar_prefetch = 0 : i64, scratch_operands = 0 : i64, tpu.core_type = #tpu.core_type<tc>, window_params = [{transform_indices = @transform_0, window_bounds = array<i64: 32, 128>}, {pipeline_mode = #tpu.pipeline_mode<synchronous>, transform_indices = @transform_1, window_bounds = array<i64: 128, 128>}, {pipeline_mode = #tpu.pipeline_mode<synchronous>, transform_indices = @transform_2, window_bounds = array<i64: 1, 128>}, {transform_indices = @transform_3, window_bounds = array<i64: 32, 128>}]} {
    %c0 = arith.constant 0 : index
    %c0_0 = arith.constant 0 : index
    %0 = vector.load %arg1[%c0, %c0_0] : memref<32x128xf32, #tpu.memory_space<vmem>>, vector<32x128xf32>
    %c0_1 = arith.constant 0 : index
    %c0_2 = arith.constant 0 : index
    %1 = vector.load %arg2[%c0_1, %c0_2] : memref<128x128xf32, #tpu.memory_space<vmem>>, vector<128x128xf32>
    %cst = arith.constant dense<0.000000e+00> : vector<32x128xf32>
    %2 = tpu.matmul %0, %1, %cst {dimension_numbers = #tpu.dot_dimension_numbers<[1], [0], [0], [1], [0, 0, 1, 1], [], []>} : vector<32x128xf32>, vector<128x128xf32>, vector<32x128xf32> -> vector<32x128xf32>
    %c0_3 = arith.constant 0 : index
    %c0_4 = arith.constant 0 : index
    %3 = vector.load %arg3[%c0_3, %c0_4] : memref<1x128xf32, #tpu.memory_space<vmem>>, vector<1x128xf32>
    %4 = vector.broadcast %3 : vector<1x128xf32> to vector<32x128xf32>
    %5 = arith.addf %2, %4 : vector<32x128xf32>
    %c0_5 = arith.constant 0 : index
    %c0_6 = arith.constant 0 : index
    %6 = vector.load %arg4[%c0_5, %c0_6] : memref<32x128xf32, #tpu.memory_space<vmem>>, vector<32x128xf32>
    tpu.vector_store %arg4[%c0_5, %c0_6], %5 {strides = array<i32>} : memref<32x128xf32, #tpu.memory_space<vmem>>, vector<32x128xf32>,
    return
  }
  func.func @transform_0(%arg0: i32) -> (i32, i32) {
    %c0_i32 = arith.constant 0 : i32
    %c0_i32_0 = arith.constant 0 : i32
    return %arg0, %c0_i32 : i32, i32
  }
  func.func @transform_1(%arg0: i32) -> (i32, i32) {
    %c0_i32 = arith.constant 0 : i32
    %c0_i32_0 = arith.constant 0 : i32
    %c0_i32_1 = arith.constant 0 : i32
    return %c0_i32, %c0_i32_0 : i32, i32
  }
  func.func @transform_2(%arg0: i32) -> (i32, i32) {
    %c0_i32 = arith.constant 0 : i32
    %c0_i32_0 = arith.constant 0 : i32
    %c0_i32_1 = arith.constant 0 : i32
    return %c0_i32, %c0_i32_0 : i32, i32
  }
  func.func @transform_3(%arg0: i32) -> (i32, i32) {
    %c0_i32 = arith.constant 0 : i32
    %c0_i32_0 = arith.constant 0 : i32
    return %arg0, %c0_i32 : i32, i32
  }
}

module attributes {stable_mosaic.version = 11 : i64} {
  func.func @_output_kernel(%arg0: i32, %arg1: memref<1x16x128xf32, #tpu.memory_space<vmem>>, %arg2: memref<1x16x32xf32, #tpu.memory_space<vmem>>, %arg3: memref<1x16x32xf32, #tpu.memory_space<vmem>>, %arg4: memref<1x1x16xf32, #tpu.memory_space<vmem>>, %arg5: memref<1x128xf32, #tpu.memory_space<vmem>>, %arg6: memref<1x32xf32, #tpu.memory_space<vmem>>, %arg7: memref<1x128xf32, #tpu.memory_space<vmem>>, %arg8: memref<1x32xf32, #tpu.memory_space<vmem>>, %arg9: memref<1x2xf32, #tpu.memory_space<vmem>>, %arg10: memref<1x2x16xf32, #tpu.memory_space<vmem>>) attributes {dimension_semantics = [#tpu.dimension_semantics<parallel>], iteration_bounds = array<i64: 2>, scalar_prefetch = 0 : i64, scratch_operands = 0 : i64, tpu.core_type = #tpu.core_type<tc>, window_params = [{transform_indices = @transform_0, window_bounds = array<i64: 1, 16, 128>}, {transform_indices = @transform_1, window_bounds = array<i64: 1, 16, 32>}, {transform_indices = @transform_2, window_bounds = array<i64: 1, 16, 32>}, {transform_indices = @transform_3, window_bounds = array<i64: 1, 1, 16>}, {pipeline_mode = #tpu.pipeline_mode<synchronous>, transform_indices = @transform_4, window_bounds = array<i64: 1, 128>}, {pipeline_mode = #tpu.pipeline_mode<synchronous>, transform_indices = @transform_5, window_bounds = array<i64: 1, 32>}, {pipeline_mode = #tpu.pipeline_mode<synchronous>, transform_indices = @transform_6, window_bounds = array<i64: 1, 128>}, {pipeline_mode = #tpu.pipeline_mode<synchronous>, transform_indices = @transform_7, window_bounds = array<i64: 1, 32>}, {pipeline_mode = #tpu.pipeline_mode<synchronous>, transform_indices = @transform_8, window_bounds = array<i64: 1, 2>}, {transform_indices = @transform_9, window_bounds = array<i64: 1, 2, 16>}]} {
    %c0 = arith.constant 0 : index
    %c0_0 = arith.constant 0 : index
    %c0_1 = arith.constant 0 : index
    %0 = vector.load %arg1[%c0, %c0_0, %c0_1] : memref<1x16x128xf32, #tpu.memory_space<vmem>>, vector<1x16x128xf32>
    %1 = vector.shape_cast %0 : vector<1x16x128xf32> to vector<16x128xf32>
    %c0_2 = arith.constant 0 : index
    %c0_3 = arith.constant 0 : index
    %c0_4 = arith.constant 0 : index
    %2 = vector.load %arg2[%c0_2, %c0_3, %c0_4] : memref<1x16x32xf32, #tpu.memory_space<vmem>>, vector<1x16x32xf32>
    %3 = vector.shape_cast %2 : vector<1x16x32xf32> to vector<16x32xf32>
    %c0_5 = arith.constant 0 : index
    %c0_6 = arith.constant 0 : index
    %c0_7 = arith.constant 0 : index
    %4 = vector.load %arg3[%c0_5, %c0_6, %c0_7] : memref<1x16x32xf32, #tpu.memory_space<vmem>>, vector<1x16x32xf32>
    %5 = vector.shape_cast %4 : vector<1x16x32xf32> to vector<16x32xf32>
    %c0_8 = arith.constant 0 : index
    %c0_9 = arith.constant 0 : index
    %c0_10 = arith.constant 0 : index
    %6 = vector.load %arg4[%c0_8, %c0_9, %c0_10] : memref<1x1x16xf32, #tpu.memory_space<vmem>>, vector<1x1x16xf32>
    %7 = vector.shape_cast %6 : vector<1x1x16xf32> to vector<1x16xf32>
    %c0_11 = arith.constant 0 : index
    %c0_12 = arith.constant 0 : index
    %8 = vector.load %arg9[%c0_11, %c0_12] : memref<1x2xf32, #tpu.memory_space<vmem>>, vector<1x2xf32>
    %c0_13 = arith.constant 0 : index
    %c0_14 = arith.constant 0 : index
    %9 = vector.load %arg5[%c0_13, %c0_14] : memref<1x128xf32, #tpu.memory_space<vmem>>, vector<1x128xf32>
    %cst = arith.constant dense<0.000000e+00> : vector<1x16xf32>
    %10 = tpu.matmul %9, %1, %cst {dimension_numbers = #tpu.dot_dimension_numbers<[1], [1], [0], [0], [0, 0, 1, 0], [], []>} : vector<1x128xf32>, vector<16x128xf32>, vector<1x16xf32> -> vector<1x16xf32>
    %c0_15 = arith.constant 0 : index
    %c0_16 = arith.constant 0 : index
    %11 = vector.load %arg6[%c0_15, %c0_16] : memref<1x32xf32, #tpu.memory_space<vmem>>, vector<1x32xf32>
    %cst_17 = arith.constant dense<0.000000e+00> : vector<1x16xf32>
    %12 = tpu.matmul %11, %3, %cst_17 {dimension_numbers = #tpu.dot_dimension_numbers<[1], [1], [0], [0], [0, 0, 1, 0], [], []>} : vector<1x32xf32>, vector<16x32xf32>, vector<1x16xf32> -> vector<1x16xf32>
    %13 = arith.addf %10, %12 : vector<1x16xf32>
    %14 = vector.extract_strided_slice %8 {offsets = [0, 0], sizes = [1, 1], strides = [1, 1]} : vector<1x2xf32> to vector<1x1xf32>
    %15 = vector.broadcast %14 : vector<1x1xf32> to vector<1x16xf32>
    %16 = arith.addf %13, %15 : vector<1x16xf32>
    %c0_18 = arith.constant 0 : index
    %c0_19 = arith.constant 0 : index
    %17 = vector.load %arg7[%c0_18, %c0_19] : memref<1x128xf32, #tpu.memory_space<vmem>>, vector<1x128xf32>
    %cst_20 = arith.constant dense<0.000000e+00> : vector<1x16xf32>
    %18 = tpu.matmul %17, %1, %cst_20 {dimension_numbers = #tpu.dot_dimension_numbers<[1], [1], [0], [0], [0, 0, 1, 0], [], []>} : vector<1x128xf32>, vector<16x128xf32>, vector<1x16xf32> -> vector<1x16xf32>
    %c0_21 = arith.constant 0 : index
    %c0_22 = arith.constant 0 : index
    %19 = vector.load %arg8[%c0_21, %c0_22] : memref<1x32xf32, #tpu.memory_space<vmem>>, vector<1x32xf32>
    %cst_23 = arith.constant dense<0.000000e+00> : vector<1x16xf32>
    %20 = tpu.matmul %19, %5, %cst_23 {dimension_numbers = #tpu.dot_dimension_numbers<[1], [1], [0], [0], [0, 0, 1, 0], [], []>} : vector<1x32xf32>, vector<16x32xf32>, vector<1x16xf32> -> vector<1x16xf32>
    %21 = arith.addf %18, %20 : vector<1x16xf32>
    %22 = vector.extract_strided_slice %8 {offsets = [0, 1], sizes = [1, 1], strides = [1, 1]} : vector<1x2xf32> to vector<1x1xf32>
    %23 = vector.broadcast %22 : vector<1x1xf32> to vector<1x16xf32>
    %24 = arith.addf %21, %23 : vector<1x16xf32>
    %25 = arith.mulf %7, %16 : vector<1x16xf32>
    %cst_24 = arith.constant 1.000000e+00 : f32
    %26 = vector.broadcast %cst_24 : f32 to vector<1x16xf32>
    %27 = arith.subf %26, %7 : vector<1x16xf32>
    %cst_25 = arith.constant -1.000000e+30 : f32
    %28 = vector.broadcast %cst_25 : f32 to vector<1x16xf32>
    %29 = arith.mulf %27, %28 : vector<1x16xf32>
    %30 = arith.addf %25, %29 : vector<1x16xf32>
    %cst_26 = arith.constant dense<0xFF800000> : vector<1xf32>
    %31 = vector.multi_reduction <maximumf>, %30, %cst_26 [1] : vector<1x16xf32> to vector<1xf32>
    %32 = vector.shape_cast %31 : vector<1xf32> to vector<1x1xf32>
    %33 = vector.broadcast %32 : vector<1x1xf32> to vector<1x16xf32>
    %34 = arith.subf %30, %33 : vector<1x16xf32>
    %35 = math.exp %34 : vector<1x16xf32>
    %cst_27 = arith.constant dense<0.000000e+00> : vector<1xf32>
    %36 = vector.multi_reduction <add>, %35, %cst_27 [1] : vector<1x16xf32> to vector<1xf32>
    %37 = vector.shape_cast %36 : vector<1xf32> to vector<1x1xf32>
    %38 = math.log %37 : vector<1x1xf32>
    %39 = arith.addf %32, %38 : vector<1x1xf32>
    %40 = vector.broadcast %39 : vector<1x1xf32> to vector<1x16xf32>
    %41 = arith.subf %30, %40 : vector<1x16xf32>
    %42 = arith.mulf %7, %24 : vector<1x16xf32>
    %cst_28 = arith.constant 1.000000e+00 : f32
    %43 = vector.broadcast %cst_28 : f32 to vector<1x16xf32>
    %44 = arith.subf %43, %7 : vector<1x16xf32>
    %cst_29 = arith.constant -1.000000e+30 : f32
    %45 = vector.broadcast %cst_29 : f32 to vector<1x16xf32>
    %46 = arith.mulf %44, %45 : vector<1x16xf32>
    %47 = arith.addf %42, %46 : vector<1x16xf32>
    %cst_30 = arith.constant dense<0xFF800000> : vector<1xf32>
    %48 = vector.multi_reduction <maximumf>, %47, %cst_30 [1] : vector<1x16xf32> to vector<1xf32>
    %49 = vector.shape_cast %48 : vector<1xf32> to vector<1x1xf32>
    %50 = vector.broadcast %49 : vector<1x1xf32> to vector<1x16xf32>
    %51 = arith.subf %47, %50 : vector<1x16xf32>
    %52 = math.exp %51 : vector<1x16xf32>
    %cst_31 = arith.constant dense<0.000000e+00> : vector<1xf32>
    %53 = vector.multi_reduction <add>, %52, %cst_31 [1] : vector<1x16xf32> to vector<1xf32>
    %54 = vector.shape_cast %53 : vector<1xf32> to vector<1x1xf32>
    %55 = math.log %54 : vector<1x1xf32>
    %56 = arith.addf %49, %55 : vector<1x1xf32>
    %57 = vector.broadcast %56 : vector<1x1xf32> to vector<1x16xf32>
    %58 = arith.subf %47, %57 : vector<1x16xf32>
    %59 = tpu.concatenate %41, %58 in 0 : vector<1x16xf32>, vector<1x16xf32> -> vector<2x16xf32>
    %c0_32 = arith.constant 0 : index
    %c0_33 = arith.constant 0 : index
    %c0_34 = arith.constant 0 : index
    %60 = vector.load %arg10[%c0_32, %c0_33, %c0_34] : memref<1x2x16xf32, #tpu.memory_space<vmem>>, vector<1x2x16xf32>
    %61 = vector.shape_cast %60 : vector<1x2x16xf32> to vector<2x16xf32>
    %62 = vector.shape_cast %59 : vector<2x16xf32> to vector<1x2x16xf32>
    tpu.vector_store %arg10[%c0_32, %c0_33, %c0_34], %62 {strides = array<i32>} : memref<1x2x16xf32, #tpu.memory_space<vmem>>, vector<1x2x16xf32>,
    return
  }
  func.func @transform_0(%arg0: i32) -> (i32, i32, i32) {
    %c0_i32 = arith.constant 0 : i32
    %c0_i32_0 = arith.constant 0 : i32
    %c0_i32_1 = arith.constant 0 : i32
    return %arg0, %c0_i32, %c0_i32_0 : i32, i32, i32
  }
  func.func @transform_1(%arg0: i32) -> (i32, i32, i32) {
    %c0_i32 = arith.constant 0 : i32
    %c0_i32_0 = arith.constant 0 : i32
    %c0_i32_1 = arith.constant 0 : i32
    return %arg0, %c0_i32, %c0_i32_0 : i32, i32, i32
  }
  func.func @transform_2(%arg0: i32) -> (i32, i32, i32) {
    %c0_i32 = arith.constant 0 : i32
    %c0_i32_0 = arith.constant 0 : i32
    %c0_i32_1 = arith.constant 0 : i32
    return %arg0, %c0_i32, %c0_i32_0 : i32, i32, i32
  }
  func.func @transform_3(%arg0: i32) -> (i32, i32, i32) {
    %c0_i32 = arith.constant 0 : i32
    %c0_i32_0 = arith.constant 0 : i32
    %c0_i32_1 = arith.constant 0 : i32
    return %arg0, %c0_i32, %c0_i32_0 : i32, i32, i32
  }
  func.func @transform_4(%arg0: i32) -> (i32, i32) {
    %c0_i32 = arith.constant 0 : i32
    %c0_i32_0 = arith.constant 0 : i32
    %c0_i32_1 = arith.constant 0 : i32
    return %c0_i32, %c0_i32_0 : i32, i32
  }
  func.func @transform_5(%arg0: i32) -> (i32, i32) {
    %c0_i32 = arith.constant 0 : i32
    %c0_i32_0 = arith.constant 0 : i32
    %c0_i32_1 = arith.constant 0 : i32
    return %c0_i32, %c0_i32_0 : i32, i32
  }
  func.func @transform_6(%arg0: i32) -> (i32, i32) {
    %c0_i32 = arith.constant 0 : i32
    %c0_i32_0 = arith.constant 0 : i32
    %c0_i32_1 = arith.constant 0 : i32
    return %c0_i32, %c0_i32_0 : i32, i32
  }
  func.func @transform_7(%arg0: i32) -> (i32, i32) {
    %c0_i32 = arith.constant 0 : i32
    %c0_i32_0 = arith.constant 0 : i32
    %c0_i32_1 = arith.constant 0 : i32
    return %c0_i32, %c0_i32_0 : i32, i32
  }
  func.func @transform_8(%arg0: i32) -> (i32, i32) {
    %c0_i32 = arith.constant 0 : i32
    %c0_i32_0 = arith.constant 0 : i32
    %c0_i32_1 = arith.constant 0 : i32
    return %c0_i32, %c0_i32_0 : i32, i32
  }
  func.func @transform_9(%arg0: i32) -> (i32, i32, i32) {
    %c0_i32 = arith.constant 0 : i32
    %c0_i32_0 = arith.constant 0 : i32
    %c0_i32_1 = arith.constant 0 : i32
    return %arg0, %c0_i32, %c0_i32_0 : i32, i32, i32
  }
}

</mosaic_0001>

<bundles_post_ra>
// kernel: bidaf_forward.14
= control target key start
LH: loop header
LB: loop body
LE: loop exit
PB: predicated region body
PF: predicated region fallthrough
CT: control target
= control target key end

     0   :  { %vm27_vm0 = vcmask 130048   ;;  %s213_s1 = inlined_call_operand.vmem [shape: f32[16,128], index: 1, kind: input, shape index: {}]   ;;  %s214_s0 = inlined_call_operand.vmem [shape: f32[32,16], index: 0, kind: input, shape index: {}]   ;;  %s215_s2 = inlined_call_operand.vmem [shape: f32[1,128], index: 2, kind: input, shape index: {}]   ;;  %s216_s3 = inlined_call_operand.vmem [shape: f32[32,128], index: 3, kind: output, shape index: {}]  }
   0x1   :  { %v18_v0 = vld [vmem:[%s213_s1] sm:$0xff]  ;;  %v19_v1 = vld [vmem:[%s213_s1 + $0x8] sm:$0xff]  ;;  %v16_v4 = vld [vmem:[%s214_s0 + $0x10] sm:$0xff] }
   0x2   :  { %v14_v2 = vld [vmem:[%s214_s0] sm:$0xff]  ;;  %v154_v3 = vpack.c.bf16 %v19_v1, %v18_v0  ;;  %151 = vmatprep.mubr.msk.f32.mxu1 %vm27_vm0, %v16_v4  ;;  %v15_v5 = vld [vmem:[%s214_s0 + $0x8] sm:$0xff]  ;;  %v17_v6 = vld [vmem:[%s214_s0 + $0x18] sm:$0xff] }
   0x3   :  { %148 = vmatprep.mubr.msk.f32.mxu0 %vm27_vm0, %v14_v2  ;;  %v133_v7 = vld [vmem:[%s215_s2] ss:$0 sm:$0xff] }
   0x4   :  { %155 = vmatprep.subr.bf16.mxu0 %v154_v3  ;;  %158 = vmatprep.subr.bf16.mxu1 %v154_v3 }
   0x5   :  { %157 = vmatpush3.bf16.msra.mxu0 %v154_v3  ;;  %159 = vmatpush3.bf16.msra.mxu1 %v154_v3 }
   0x8   :  { %149 = vmatmul.mubr.msk.f32.vlgmr.msra.gmra.mrb[0].mxu0 %vm27_vm0, %v15_v5  ;;  %152 = vmatmul.mubr.msk.f32.vlgmr.msra.gmra.mrb[0].mxu1 %vm27_vm0, %v17_v6 }
  0xdb   :  { %v150_v8 = vpop.f32.mrb[0].mxu0  ;;  %v153_v9 = vpop.f32.mrb[0].mxu1 }
  0xdc   :  { %v112_v10 = vadd.f32 %v150_v8, %v133_v7  ;;  %v122_v11 = vadd.f32 %v153_v9, %v133_v7  ;;  %v106_v12 = vpop.f32.mrb[1].mxu0  ;;  %v116_v13 = vpop.f32.mrb[1].mxu1 }
  0xdd   :  { %v107_v14 = vadd.f32 %v133_v7, %v106_v12  ;;  %v117_v15 = vadd.f32 %v133_v7, %v116_v13 }
  0xde   :  { %126 = vst [vmem:[%s216_s3 + $0x8] sm:$0xff] %v112_v10  ;;  %128 = vst [vmem:[%s216_s3 + $0x18] sm:$0xff] %v122_v11 }
  0xdf   :  { %125 = vst [vmem:[%s216_s3] sm:$0xff] %v107_v14  ;;  %127 = vst [vmem:[%s216_s3 + $0x10] sm:$0xff] %v117_v15 }

// kernel: bidaf_forward.15
= control target key start
LH: loop header
LB: loop body
LE: loop exit
PB: predicated region body
PF: predicated region fallthrough
CT: control target
= control target key end

     0   :  { %s849_s12 = smov 0   ;;  %s851_s13 = smov 0   ;;  %s936_s0 = inlined_call_operand.vmem [shape: f32[2,16,2,64], index: 0, kind: input, shape index: {}]   ;;  %s937_s1 = inlined_call_operand.vmem [shape: f32[16,2,1], index: 1, kind: input, shape index: {}]   ;;  %s938_s2 = inlined_call_operand.vmem [shape: f32[2,16,64], index: 2, kind: input, shape index: {}]   ;;  %s939_s3 = inlined_call_operand.vmem [shape: f32[2,16,2,16], index: 3, kind: output, shape index: {}]  }
   0x1   :  { %s853_s14 = smov 0  }
   0x2 LB: > { %s25_s15 = sadd.s32 1, %s800_s13  ;;  %p673_p0 = scmp.ge.s32.totalorder %s804_s14, 1  ;;  %s804_s14 = sphi %s853_s14, %s13_s14   ;;  %s800_s13 = sphi %s851_s13, %s943_s13   ;;  %s796_s12 = sphi %s849_s12, %s942_s12  }
   0x3   : > { %p27_p1 = scmp.ge.s32.totalorder %s25_s15, 2  ;;  %p229_p2 = scmp.lt.s32.totalorder %s804_s14, 3 }
   0x5   : > { %s945_s15 = smov (%p27_p1, %s25_s15), 0  ;;  %p230_p3 = pnand %p673_p0, %p229_p2 }
   0x6   : > { %p292_p4 = scmp.lt.s32.totalorder (!%p230_p3), %s796_s12, 1  ;;  %vm351_vm0 = vcmask (!%p230_p3), 123904   ;;  %v818_v0 = vmov (!%p230_p3), 0.0   ;;  %s894_s28 = smov (!%p230_p3), 0  }
   0x7   : > { %233 = sbr.rel (%p230_p3) target bundleno = 733 (0x2dd), region = 32  ;;  %352 = vst.msk [vmem:[#allocation2] sm:$0x3] (!%p230_p3), %vm351_vm0, %v818_v0  ;;  %353 = vst.msk [vmem:[#allocation3] sm:$0x3] (!%p230_p3), %vm351_vm0, %v818_v0 }
   0xe   : > { %s293_s16 = scalar_select %p292_p4, %s796_s12, 1  ;;  %v356_v3 = vld [vmem:[#allocation2] sm:$0x3]   ;;  %v357_v4 = vld [vmem:[#allocation3] sm:$0x3]  }
  0x10   : > { %s685_s17 = sshll.u32 %s293_s16, 5  ;;  %s686_s18 = sshll.u32 %s293_s16, 4 }
  0x11   : > { %s876_s21 = scalar_lea.vmem %s936_s0, %s685_s17  ;;  %s326_s24 = scalar_lea.vmem %s938_s2, %s686_s18 }
  0x12   : > { %s884_s27 = scalar_lea.vmem %s939_s3, %s685_s17  ;;  %v886_v1 = vld [vmem:[%s326_s24] sm:$0xff]  ;;  %v888_v2 = vld [vmem:[%s326_s24 + $0x8] sm:$0xff] }
  0x13 LB: >> { %v699_v5 = vpack.c.bf16 %v888_v2, %v886_v1  ;;  %v819_v6 = vmov 0.0|0.0   ;;  %vm820_vm1 = vmmov 0   ;;  %v821_v7 = vmov 0.0   ;;  %s366_s29 = ssub.s32 1, %s796_s12  ;;  %s368_s30 = ssub.s32 15, %s816_s28  ;;  %s816_s28 = sphi %s894_s28, %s363_s28   ;;  %v812_v3 = vphi %v356_v3, %v941_v3   ;;  %v808_v4 = vphi %v357_v4, %v940_v4  }
  0x14   : >> { %698 = vmatprep.subr.bf16.mxu0 %v819_v6  ;;  %695 = vmatprep.mubr.msk.f32.mxu0 %vm820_vm1, %v821_v7  ;;  %vm376_vm2 = vcmask 130048   ;;  %v822_v8 = vmov 0   ;;  %s367_s4 = smul.u32 %s816_s28, %s366_s29  ;;  %s823_s9 = smov 96  }
  0x15   : >> { %700 = vmatpush3.bf16.msra.mxu0 %v699_v5  ;;  %761 = vset.pattern.permute.xlu0 %v822_v8  ;;  %s369_s5 = smul.u32 %s796_s12, %s368_s30  ;;  %s824_s17 = smov 16  }
  0x16   : >> { %760 = vset.pattern.permute.xlu1 %v822_v8  ;;  %s825_s18 = smov 32   ;;  %s826_s19 = smov 48  }
  0x17   : >> { %s370_s6 = sadd.s32 %s369_s5, %s367_s4  ;;  %s827_s20 = smov 80  }
  0x18   : >> { %696 = vmatmul.mubr.msk.f32.vlgmr.msra.gmra.mrb[0].mxu0 %vm376_vm2, %v812_v3  ;;  %s907_s7 = sshll.u32 %s370_s6, 1  ;;  %s828_s22 = smov 112  }
  0x19   : >> { %s372_s8 = scalar_lea.vmem %s876_s21, %s907_s7  ;;  %s374_s16 = scalar_lea.vmem %s937_s1, %s907_s7 }
  0x1a   : >> { %v373_v9 = vld [vmem:[%s372_s8] sm:$0x3]  ;;  %s489_s23 = scalar_lea.vmem %s884_s27, %s907_s7  ;;  %s363_s28 = sadd.s32 1, %s816_s28  }
  0x1b   : >> { %v375_v14 = vld [vmem:[%s374_s16] sm:$0x3]  ;;  %p360_p5 = scmp.ge.s32.totalorder %s363_s28, 16  }
  0x1c   : >> { %v492_v21 = vsub.f32 1.0, %v375_v14 }
  0xeb   : >> { %v446_v10 = vpop.f32.mrb[0].mxu0 }
  0xec   : >> { %v450_v11 = vadd.f32 %v446_v10, %v373_v9  ;;  %v697_v12 = vpop.f32.mrb[1].mxu0 }
  0xee   : >> { %762 = vtanh.f32 %v450_v11  ;;  %v682_v15 = vmul.f32 -1.442695, %v450_v11 }
  0xf0   : >> { %764 = vpow2.f32 %v682_v15 }
  0xf8   : >> { %v763_v13 = vpop.eup %762 }
  0xf9   : >> { %464 = vrot.lane.b32.xlu0 %v763_v13, %s823_s9 }
  0xfa   : >> { %v765_v16 = vpop.eup %764 }
  0xfb   : >> { %v454_v17 = vadd.f32 1.0, %v765_v16 }
  0xfd   : >> { %459 = vrot.lane.b32.xlu0 %v808_v4, %s824_s17  ;;  %766 = vrcp.f32 %v454_v17 }
 0x101   : >> { %481 = vperm.xlu0 %761, %v375_v14  }
 0x107   : >> { %v767_v18 = vpop.eup %766 }
 0x16b   : >> { %v465_v19 = vpop.permute.xlu0 %464 }
 0x16c   : >> { %v467_v20 = vmul.f32 %v767_v18, %v465_v19 }
 0x16e   : >> { %469 = vrot.lane.b32.xlu1 %v467_v20, %s824_s17 }
 0x16f   : >> { %v460_v22 = vpop.permute.xlu0 %459 }
 0x170   : >> { %v462_v23 = vmul.f32 %v767_v18, %v460_v22 }
 0x172   : >> { %495 = vperm.xlu1 %760, %v492_v21  }
 0x180   : >> { %v482_v32 = vpop.permute.xlu0 %481 }
 0x1e0   : >> { %v470_v24 = vpop.permute.xlu1 %469 }
 0x1e1   : >> { %v472_v25 = vadd.f32 %v470_v24, %v462_v23 }
 0x1e3   : >> { %768 = vtanh.f32 %v472_v25  ;;  %v504_v34 = vmul.f32 %v482_v32, %v472_v25 }
 0x1ed   : >> { %v769_v26 = vpop.eup %768 }
 0x1ee   : >> { %475 = vrot.lane.b32.xlu1 %v769_v26, %s825_s18 }
 0x1f1   : >> { %v496_v27 = vpop.permute.xlu1 %495 }
 0x1f2   : >> { %v498_v28 = vmul.f32 %v812_v3, %v496_v27  ;;  %v505_v29 = vmul.f32 %v808_v4, %v496_v27 }
 0x1f4   : >> { %500 = vrot.lane.b32.xlu1 %v498_v28, %s826_s19  ;;  %507 = vrot.lane.b32.xlu0 %v505_v29, %s824_s17 }
 0x260   : >> { %v476_v30 = vpop.permute.xlu1 %475 }
 0x261   : >> { %v478_v31 = vmul.f32 %v767_v18, %v476_v30 }
 0x263   : >> { %v484_v33 = vmul.f32 %v482_v32, %v478_v31 }
 0x265   : >> { %486 = vrot.lane.b32.xlu1 %v484_v33, %s827_s20 }
 0x266   : >> { %v501_v35 = vpop.permute.xlu1 %500  ;;  %v508_v36 = vpop.permute.xlu0 %507 }
 0x267   : >> { %v503_v37 = vadd.f32 %v501_v35, %v484_v33  ;;  %v510_v38 = vadd.f32 %v508_v36, %v504_v34 }
 0x269   : >> { %512 = vrot.lane.b32.xlu0 %v503_v37, %s827_s20  ;;  %516 = vrot.lane.b32.xlu1 %v510_v38, %s828_s22 }
 0x2d6   : > { %362 = sbr.rel (!%p360_p5) target bundleno = 19 (0x13), region = 82 }
 0x2d7   : >> { %v487_v39 = vpop.permute.xlu1 %486 }
 0x2d8   : >> { %491 = vst.msk [vmem:[%s489_s23] sm:$0x3] %vm351_vm0, %v487_v39 }
 0x2db   : >> { %v517_v40 = vpop.permute.xlu1 %516   ;;  %v513_v41 = vpop.permute.xlu0 %512  }
 0x2dc   : >> { %v940_v4 = vmov %v517_v40  ;;  %v941_v3 = vmov %v513_v41  ;;  %520 = vst.msk [vmem:[#allocation2] sm:$0x3] (%p360_p5), %vm351_vm0, %v513_v41  ;;  %521 = vst.msk [vmem:[#allocation3] sm:$0x3] (%p360_p5), %vm351_vm0, %v517_v40 }
 0x2dd PF: > { %s13_s14 = sadd.s32 1, %s804_s14   ;;  %s942_s12 = smov %s800_s13 }
 0x2de   : > { %p10_p6 = scmp.ge.s32.totalorder %s13_s14, 4   ;;  %s943_s13 = smov %s945_s15 }
 0x2e0   :  { %12 = sbr.rel (!%p10_p6) target bundleno = 2 (0x2), region = 93 }

// kernel: bidaf_forward.13
= control target key start
LH: loop header
LB: loop body
LE: loop exit
PB: predicated region body
PF: predicated region fallthrough
CT: control target
= control target key end

     0   :  { %vm66_vm0 = vcmask 1043456   ;;  %v1116_v0 = vmov 0.0|0.0   ;;  %vm1117_vm1 = vmmov 1   ;;  %vm1118_vm3 = vmmov 0   ;;  %s1477_s1 = inlined_call_operand.vmem [shape: f32[12,16], index: 1, kind: input, shape index: {}]   ;;  %s1478_s0 = inlined_call_operand.vmem [shape: f32[56,12], index: 0, kind: input, shape index: {}]   ;;  %s1479_s4 = inlined_call_operand.vmem [shape: f32[16,16], index: 4, kind: input, shape index: {}]   ;;  %s1480_s2 = inlined_call_operand.vmem [shape: f32[16,16], index: 2, kind: input, shape index: {}]   ;;  %s1481_s8 = inlined_call_operand.vmem [shape: f32[16,16], index: 8, kind: input, shape index: {}]   ;;  %s1482_s6 = inlined_call_operand.vmem [shape: f32[16,16], index: 6, kind: input, shape index: {}]   ;;  %s1483_s5 = inlined_call_operand.vmem [shape: f32[1,16], index: 5, kind: input, shape index: {}]   ;;  %s1484_s3 = inlined_call_operand.vmem [shape: f32[1,16], index: 3, kind: input, shape index: {}]   ;;  %s1485_s9 = inlined_call_operand.vmem [shape: f32[1,16], index: 9, kind: input, shape index: {}]   ;;  %s1486_s7 = inlined_call_operand.vmem [shape: f32[1,16], index: 7, kind: input, shape index: {}]   ;;  %s1487_s10 = inlined_call_operand.vmem [shape: f32[56,16], index: 10, kind: output, shape index: {}]  }
   0x1   :  { %1038 = vmatprep.subr.bf16.mxu0 %v1116_v0  ;;  %v42_v1 = vld [vmem:[%s1477_s1] sm:$0xff]  ;;  %v43_v2 = vld [vmem:[%s1477_s1 + $0x8] sm:$0xf]  ;;  %vm1040_vm2 = vmpackc.low %vm66_vm0, %vm1117_vm1  ;;  %1054 = vmatprep.subr.bf16.mxu1 %v1116_v0  ;;  %v1119_v4 = vmov 0.0   ;;  %vm44_vm4 = vcmask 97280   ;;  %vm179_vm5 = vcmask 130048  }
   0x2   :  { %v1039_v3 = vpack.c.bf16 %v43_v2, %v42_v1  ;;  %917 = vmatprep.mubr.msk.f32.mxu0 %vm1118_vm3, %v1119_v4  ;;  %929 = vmatprep.mubr.msk.f32.mxu1 %vm1118_vm3, %v1119_v4  ;;  %v35_v5 = vld [vmem:[%s1478_s0] sm:$0xff]  ;;  %v309_v8 = vld [vmem:[%s1479_s4 + $0x8] sm:$0xff]  ;;  %v37_v15 = vld [vmem:[%s1478_s0 + $0x10] sm:$0xff] }
   0x3   :  { %v39_v6 = vld [vmem:[%s1478_s0 + $0x20] sm:$0xff]  ;;  %v171_v11 = vld [vmem:[%s1480_s2 + $0x8] sm:$0xff]  ;;  %v41_v16 = vld [vmem:[%s1478_s0 + $0x30] sm:$0xff] }
   0x4   :  { %1041 = vmatpush3.bf16.msk.msra.mxu0 %vm1040_vm2, %v1039_v3  ;;  %1055 = vmatpush3.bf16.msk.msra.mxu1 %vm1040_vm2, %v1039_v3  ;;  %v308_v7 = vld [vmem:[%s1479_s4] sm:$0xff]  ;;  %v36_v13 = vld [vmem:[%s1478_s0 + $0x8] sm:$0xff]  ;;  %v38_v17 = vld [vmem:[%s1478_s0 + $0x18] sm:$0xff] }
   0x5   :  { %1045 = vmatprep.subr.bf16.mxu0 %v1116_v0  ;;  %v1046_v9 = vpack.c.bf16 %v309_v8, %v308_v7  ;;  %1042 = vmatprep.subr.bf16.mxu1 %v1116_v0  ;;  %v170_v10 = vld [vmem:[%s1480_s2] sm:$0xff]  ;;  %v40_v14 = vld [vmem:[%s1478_s0 + $0x28] sm:$0xff] }
   0x6   :  { %v1043_v12 = vpack.c.bf16 %v171_v11, %v170_v10  ;;  %v624_v32 = vld [vmem:[%s1481_s8] sm:$0xff]  ;;  %v625_v33 = vld [vmem:[%s1481_s8 + $0x8] sm:$0xff] }
   0x7   :  { %918 = vmatmul.mubr.msk.f32.vlgmr.msra.gmra.mrb[0].mxu0 %vm44_vm4, %v35_v5  ;;  %930 = vmatmul.mubr.msk.f32.vlgmr.msra.gmra.mrb[0].mxu1 %vm44_vm4, %v39_v6  ;;  %v487_v34 = vld [vmem:[%s1482_s6] sm:$0xff]  ;;  %v1052_v35 = vpack.c.bf16 %v625_v33, %v624_v32  ;;  %v488_v36 = vld [vmem:[%s1482_s6 + $0x8] sm:$0xff] }
   0x8   :  { %920 = vmatprep.mubr.msk.f32.mxu0 %vm1118_vm3, %v1119_v4  ;;  %932 = vmatprep.mubr.msk.f32.mxu1 %vm1118_vm3, %v1119_v4  ;;  %v1049_v37 = vpack.c.bf16 %v488_v36, %v487_v34  ;;  %v830_v38 = vld [vmem:[%s1483_s5] ss:$0 sm:$0xff] }
   0x9   :  { %1047 = vmatpush3.bf16.msra.mxu0 %v1046_v9  ;;  %1044 = vmatpush3.bf16.msra.mxu1 %v1043_v12  ;;  %v1329_v9 = vld [vmem:[%s1484_s3] ss:$0 sm:$0xff] }
   0xa   :  { %1051 = vmatprep.subr.bf16.mxu0 %v1116_v0  ;;  %1048 = vmatprep.subr.bf16.mxu1 %v1116_v0 }
   0xb   :  { %921 = vmatmul.mubr.msk.f32.gmra.mrb[2].mxu0 %vm44_vm4, %v36_v13  ;;  %933 = vmatmul.mubr.msk.f32.gmra.mrb[2].mxu1 %vm44_vm4, %v40_v14 }
   0xc   :  { %923 = vmatprep.mubr.msk.f32.mxu0 %vm1118_vm3, %v1119_v4  ;;  %935 = vmatprep.mubr.msk.f32.mxu1 %vm1118_vm3, %v1119_v4 }
   0xf   :  { %924 = vmatmul.mubr.msk.f32.gmra.mrb[4].mxu0 %vm44_vm4, %v37_v15  ;;  %936 = vmatmul.mubr.msk.f32.gmra.mrb[4].mxu1 %vm44_vm4, %v41_v16 }
  0x10   :  { %926 = vmatprep.mubr.msk.f32.mxu0 %vm1118_vm3, %v1119_v4  ;;  %942 = vmatprep.mubr.msk.f32.mxu1 %vm1118_vm3, %v1119_v4 }
  0x13   :  { %927 = vmatmul.mubr.msk.f32.gmra.mrb[6].mxu0 %vm44_vm4, %v38_v17 }
  0x14   :  { %967 = vmatprep.mubr.msk.f32.mxu0 %vm1118_vm3, %v1119_v4 }
  0xda   :  { %v1239_v18 = vpop.f32.mrb[0].mxu0  ;;  %v1241_v19 = vpop.f32.mrb[0].mxu1 }
  0xdb   :  { %v919_v20 = vpop.f32.mrb[1].mxu0  ;;  %943 = vmatmul.mubr.msk.f32.vlgmr.msra.gmra.mrb[6].mxu1 %vm179_vm5, %v1239_v18  ;;  %968 = vmatmul.mubr.msk.f32.vlgmr.msra.gmra.mrb[8].mxu0 %vm179_vm5, %v1239_v18  ;;  %v931_v21 = vpop.f32.mrb[1].mxu1 }
  0xdc   :  { %945 = vmatprep.mubr.msk.f32.mxu1 %vm1118_vm3, %v1119_v4  ;;  %970 = vmatprep.mubr.msk.f32.mxu0 %vm1118_vm3, %v1119_v4 }
  0xdd   :  { %1053 = vmatpush3.bf16.msra.mxu0 %v1052_v35  ;;  %1050 = vmatpush3.bf16.msra.mxu1 %v1049_v37 }
  0xde   :  { %v1251_v22 = vpop.f32.mrb[2].mxu0  ;;  %v1253_v23 = vpop.f32.mrb[2].mxu1 }
  0xdf   :  { %v922_v24 = vpop.f32.mrb[3].mxu0  ;;  %946 = vmatmul.mubr.msk.f32.gmra.mrb[8].mxu1 %vm179_vm5, %v1251_v22  ;;  %971 = vmatmul.mubr.msk.f32.gmra.mrb[10].mxu0 %vm179_vm5, %v1251_v22  ;;  %v934_v25 = vpop.f32.mrb[3].mxu1 }
  0xe0   :  { %948 = vmatprep.mubr.msk.f32.mxu1 %vm1118_vm3, %v1119_v4  ;;  %973 = vmatprep.mubr.msk.f32.mxu0 %vm1118_vm3, %v1119_v4 }
  0xe2   :  { %v1263_v26 = vpop.f32.mrb[4].mxu0  ;;  %v1265_v27 = vpop.f32.mrb[4].mxu1 }
  0xe3   :  { %v925_v28 = vpop.f32.mrb[5].mxu0  ;;  %949 = vmatmul.mubr.msk.f32.gmra.mrb[10].mxu1 %vm179_vm5, %v1263_v26  ;;  %974 = vmatmul.mubr.msk.f32.gmra.mrb[12].mxu0 %vm179_vm5, %v1263_v26  ;;  %v937_v29 = vpop.f32.mrb[5].mxu1 }
  0xe4   :  { %951 = vmatprep.mubr.msk.f32.mxu1 %vm1118_vm3, %v1119_v4  ;;  %976 = vmatprep.mubr.msk.f32.mxu0 %vm1118_vm3, %v1119_v4 }
  0xe6   :  { %v1275_v30 = vpop.f32.mrb[6].mxu0 }
  0xe7   :  { %v928_v31 = vpop.f32.mrb[7].mxu0  ;;  %952 = vmatmul.mubr.msk.f32.gmra.mrb[12].mxu1 %vm179_vm5, %v1275_v30  ;;  %977 = vmatmul.mubr.msk.f32.gmra.mrb[14].mxu0 %vm179_vm5, %v1275_v30 }
  0xe8   :  { %954 = vmatprep.mubr.msk.f32.mxu1 %vm1118_vm3, %v1119_v4  ;;  %979 = vmatprep.mubr.msk.f32.mxu0 %vm1118_vm3, %v1119_v4 }
  0xeb   :  { %955 = vmatmul.mubr.msk.f32.gmra.mrb[14].mxu1 %vm179_vm5, %v1241_v19  ;;  %980 = vmatmul.mubr.msk.f32.gmra.mrb[16].mxu0 %vm179_vm5, %v1241_v19 }
  0xec   :  { %957 = vmatprep.mubr.msk.f32.mxu1 %vm1118_vm3, %v1119_v4  ;;  %982 = vmatprep.mubr.msk.f32.mxu0 %vm1118_vm3, %v1119_v4 }
  0xef   :  { %958 = vmatmul.mubr.msk.f32.gmra.mrb[16].mxu1 %vm179_vm5, %v1253_v23  ;;  %983 = vmatmul.mubr.msk.f32.gmra.mrb[18].mxu0 %vm179_vm5, %v1253_v23 }
  0xf0   :  { %960 = vmatprep.mubr.msk.f32.mxu1 %vm1118_vm3, %v1119_v4  ;;  %985 = vmatprep.mubr.msk.f32.mxu0 %vm1118_vm3, %v1119_v4 }
  0xf3   :  { %961 = vmatmul.mubr.msk.f32.gmra.mrb[18].mxu1 %vm179_vm5, %v1265_v27  ;;  %986 = vmatmul.mubr.msk.f32.gmra.mrb[20].mxu0 %vm179_vm5, %v1265_v27 }
  0xf4   :  { %992 = vmatprep.mubr.msk.f32.mxu1 %vm1118_vm3, %v1119_v4  ;;  %1017 = vmatprep.mubr.msk.f32.mxu0 %vm1118_vm3, %v1119_v4 }
 0x1ae   :  { %v267_v39 = vpop.f32.mrb[6].mxu1  ;;  %v383_v40 = vpop.f32.mrb[8].mxu0 }
 0x1af   :  { %v384_v41 = vadd.f32 %v830_v38, %v383_v40  ;;  %v944_v42 = vpop.f32.mrb[7].mxu1  ;;  %v969_v43 = vpop.f32.mrb[9].mxu0  ;;  %v268_v17 = vadd.f32 %v1329_v9, %v267_v39 }
 0x1b1   :  { %v838_v44 = vmul.f32 -1.442695, %v384_v41  ;;  %v301_v33 = vmax.f32 %v268_v17, 0.0 }
 0x1b2   :  { %v272_v45 = vpop.f32.mrb[8].mxu1  ;;  %v388_v46 = vpop.f32.mrb[10].mxu0 }
 0x1b3   :  { %1060 = vpow2.f32 %v838_v44  ;;  %v389_v47 = vadd.f32 %v830_v38, %v388_v46  ;;  %v947_v48 = vpop.f32.mrb[9].mxu1  ;;  %v972_v49 = vpop.f32.mrb[11].mxu0  ;;  %v273_v34 = vadd.f32 %v1329_v9, %v272_v45 }
 0x1b5   :  { %v839_v50 = vmul.f32 -1.442695, %v389_v47  ;;  %v302_v43 = vmax.f32 %v273_v34, 0.0 }
 0x1b6   :  { %v277_v51 = vpop.f32.mrb[10].mxu1  ;;  %v393_v52 = vpop.f32.mrb[12].mxu0 }
 0x1b7   :  { %1062 = vpow2.f32 %v839_v50  ;;  %v394_v53 = vadd.f32 %v830_v38, %v393_v52  ;;  %v950_v54 = vpop.f32.mrb[11].mxu1  ;;  %v975_v55 = vpop.f32.mrb[13].mxu0 }
 0x1b9   :  { %v840_v56 = vmul.f32 -1.442695, %v394_v53 }
 0x1ba   :  { %v282_v57 = vpop.f32.mrb[12].mxu1  ;;  %v398_v58 = vpop.f32.mrb[14].mxu0 }
 0x1bb   :  { %1064 = vpow2.f32 %v840_v56  ;;  %v399_v59 = vadd.f32 %v830_v38, %v398_v58  ;;  %v953_v60 = vpop.f32.mrb[13].mxu1  ;;  %v978_v61 = vpop.f32.mrb[15].mxu0  ;;  %v283_v52 = vadd.f32 %v1329_v9, %v282_v57 }
 0x1bd   :  { %v1061_v62 = vpop.eup %1060  ;;  %v841_v63 = vmul.f32 -1.442695, %v399_v59  ;;  %v304_v58 = vmax.f32 %v283_v52, 0.0 }
 0x1be   :  { %v438_v0 = vadd.f32 1.0, %v1061_v62  ;;  %v1324_v1 = vpop.f32.mrb[14].mxu1  ;;  %v403_v2 = vpop.f32.mrb[16].mxu0 }
 0x1bf   :  { %1066 = vpow2.f32 %v841_v63  ;;  %v404_v3 = vadd.f32 %v830_v38, %v403_v2  ;;  %v956_v5 = vpop.f32.mrb[15].mxu1  ;;  %v981_v6 = vpop.f32.mrb[17].mxu0  ;;  %v288_v59 = vadd.f32 %v1329_v9, %v1324_v1 }
 0x1c0   :  { %1068 = vrcp.f32 %v438_v0 }
 0x1c1   :  { %v1063_v7 = vpop.eup %1062  ;;  %v842_v8 = vmul.f32 -1.442695, %v404_v3  ;;  %v305_v1 = vmax.f32 %v288_v59, 0.0 }
 0x1c2   :  { %v439_v10 = vadd.f32 1.0, %v1063_v7  ;;  %v1331_v11 = vpop.f32.mrb[16].mxu1  ;;  %v408_v12 = vpop.f32.mrb[18].mxu0 }
 0x1c3   :  { %1070 = vpow2.f32 %v842_v8  ;;  %v409_v13 = vadd.f32 %v830_v38, %v408_v12  ;;  %v959_v14 = vpop.f32.mrb[17].mxu1  ;;  %v984_v15 = vpop.f32.mrb[19].mxu0  ;;  %v293_v2 = vadd.f32 %v1329_v9, %v1331_v11 }
 0x1c4   :  { %1072 = vrcp.f32 %v439_v10 }
 0x1c5   :  { %v1065_v16 = vpop.eup %1064  ;;  %v843_v20 = vmul.f32 -1.442695, %v409_v13  ;;  %v306_v8 = vmax.f32 %v293_v2, 0.0 }
 0x1c6   :  { %v440_v21 = vadd.f32 1.0, %v1065_v16  ;;  %v1334_v24 = vpop.f32.mrb[18].mxu1  ;;  %v413_v25 = vpop.f32.mrb[20].mxu0 }
 0x1c7   :  { %1074 = vpow2.f32 %v843_v20  ;;  %v414_v28 = vadd.f32 %v830_v38, %v413_v25  ;;  %v962_v29 = vpop.f32.mrb[19].mxu1  ;;  %v987_v31 = vpop.f32.mrb[21].mxu0  ;;  %v278_v38 = vadd.f32 %v1329_v9, %v277_v51  ;;  %v298_v10 = vadd.f32 %v1329_v9, %v1334_v24  ;;  %v853_v24 = vld [vmem:[%s1485_s9] ss:$0 sm:$0xff] }
 0x1c8   :  { %1076 = vrcp.f32 %v440_v21 }
 0x1c9   :  { %v1067_v32 = vpop.eup %1066  ;;  %v844_v35 = vmul.f32 -1.442695, %v414_v28  ;;  %v303_v50 = vmax.f32 %v278_v38, 0.0  ;;  %v307_v9 = vmax.f32 %v298_v10, 0.0 }
 0x1ca   :  { %v1069_v36 = vpop.eup %1068  ;;  %v441_v37 = vadd.f32 1.0, %v1067_v32 }
 0x1cb   :  { %v459_v40 = vmul.f32 %v1069_v36, %v301_v33  ;;  %v466_v41 = vsub.f32 1.0, %v1069_v36  ;;  %1078 = vpow2.f32 %v844_v35 }
 0x1cc   :  { %1080 = vrcp.f32 %v441_v37 }
 0x1cd   :  { %v1071_v39 = vpop.eup %1070  ;;  %v473_v42 = vmul.f32 %v466_v41, %v1239_v18 }
 0x1ce   :  { %v1073_v44 = vpop.eup %1072  ;;  %v442_v46 = vadd.f32 1.0, %v1071_v39 }
 0x1cf   :  { %v1339_v47 = vadd.f32 %v473_v42, %v459_v40  ;;  %v460_v48 = vmul.f32 %v1073_v44, %v302_v43  ;;  %v467_v49 = vsub.f32 1.0, %v1073_v44 }
 0x1d0   :  { %1082 = vrcp.f32 %v442_v46 }
 0x1d1   :  { %v1075_v45 = vpop.eup %1074  ;;  %993 = vmatmul.mubr.msk.f32.vlgmr.msra.gmra.mrb[20].mxu1 %vm179_vm5, %v1339_v47  ;;  %1018 = vmatmul.mubr.msk.f32.vlgmr.msra.gmra.mrb[22].mxu0 %vm179_vm5, %v1339_v47  ;;  %v474_v18 = vmul.f32 %v467_v49, %v1251_v22 }
 0x1d2   :  { %v1077_v51 = vpop.eup %1076  ;;  %v443_v53 = vadd.f32 1.0, %v1075_v45  ;;  %995 = vmatprep.mubr.msk.f32.mxu1 %vm1118_vm3, %v1119_v4  ;;  %1020 = vmatprep.mubr.msk.f32.mxu0 %vm1118_vm3, %v1119_v4 }
 0x1d3   :  { %v1351_v54 = vadd.f32 %v474_v18, %v460_v48  ;;  %v461_v55 = vmul.f32 %v1077_v51, %v303_v50  ;;  %v468_v56 = vsub.f32 1.0, %v1077_v51 }
 0x1d4   :  { %1084 = vrcp.f32 %v443_v53 }
 0x1d5   :  { %v1079_v57 = vpop.eup %1078  ;;  %996 = vmatmul.mubr.msk.f32.gmra.mrb[22].mxu1 %vm179_vm5, %v1351_v54  ;;  %1021 = vmatmul.mubr.msk.f32.gmra.mrb[24].mxu0 %vm179_vm5, %v1351_v54  ;;  %v475_v22 = vmul.f32 %v468_v56, %v1263_v26 }
 0x1d6   :  { %v1081_v60 = vpop.eup %1080  ;;  %v444_v61 = vadd.f32 1.0, %v1079_v57  ;;  %998 = vmatprep.mubr.msk.f32.mxu1 %vm1118_vm3, %v1119_v4  ;;  %1023 = vmatprep.mubr.msk.f32.mxu0 %vm1118_vm3, %v1119_v4 }
 0x1d7   :  { %v1364_v62 = vadd.f32 %v475_v22, %v461_v55  ;;  %v462_v63 = vmul.f32 %v1081_v60, %v304_v58  ;;  %v469_v0 = vsub.f32 1.0, %v1081_v60  ;;  %v1428_v22 = vld [vmem:[%s1486_s7] ss:$0 sm:$0xff] }
 0x1d8   :  { %1086 = vrcp.f32 %v444_v61 }
 0x1d9   :  { %999 = vmatmul.mubr.msk.f32.gmra.mrb[24].mxu1 %vm179_vm5, %v1364_v62  ;;  %1024 = vmatmul.mubr.msk.f32.gmra.mrb[26].mxu0 %vm179_vm5, %v1364_v62  ;;  %v476_v26 = vmul.f32 %v469_v0, %v1275_v30 }
 0x1da   :  { %v1083_v3 = vpop.eup %1082  ;;  %1001 = vmatprep.mubr.msk.f32.mxu1 %vm1118_vm3, %v1119_v4  ;;  %1026 = vmatprep.mubr.msk.f32.mxu0 %vm1118_vm3, %v1119_v4 }
 0x1db   :  { %v1377_v5 = vadd.f32 %v476_v26, %v462_v63  ;;  %v463_v6 = vmul.f32 %v1083_v3, %v305_v1  ;;  %v470_v7 = vsub.f32 1.0, %v1083_v3 }
 0x1dd   :  { %1002 = vmatmul.mubr.msk.f32.gmra.mrb[26].mxu1 %vm179_vm5, %v1377_v5  ;;  %1027 = vmatmul.mubr.msk.f32.gmra.mrb[28].mxu0 %vm179_vm5, %v1377_v5  ;;  %v477_v30 = vmul.f32 %v470_v7, %v1241_v19 }
 0x1de   :  { %v1085_v11 = vpop.eup %1084  ;;  %1004 = vmatprep.mubr.msk.f32.mxu1 %vm1118_vm3, %v1119_v4  ;;  %1029 = vmatprep.mubr.msk.f32.mxu0 %vm1118_vm3, %v1119_v4 }
 0x1df   :  { %v1390_v12 = vadd.f32 %v477_v30, %v463_v6  ;;  %v464_v13 = vmul.f32 %v1085_v11, %v306_v8  ;;  %v471_v14 = vsub.f32 1.0, %v1085_v11 }
 0x1e1   :  { %1005 = vmatmul.mubr.msk.f32.gmra.mrb[28].mxu1 %vm179_vm5, %v1390_v12  ;;  %1030 = vmatmul.mubr.msk.f32.gmra.mrb[30].mxu0 %vm179_vm5, %v1390_v12  ;;  %v478_v19 = vmul.f32 %v471_v14, %v1253_v23 }
 0x1e2   :  { %v1087_v15 = vpop.eup %1086  ;;  %1007 = vmatprep.mubr.msk.f32.mxu1 %vm1118_vm3, %v1119_v4  ;;  %1032 = vmatprep.mubr.msk.f32.mxu0 %vm1118_vm3, %v1119_v4 }
 0x1e3   :  { %v1401_v16 = vadd.f32 %v478_v19, %v464_v13  ;;  %v465_v17 = vmul.f32 %v1087_v15, %v307_v9  ;;  %v472_v20 = vsub.f32 1.0, %v1087_v15 }
 0x1e5   :  { %1008 = vmatmul.mubr.msk.f32.gmra.mrb[30].mxu1 %vm179_vm5, %v1401_v16  ;;  %1033 = vmatmul.mubr.msk.f32.gmra.mrb[32].mxu0 %vm179_vm5, %v1401_v16  ;;  %v479_v21 = vmul.f32 %v472_v20, %v1265_v27 }
 0x1e6   :  { %1010 = vmatprep.mubr.msk.f32.mxu1 %vm1118_vm3, %v1119_v4  ;;  %1035 = vmatprep.mubr.msk.f32.mxu0 %vm1118_vm3, %v1119_v4 }
 0x1e7   :  { %v1412_v23 = vadd.f32 %v479_v21, %v465_v17 }
 0x1e9   :  { %1011 = vmatmul.mubr.msk.f32.gmra.mrb[32].mxu1 %vm179_vm5, %v1412_v23  ;;  %1036 = vmatmul.mubr.msk.f32.gmra.mrb[34].mxu0 %vm179_vm5, %v1412_v23 }
 0x2a4   :  { %v583_v25 = vpop.f32.mrb[20].mxu1  ;;  %v699_v27 = vpop.f32.mrb[22].mxu0 }
 0x2a5   :  { %v700_v28 = vadd.f32 %v853_v24, %v699_v27  ;;  %v994_v29 = vpop.f32.mrb[21].mxu1  ;;  %v1019_v31 = vpop.f32.mrb[23].mxu0  ;;  %v584_v3 = vadd.f32 %v1428_v22, %v583_v25 }
 0x2a7   :  { %v861_v32 = vmul.f32 -1.442695, %v700_v28  ;;  %v617_v9 = vmax.f32 %v584_v3, 0.0 }
 0x2a8   :  { %v588_v33 = vpop.f32.mrb[22].mxu1  ;;  %v704_v4 = vpop.f32.mrb[24].mxu0 }
 0x2a9   :  { %1088 = vpow2.f32 %v861_v32  ;;  %v705_v34 = vadd.f32 %v853_v24, %v704_v4  ;;  %v997_v35 = vpop.f32.mrb[23].mxu1  ;;  %v1022_v36 = vpop.f32.mrb[25].mxu0  ;;  %v589_v19 = vadd.f32 %v1428_v22, %v588_v33 }
 0x2ab   :  { %v862_v37 = vmul.f32 -1.442695, %v705_v34  ;;  %v618_v29 = vmax.f32 %v589_v19, 0.0 }
 0x2ac   :  { %v593_v40 = vpop.f32.mrb[24].mxu1  ;;  %v709_v41 = vpop.f32.mrb[26].mxu0 }
 0x2ad   :  { %1090 = vpow2.f32 %v862_v37  ;;  %v710_v39 = vadd.f32 %v853_v24, %v709_v41  ;;  %v1000_v42 = vpop.f32.mrb[25].mxu1  ;;  %v1025_v43 = vpop.f32.mrb[27].mxu0 }
 0x2af   :  { %v863_v38 = vmul.f32 -1.442695, %v710_v39 }
 0x2b0   :  { %v1421_v44 = vpop.f32.mrb[26].mxu1  ;;  %v714_v46 = vpop.f32.mrb[28].mxu0 }
 0x2b1   :  { %1092 = vpow2.f32 %v863_v38  ;;  %v715_v48 = vadd.f32 %v853_v24, %v714_v46  ;;  %v1003_v49 = vpop.f32.mrb[27].mxu1  ;;  %v1028_v45 = vpop.f32.mrb[29].mxu0 }
 0x2b3   :  { %v1089_v50 = vpop.eup %1088  ;;  %v864_v52 = vmul.f32 -1.442695, %v715_v48 }
 0x2b4   :  { %v754_v18 = vadd.f32 1.0, %v1089_v50  ;;  %v1423_v51 = vpop.f32.mrb[28].mxu1  ;;  %v719_v53 = vpop.f32.mrb[30].mxu0 }
 0x2b5   :  { %1094 = vpow2.f32 %v864_v52  ;;  %v720_v55 = vadd.f32 %v853_v24, %v719_v53  ;;  %v1006_v56 = vpop.f32.mrb[29].mxu1  ;;  %v1031_v57 = vpop.f32.mrb[31].mxu0 }
 0x2b6   :  { %1096 = vrcp.f32 %v754_v18 }
 0x2b7   :  { %v1091_v58 = vpop.eup %1090  ;;  %v865_v59 = vmul.f32 -1.442695, %v720_v55 }
 0x2b8   :  { %v755_v60 = vadd.f32 1.0, %v1091_v58  ;;  %v1430_v61 = vpop.f32.mrb[30].mxu1  ;;  %v724_v63 = vpop.f32.mrb[32].mxu0 }
 0x2b9   :  { %1098 = vpow2.f32 %v865_v59  ;;  %v725_v0 = vadd.f32 %v853_v24, %v724_v63  ;;  %v1009_v1 = vpop.f32.mrb[31].mxu1  ;;  %v1034_v2 = vpop.f32.mrb[33].mxu0 }
 0x2ba   :  { %1100 = vrcp.f32 %v755_v60 }
 0x2bb   :  { %v1093_v26 = vpop.eup %1092  ;;  %v866_v6 = vmul.f32 -1.442695, %v725_v0 }
 0x2bc   :  { %v756_v7 = vadd.f32 1.0, %v1093_v26  ;;  %v613_v8 = vpop.f32.mrb[32].mxu1  ;;  %v729_v10 = vpop.f32.mrb[34].mxu0 }
 0x2bd   :  { %1102 = vpow2.f32 %v866_v6  ;;  %v730_v30 = vadd.f32 %v853_v24, %v729_v10  ;;  %v1012_v11 = vpop.f32.mrb[33].mxu1  ;;  %v1037_v13 = vpop.f32.mrb[35].mxu0  ;;  %v594_v24 = vadd.f32 %v1428_v22, %v593_v40  ;;  %v614_v60 = vadd.f32 %v1428_v22, %v613_v8 }
 0x2be   :  { %1104 = vrcp.f32 %v756_v7 }
 0x2bf   :  { %v1095_v14 = vpop.eup %1094  ;;  %v867_v15 = vmul.f32 -1.442695, %v730_v30  ;;  %v619_v37 = vmax.f32 %v594_v24, 0.0  ;;  %v623_v2 = vmax.f32 %v614_v60, 0.0 }
 0x2c0   :  { %v1097_v17 = vpop.eup %1096  ;;  %v757_v20 = vadd.f32 1.0, %v1095_v14 }
 0x2c1   :  { %v775_v21 = vmul.f32 %v1097_v17, %v617_v9  ;;  %v782_v27 = vsub.f32 1.0, %v1097_v17  ;;  %1106 = vpow2.f32 %v867_v15 }
 0x2c2   :  { %1108 = vrcp.f32 %v757_v20 }
 0x2c3   :  { %v1099_v25 = vpop.eup %1098  ;;  %v789_v28 = vmul.f32 %v782_v27, %v1339_v47  ;;  %v599_v47 = vadd.f32 %v1428_v22, %v1421_v44 }
 0x2c4   :  { %v1101_v31 = vpop.eup %1100  ;;  %v758_v32 = vadd.f32 1.0, %v1099_v25 }
 0x2c5   :  { %v796_v4 = vadd.f32 %v789_v28, %v775_v21  ;;  %v776_v34 = vmul.f32 %v1101_v31, %v618_v29  ;;  %v783_v35 = vsub.f32 1.0, %v1101_v31  ;;  %v620_v48 = vmax.f32 %v599_v47, 0.0 }
 0x2c6   :  { %1110 = vrcp.f32 %v758_v32 }
 0x2c7   :  { %v1103_v33 = vpop.eup %1102  ;;  %803 = vst.msk [vmem:[%s1487_s10] sm:$0xff] %vm179_vm5, %v796_v4  ;;  %v790_v36 = vmul.f32 %v783_v35, %v1351_v54  ;;  %v604_v54 = vadd.f32 %v1428_v22, %v1423_v51 }
 0x2c8   :  { %v1105_v41 = vpop.eup %1104  ;;  %v759_v40 = vadd.f32 1.0, %v1103_v33 }
 0x2c9   :  { %v797_v39 = vadd.f32 %v790_v36, %v776_v34  ;;  %v777_v42 = vmul.f32 %v1105_v41, %v619_v37  ;;  %v784_v43 = vsub.f32 1.0, %v1105_v41  ;;  %v621_v53 = vmax.f32 %v604_v54, 0.0 }
 0x2ca   :  { %1112 = vrcp.f32 %v759_v40 }
 0x2cb   :  { %v1107_v38 = vpop.eup %1106  ;;  %804 = vst.msk [vmem:[%s1487_s10 + $0x8] sm:$0xff] %vm179_vm5, %v797_v39  ;;  %v791_v46 = vmul.f32 %v784_v43, %v1364_v62  ;;  %v609_v62 = vadd.f32 %v1428_v22, %v1430_v61 }
 0x2cc   :  { %v1109_v49 = vpop.eup %1108  ;;  %v760_v44 = vadd.f32 1.0, %v1107_v38 }
 0x2cd   :  { %v798_v45 = vadd.f32 %v791_v46, %v777_v42  ;;  %v778_v50 = vmul.f32 %v1109_v49, %v620_v48  ;;  %v785_v52 = vsub.f32 1.0, %v1109_v49  ;;  %v622_v59 = vmax.f32 %v609_v62, 0.0 }
 0x2ce   :  { %1114 = vrcp.f32 %v760_v44 }
 0x2cf   :  { %805 = vst.msk [vmem:[%s1487_s10 + $0x10] sm:$0xff] %vm179_vm5, %v798_v45  ;;  %v792_v18 = vmul.f32 %v785_v52, %v1377_v5 }
 0x2d0   :  { %v1111_v55 = vpop.eup %1110 }
 0x2d1   :  { %v799_v56 = vadd.f32 %v792_v18, %v778_v50  ;;  %v779_v51 = vmul.f32 %v1111_v55, %v621_v53  ;;  %v786_v57 = vsub.f32 1.0, %v1111_v55 }
 0x2d3   :  { %806 = vst.msk [vmem:[%s1487_s10 + $0x18] sm:$0xff] %vm179_vm5, %v799_v56  ;;  %v793_v58 = vmul.f32 %v786_v57, %v1390_v12 }
 0x2d4   :  { %v1113_v63 = vpop.eup %1112 }
 0x2d5   :  { %v800_v5 = vadd.f32 %v793_v58, %v779_v51  ;;  %v780_v0 = vmul.f32 %v1113_v63, %v622_v59  ;;  %v787_v1 = vsub.f32 1.0, %v1113_v63 }
 0x2d7   :  { %807 = vst.msk [vmem:[%s1487_s10 + $0x20] sm:$0xff] %vm179_vm5, %v800_v5  ;;  %v794_v61 = vmul.f32 %v787_v1, %v1401_v16 }
 0x2d8   :  { %v1115_v26 = vpop.eup %1114 }
 0x2d9   :  { %v801_v3 = vadd.f32 %v794_v61, %v780_v0  ;;  %v781_v6 = vmul.f32 %v1115_v26, %v623_v2  ;;  %v788_v7 = vsub.f32 1.0, %v1115_v26 }
 0x2db   :  { %808 = vst.msk [vmem:[%s1487_s10 + $0x28] sm:$0xff] %vm179_vm5, %v801_v3  ;;  %v795_v12 = vmul.f32 %v788_v7, %v1412_v23 }
 0x2dd   :  { %v802_v22 = vadd.f32 %v795_v12, %v781_v6 }
 0x2df   :  { %809 = vst.msk [vmem:[%s1487_s10 + $0x30] sm:$0xff] %vm179_vm5, %v802_v22 }

// kernel: bidaf_forward.16
= control target key start
LH: loop header
LB: loop body
LE: loop exit
PB: predicated region body
PF: predicated region fallthrough
CT: control target
= control target key end

     0   :  { %v153_v0 = vmov 0.0|0.0   ;;  %vm154_vm0 = vmmov 0   ;;  %v155_v4 = vmov 0.0   ;;  %vm26_vm1 = vcmask 130048   ;;  %s203_s1 = inlined_call_operand.vmem [shape: f32[16,128], index: 1, kind: input, shape index: {}]   ;;  %s204_s0 = inlined_call_operand.vmem [shape: f32[24,16], index: 0, kind: input, shape index: {}]   ;;  %s205_s2 = inlined_call_operand.vmem [shape: f32[1,128], index: 2, kind: input, shape index: {}]   ;;  %s206_s3 = inlined_call_operand.vmem [shape: f32[24,128], index: 3, kind: output, shape index: {}]  }
   0x1   :  { %148 = vmatprep.subr.bf16.mxu1 %v153_v0  ;;  %v17_v1 = vld [vmem:[%s203_s1] sm:$0xff]  ;;  %v18_v2 = vld [vmem:[%s203_s1 + $0x8] sm:$0xff]  ;;  %145 = vmatprep.subr.bf16.mxu0 %v153_v0  ;;  %v16_v7 = vld [vmem:[%s204_s0 + $0x10] sm:$0xff] }
   0x2   :  { %v146_v3 = vpack.c.bf16 %v18_v2, %v17_v1  ;;  %139 = vmatprep.mubr.msk.f32.mxu1 %vm154_vm0, %v155_v4  ;;  %136 = vmatprep.mubr.msk.f32.mxu0 %vm154_vm0, %v155_v4  ;;  %v15_v5 = vld [vmem:[%s204_s0 + $0x8] sm:$0xff]  ;;  %v14_v6 = vld [vmem:[%s204_s0] sm:$0xff] }
   0x3   :  { %v123_v8 = vld [vmem:[%s205_s2] ss:$0 sm:$0xff] }
   0x4   :  { %149 = vmatpush3.bf16.msra.mxu1 %v146_v3  ;;  %147 = vmatpush3.bf16.msra.mxu0 %v146_v3 }
   0x7   :  { %140 = vmatmul.mubr.msk.f32.vlgmr.msra.gmra.mrb[0].mxu1 %vm26_vm1, %v15_v5  ;;  %137 = vmatmul.mubr.msk.f32.vlgmr.msra.gmra.mrb[0].mxu0 %vm26_vm1, %v14_v6 }
   0x8   :  { %142 = vmatprep.mubr.msk.f32.mxu1 %vm154_vm0, %v155_v4 }
   0xb   :  { %143 = vmatmul.mubr.msk.f32.gmra.mrb[2].mxu1 %vm26_vm1, %v16_v7 }
  0xda   :  { %v107_v9 = vpop.f32.mrb[0].mxu1  ;;  %v102_v10 = vpop.f32.mrb[0].mxu0 }
  0xdb   :  { %v108_v11 = vadd.f32 %v123_v8, %v107_v9  ;;  %v141_v12 = vpop.f32.mrb[1].mxu1  ;;  %v103_v13 = vadd.f32 %v123_v8, %v102_v10  ;;  %v138_v14 = vpop.f32.mrb[1].mxu0 }
  0xdd   :  { %117 = vst [vmem:[%s206_s3 + $0x8] sm:$0xff] %v108_v11  ;;  %116 = vst [vmem:[%s206_s3] sm:$0xff] %v103_v13 }
  0xde   :  { %v112_v15 = vpop.f32.mrb[2].mxu1 }
  0xdf   :  { %v113_v16 = vadd.f32 %v123_v8, %v112_v15  ;;  %v144_v17 = vpop.f32.mrb[3].mxu1 }
  0xe1   :  { %118 = vst [vmem:[%s206_s3 + $0x10] sm:$0xff] %v113_v16 }

// kernel: bidaf_forward.17
= control target key start
LH: loop header
LB: loop body
LE: loop exit
PB: predicated region body
PF: predicated region fallthrough
CT: control target
= control target key end

     0   :  { %s846_s12 = smov 0   ;;  %s848_s13 = smov 0   ;;  %s933_s0 = inlined_call_operand.vmem [shape: f32[2,10,2,64], index: 0, kind: input, shape index: {}]   ;;  %s934_s1 = inlined_call_operand.vmem [shape: f32[10,2,1], index: 1, kind: input, shape index: {}]   ;;  %s935_s2 = inlined_call_operand.vmem [shape: f32[2,16,64], index: 2, kind: input, shape index: {}]   ;;  %s936_s3 = inlined_call_operand.vmem [shape: f32[2,10,2,16], index: 3, kind: output, shape index: {}]  }
   0x1   :  { %s850_s14 = smov 0  }
   0x2 LB: > { %s25_s15 = sadd.s32 1, %s797_s13  ;;  %p673_p0 = scmp.ge.s32.totalorder %s801_s14, 1  ;;  %s801_s14 = sphi %s850_s14, %s13_s14   ;;  %s797_s13 = sphi %s848_s13, %s940_s13   ;;  %s793_s12 = sphi %s846_s12, %s939_s12  }
   0x3   : > { %p27_p1 = scmp.ge.s32.totalorder %s25_s15, 2  ;;  %p229_p2 = scmp.lt.s32.totalorder %s801_s14, 3 }
   0x5   : > { %s942_s15 = smov (%p27_p1, %s25_s15), 0  ;;  %p230_p3 = pnand %p673_p0, %p229_p2 }
   0x6   : > { %p292_p4 = scmp.lt.s32.totalorder (!%p230_p3), %s793_s12, 1  ;;  %vm351_vm0 = vcmask (!%p230_p3), 123904   ;;  %v815_v0 = vmov (!%p230_p3), 0.0   ;;  %s891_s28 = smov (!%p230_p3), 0  }
   0x7   : > { %233 = sbr.rel (%p230_p3) target bundleno = 733 (0x2dd), region = 32  ;;  %352 = vst.msk [vmem:[#allocation2] sm:$0x3] (!%p230_p3), %vm351_vm0, %v815_v0  ;;  %353 = vst.msk [vmem:[#allocation3] sm:$0x3] (!%p230_p3), %vm351_vm0, %v815_v0 }
   0xe   : > { %s293_s16 = scalar_select %p292_p4, %s793_s12, 1  ;;  %v356_v3 = vld [vmem:[#allocation2] sm:$0x3]   ;;  %v357_v4 = vld [vmem:[#allocation3] sm:$0x3]  }
  0x10   : > { %s697_s17 = smul.u32 20, %s293_s16  ;;  %s683_s18 = sshll.u32 %s293_s16, 4 }
  0x11   : > { %s326_s21 = scalar_lea.vmem %s935_s2, %s683_s18 }
  0x12   : > { %s876_s24 = scalar_lea.vmem %s933_s0, %s697_s17  ;;  %s881_s27 = scalar_lea.vmem %s936_s3, %s697_s17  ;;  %v883_v1 = vld [vmem:[%s326_s21] sm:$0xff]  ;;  %v885_v2 = vld [vmem:[%s326_s21 + $0x8] sm:$0xff] }
  0x13 LB: >> { %v695_v5 = vpack.c.bf16 %v885_v2, %v883_v1  ;;  %v816_v6 = vmov 0.0|0.0   ;;  %vm817_vm1 = vmmov 0   ;;  %v818_v7 = vmov 0.0   ;;  %s366_s29 = ssub.s32 1, %s793_s12  ;;  %s368_s30 = ssub.s32 9, %s813_s28  ;;  %s813_s28 = sphi %s891_s28, %s363_s28   ;;  %v809_v3 = vphi %v356_v3, %v938_v3   ;;  %v805_v4 = vphi %v357_v4, %v937_v4  }
  0x14   : >> { %694 = vmatprep.subr.bf16.mxu0 %v816_v6  ;;  %691 = vmatprep.mubr.msk.f32.mxu0 %vm817_vm1, %v818_v7  ;;  %vm376_vm2 = vcmask 130048   ;;  %v819_v8 = vmov 0   ;;  %s367_s4 = smul.u32 %s813_s28, %s366_s29  ;;  %s820_s9 = smov 96  }
  0x15   : >> { %696 = vmatpush3.bf16.msra.mxu0 %v695_v5  ;;  %758 = vset.pattern.permute.xlu0 %v819_v8  ;;  %s369_s5 = smul.u32 %s793_s12, %s368_s30  ;;  %s821_s17 = smov 16  }
  0x16   : >> { %757 = vset.pattern.permute.xlu1 %v819_v8  ;;  %s822_s18 = smov 32   ;;  %s823_s19 = smov 48  }
  0x17   : >> { %s370_s6 = sadd.s32 %s369_s5, %s367_s4  ;;  %s824_s20 = smov 80  }
  0x18   : >> { %692 = vmatmul.mubr.msk.f32.vlgmr.msra.gmra.mrb[0].mxu0 %vm376_vm2, %v809_v3  ;;  %s904_s7 = sshll.u32 %s370_s6, 1  ;;  %s825_s21 = smov 112  }
  0x19   : >> { %s372_s8 = scalar_lea.vmem %s876_s24, %s904_s7  ;;  %s374_s16 = scalar_lea.vmem %s934_s1, %s904_s7 }
  0x1a   : >> { %v373_v9 = vld [vmem:[%s372_s8] sm:$0x3]  ;;  %s489_s22 = scalar_lea.vmem %s881_s27, %s904_s7  ;;  %s363_s28 = sadd.s32 1, %s813_s28  }
  0x1b   : >> { %v375_v14 = vld [vmem:[%s374_s16] sm:$0x3]  ;;  %p360_p5 = scmp.ge.s32.totalorder %s363_s28, 10  }
  0x1c   : >> { %v492_v21 = vsub.f32 1.0, %v375_v14 }
  0xeb   : >> { %v446_v10 = vpop.f32.mrb[0].mxu0 }
  0xec   : >> { %v450_v11 = vadd.f32 %v446_v10, %v373_v9  ;;  %v693_v12 = vpop.f32.mrb[1].mxu0 }
  0xee   : >> { %759 = vtanh.f32 %v450_v11  ;;  %v680_v15 = vmul.f32 -1.442695, %v450_v11 }
  0xf0   : >> { %761 = vpow2.f32 %v680_v15 }
  0xf8   : >> { %v760_v13 = vpop.eup %759 }
  0xf9   : >> { %464 = vrot.lane.b32.xlu0 %v760_v13, %s820_s9 }
  0xfa   : >> { %v762_v16 = vpop.eup %761 }
  0xfb   : >> { %v454_v17 = vadd.f32 1.0, %v762_v16 }
  0xfd   : >> { %459 = vrot.lane.b32.xlu0 %v805_v4, %s821_s17  ;;  %763 = vrcp.f32 %v454_v17 }
 0x101   : >> { %481 = vperm.xlu0 %758, %v375_v14  }
 0x107   : >> { %v764_v18 = vpop.eup %763 }
 0x16b   : >> { %v465_v19 = vpop.permute.xlu0 %464 }
 0x16c   : >> { %v467_v20 = vmul.f32 %v764_v18, %v465_v19 }
 0x16e   : >> { %469 = vrot.lane.b32.xlu1 %v467_v20, %s821_s17 }
 0x16f   : >> { %v460_v22 = vpop.permute.xlu0 %459 }
 0x170   : >> { %v462_v23 = vmul.f32 %v764_v18, %v460_v22 }
 0x172   : >> { %495 = vperm.xlu1 %757, %v492_v21  }
 0x180   : >> { %v482_v32 = vpop.permute.xlu0 %481 }
 0x1e0   : >> { %v470_v24 = vpop.permute.xlu1 %469 }
 0x1e1   : >> { %v472_v25 = vadd.f32 %v470_v24, %v462_v23 }
 0x1e3   : >> { %765 = vtanh.f32 %v472_v25  ;;  %v504_v34 = vmul.f32 %v482_v32, %v472_v25 }
 0x1ed   : >> { %v766_v26 = vpop.eup %765 }
 0x1ee   : >> { %475 = vrot.lane.b32.xlu1 %v766_v26, %s822_s18 }
 0x1f1   : >> { %v496_v27 = vpop.permute.xlu1 %495 }
 0x1f2   : >> { %v498_v28 = vmul.f32 %v809_v3, %v496_v27  ;;  %v505_v29 = vmul.f32 %v805_v4, %v496_v27 }
 0x1f4   : >> { %500 = vrot.lane.b32.xlu1 %v498_v28, %s823_s19  ;;  %507 = vrot.lane.b32.xlu0 %v505_v29, %s821_s17 }
 0x260   : >> { %v476_v30 = vpop.permute.xlu1 %475 }
 0x261   : >> { %v478_v31 = vmul.f32 %v764_v18, %v476_v30 }
 0x263   : >> { %v484_v33 = vmul.f32 %v482_v32, %v478_v31 }
 0x265   : >> { %486 = vrot.lane.b32.xlu1 %v484_v33, %s824_s20 }
 0x266   : >> { %v501_v35 = vpop.permute.xlu1 %500  ;;  %v508_v36 = vpop.permute.xlu0 %507 }
 0x267   : >> { %v503_v37 = vadd.f32 %v501_v35, %v484_v33  ;;  %v510_v38 = vadd.f32 %v508_v36, %v504_v34 }
 0x269   : >> { %512 = vrot.lane.b32.xlu0 %v503_v37, %s824_s20  ;;  %516 = vrot.lane.b32.xlu1 %v510_v38, %s825_s21 }
 0x2d6   : > { %362 = sbr.rel (!%p360_p5) target bundleno = 19 (0x13), region = 82 }
 0x2d7   : >> { %v487_v39 = vpop.permute.xlu1 %486 }
 0x2d8   : >> { %491 = vst.msk [vmem:[%s489_s22] sm:$0x3] %vm351_vm0, %v487_v39 }
 0x2db   : >> { %v517_v40 = vpop.permute.xlu1 %516   ;;  %v513_v41 = vpop.permute.xlu0 %512  }
 0x2dc   : >> { %v937_v4 = vmov %v517_v40  ;;  %v938_v3 = vmov %v513_v41  ;;  %520 = vst.msk [vmem:[#allocation2] sm:$0x3] (%p360_p5), %vm351_vm0, %v513_v41  ;;  %521 = vst.msk [vmem:[#allocation3] sm:$0x3] (%p360_p5), %vm351_vm0, %v517_v40 }
 0x2dd PF: > { %s13_s14 = sadd.s32 1, %s801_s14   ;;  %s939_s12 = smov %s797_s13 }
 0x2de   : > { %p10_p6 = scmp.ge.s32.totalorder %s13_s14, 4   ;;  %s940_s13 = smov %s942_s15 }
 0x2e0   :  { %12 = sbr.rel (!%p10_p6) target bundleno = 2 (0x2), region = 93 }

// kernel: bidaf_forward.21
= control target key start
LH: loop header
LB: loop body
LE: loop exit
PB: predicated region body
PF: predicated region fallthrough
CT: control target
= control target key end

     0   :  { %vm29_vm0 = vcmask 261120   ;;  %s237_s1 = inlined_call_operand.vmem [shape: f32[32,128], index: 1, kind: input, shape index: {}]   ;;  %s238_s0 = inlined_call_operand.vmem [shape: f32[32,32], index: 0, kind: input, shape index: {}]   ;;  %s239_s2 = inlined_call_operand.vmem [shape: f32[1,128], index: 2, kind: input, shape index: {}]   ;;  %s240_s3 = inlined_call_operand.vmem [shape: f32[32,128], index: 3, kind: output, shape index: {}]  }
   0x1   :  { %v18_v0 = vld [vmem:[%s237_s1] sm:$0xff]  ;;  %v19_v1 = vld [vmem:[%s237_s1 + $0x8] sm:$0xff]  ;;  %v20_v2 = vld [vmem:[%s237_s1 + $0x10] sm:$0xff] }
   0x2   :  { %v162_v3 = vpack.c.bf16 %v19_v1, %v18_v0  ;;  %v21_v4 = vld [vmem:[%s237_s1 + $0x18] sm:$0xff]  ;;  %v14_v5 = vld [vmem:[%s238_s0] sm:$0xff]  ;;  %v16_v6 = vld [vmem:[%s238_s0 + $0x10] sm:$0xff] }
   0x3   :  { %v166_v7 = vpack.c.bf16 %v21_v4, %v20_v2  ;;  %156 = vmatprep.mubr.msk.f32.mxu0 %vm29_vm0, %v14_v5  ;;  %159 = vmatprep.mubr.msk.f32.mxu1 %vm29_vm0, %v16_v6  ;;  %v15_v8 = vld [vmem:[%s238_s0 + $0x8] sm:$0xff]  ;;  %v17_v9 = vld [vmem:[%s238_s0 + $0x18] sm:$0xff]  ;;  %v135_v10 = vld [vmem:[%s239_s2] ss:$0 sm:$0xff] }
   0x4   :  { %163 = vmatprep.subr.bf16.mxu0 %v162_v3  ;;  %170 = vmatprep.subr.bf16.mxu1 %v162_v3 }
   0x5   :  { %165 = vmatpush3.bf16.msra.mxu0 %v162_v3  ;;  %172 = vmatpush3.bf16.msra.mxu1 %v162_v3 }
   0x6   :  { %167 = vmatprep.subr.bf16.mxu0 %v166_v7  ;;  %171 = vmatprep.subr.bf16.mxu1 %v166_v7 }
   0x9   :  { %169 = vmatpush3.bf16.msra.mxu0 %v166_v7  ;;  %173 = vmatpush3.bf16.msra.mxu1 %v166_v7 }
   0xc   :  { %157 = vmatmul.mubr.msk.f32.vlgmr.msra.gmra.mrb[0].mxu0 %vm29_vm0, %v15_v8  ;;  %160 = vmatmul.mubr.msk.f32.vlgmr.msra.gmra.mrb[0].mxu1 %vm29_vm0, %v17_v9 }
  0xdf   :  { %v158_v11 = vpop.f32.mrb[0].mxu0  ;;  %v161_v12 = vpop.f32.mrb[0].mxu1 }
  0xe0   :  { %v114_v13 = vadd.f32 %v158_v11, %v135_v10  ;;  %v124_v14 = vadd.f32 %v161_v12, %v135_v10  ;;  %v108_v15 = vpop.f32.mrb[1].mxu0  ;;  %v118_v16 = vpop.f32.mrb[1].mxu1 }
  0xe1   :  { %v109_v17 = vadd.f32 %v135_v10, %v108_v15  ;;  %v119_v18 = vadd.f32 %v135_v10, %v118_v16 }
  0xe2   :  { %128 = vst [vmem:[%s240_s3 + $0x8] sm:$0xff] %v114_v13  ;;  %130 = vst [vmem:[%s240_s3 + $0x18] sm:$0xff] %v124_v14 }
  0xe3   :  { %127 = vst [vmem:[%s240_s3] sm:$0xff] %v109_v17  ;;  %129 = vst [vmem:[%s240_s3 + $0x10] sm:$0xff] %v119_v18 }

// kernel: bidaf_forward.19
= control target key start
LH: loop header
LB: loop body
LE: loop exit
PB: predicated region body
PF: predicated region fallthrough
CT: control target
= control target key end

     0   :  { %s336_s1 = inlined_call_operand.vmem [shape: f32[128,128], index: 1, kind: input, shape index: {}]   ;;  %s337_s0 = inlined_call_operand.vmem [shape: f32[32,128], index: 0, kind: input, shape index: {}]   ;;  %s338_s2 = inlined_call_operand.vmem [shape: f32[1,128], index: 2, kind: input, shape index: {}]   ;;  %s339_s3 = inlined_call_operand.vmem [shape: f32[32,128], index: 3, kind: output, shape index: {}]  }
   0x1   :  { %v18_v0 = vld [vmem:[%s336_s1] sm:$0xff]  ;;  %v19_v1 = vld [vmem:[%s336_s1 + $0x8] sm:$0xff]  ;;  %v20_v2 = vld [vmem:[%s336_s1 + $0x10] sm:$0xff] }
   0x2   :  { %v193_v3 = vpack.c.bf16 %v19_v1, %v18_v0  ;;  %v21_v4 = vld [vmem:[%s336_s1 + $0x18] sm:$0xff]  ;;  %v22_v6 = vld [vmem:[%s336_s1 + $0x20] sm:$0xff]  ;;  %v23_v7 = vld [vmem:[%s336_s1 + $0x28] sm:$0xff] }
   0x3   :  { %v197_v5 = vpack.c.bf16 %v21_v4, %v20_v2  ;;  %v201_v8 = vpack.c.bf16 %v23_v7, %v22_v6  ;;  %v14_v9 = vld [vmem:[%s337_s0] sm:$0xff]  ;;  %v16_v10 = vld [vmem:[%s337_s0 + $0x10] sm:$0xff]  ;;  %v25_v12 = vld [vmem:[%s336_s1 + $0x38] sm:$0xff] }
   0x4   :  { %194 = vmatprep.subr.bf16.mxu0 %v193_v3  ;;  %225 = vmatprep.subr.bf16.mxu1 %v193_v3  ;;  %v24_v11 = vld [vmem:[%s336_s1 + $0x30] sm:$0xff]  ;;  %v26_v14 = vld [vmem:[%s336_s1 + $0x40] sm:$0xff]  ;;  %v27_v15 = vld [vmem:[%s336_s1 + $0x48] sm:$0xff] }
   0x5   :  { %196 = vmatpush3.bf16.msra.mxu0 %v193_v3  ;;  %233 = vmatpush3.bf16.msra.mxu1 %v193_v3  ;;  %v205_v13 = vpack.c.bf16 %v25_v12, %v24_v11  ;;  %v209_v16 = vpack.c.bf16 %v27_v15, %v26_v14  ;;  %v28_v17 = vld [vmem:[%s336_s1 + $0x50] sm:$0xff]  ;;  %v29_v18 = vld [vmem:[%s336_s1 + $0x58] sm:$0xff]  ;;  %v30_v20 = vld [vmem:[%s336_s1 + $0x60] sm:$0xff] }
   0x6   :  { %198 = vmatprep.subr.bf16.mxu0 %v197_v5  ;;  %226 = vmatprep.subr.bf16.mxu1 %v197_v5  ;;  %v213_v19 = vpack.c.bf16 %v29_v18, %v28_v17  ;;  %v31_v21 = vld [vmem:[%s336_s1 + $0x68] sm:$0xff]  ;;  %v32_v23 = vld [vmem:[%s336_s1 + $0x70] sm:$0xff]  ;;  %v33_v24 = vld [vmem:[%s336_s1 + $0x78] sm:$0xff] }
   0x7   :  { %187 = vmatprep.mubr.f32.mxu0 %v14_v9  ;;  %190 = vmatprep.mubr.f32.mxu1 %v16_v10  ;;  %v217_v22 = vpack.c.bf16 %v31_v21, %v30_v20  ;;  %v221_v25 = vpack.c.bf16 %v33_v24, %v32_v23  ;;  %v15_v26 = vld [vmem:[%s337_s0 + $0x8] sm:$0xff]  ;;  %v17_v27 = vld [vmem:[%s337_s0 + $0x18] sm:$0xff]  ;;  %v134_v28 = vld [vmem:[%s338_s2] ss:$0 sm:$0xff] }
   0x9   :  { %200 = vmatpush3.bf16.msra.mxu0 %v197_v5  ;;  %234 = vmatpush3.bf16.msra.mxu1 %v197_v5 }
   0xa   :  { %202 = vmatprep.subr.bf16.mxu0 %v201_v8  ;;  %227 = vmatprep.subr.bf16.mxu1 %v201_v8 }
   0xd   :  { %204 = vmatpush3.bf16.msra.mxu0 %v201_v8  ;;  %235 = vmatpush3.bf16.msra.mxu1 %v201_v8 }
   0xe   :  { %206 = vmatprep.subr.bf16.mxu0 %v205_v13  ;;  %228 = vmatprep.subr.bf16.mxu1 %v205_v13 }
  0x11   :  { %208 = vmatpush3.bf16.msra.mxu0 %v205_v13  ;;  %236 = vmatpush3.bf16.msra.mxu1 %v205_v13 }
  0x12   :  { %210 = vmatprep.subr.bf16.mxu0 %v209_v16  ;;  %229 = vmatprep.subr.bf16.mxu1 %v209_v16 }
  0x15   :  { %212 = vmatpush3.bf16.msra.mxu0 %v209_v16  ;;  %237 = vmatpush3.bf16.msra.mxu1 %v209_v16 }
  0x16   :  { %214 = vmatprep.subr.bf16.mxu0 %v213_v19  ;;  %230 = vmatprep.subr.bf16.mxu1 %v213_v19 }
  0x19   :  { %216 = vmatpush3.bf16.msra.mxu0 %v213_v19  ;;  %238 = vmatpush3.bf16.msra.mxu1 %v213_v19 }
  0x1a   :  { %218 = vmatprep.subr.bf16.mxu0 %v217_v22  ;;  %231 = vmatprep.subr.bf16.mxu1 %v217_v22 }
  0x1d   :  { %220 = vmatpush3.bf16.msra.mxu0 %v217_v22  ;;  %239 = vmatpush3.bf16.msra.mxu1 %v217_v22 }
  0x1e   :  { %222 = vmatprep.subr.bf16.mxu0 %v221_v25  ;;  %232 = vmatprep.subr.bf16.mxu1 %v221_v25 }
  0x21   :  { %224 = vmatpush3.bf16.msra.mxu0 %v221_v25  ;;  %240 = vmatpush3.bf16.msra.mxu1 %v221_v25 }
  0x24   :  { %188 = vmatmul.mubr.f32.vlgmr.msra.gmra.mrb[0].mxu0 %v15_v26  ;;  %191 = vmatmul.mubr.f32.vlgmr.msra.gmra.mrb[0].mxu1 %v17_v27 }
  0xf7   :  { %v189_v29 = vpop.f32.mrb[0].mxu0  ;;  %v192_v30 = vpop.f32.mrb[0].mxu1 }
  0xf8   :  { %v113_v31 = vadd.f32 %v189_v29, %v134_v28  ;;  %v123_v32 = vadd.f32 %v192_v30, %v134_v28  ;;  %v107_v33 = vpop.f32.mrb[1].mxu0  ;;  %v117_v34 = vpop.f32.mrb[1].mxu1 }
  0xf9   :  { %v108_v35 = vadd.f32 %v134_v28, %v107_v33  ;;  %v118_v36 = vadd.f32 %v134_v28, %v117_v34 }
  0xfa   :  { %127 = vst [vmem:[%s339_s3 + $0x8] sm:$0xff] %v113_v31  ;;  %129 = vst [vmem:[%s339_s3 + $0x18] sm:$0xff] %v123_v32 }
  0xfb   :  { %126 = vst [vmem:[%s339_s3] sm:$0xff] %v108_v35  ;;  %128 = vst [vmem:[%s339_s3 + $0x10] sm:$0xff] %v118_v36 }

// kernel: bidaf_forward.18
= control target key start
LH: loop header
LB: loop body
LE: loop exit
PB: predicated region body
PF: predicated region fallthrough
CT: control target
= control target key end

     0   :  { %s1258_s29 = smov 0   ;;  %s1349_s0 = inlined_call_operand.vmem [shape: f32[2,16,32], index: 0, kind: input, shape index: {}]   ;;  %s1350_s1 = inlined_call_operand.vmem [shape: f32[2,10,32], index: 1, kind: input, shape index: {}]   ;;  %s1351_s2 = inlined_call_operand.vmem [shape: f32[2,16,1], index: 2, kind: input, shape index: {}]   ;;  %s1352_s3 = inlined_call_operand.vmem [shape: f32[2,1,10], index: 3, kind: input, shape index: {}]   ;;  %s1353_s4 = inlined_call_operand.vmem [shape: f32[1,32], index: 4, kind: input, shape index: {}]   ;;  %s1354_s5 = inlined_call_operand.vmem [shape: f32[1,32], index: 5, kind: input, shape index: {}]   ;;  %s1355_s6 = inlined_call_operand.vmem [shape: f32[1,32], index: 6, kind: input, shape index: {}]   ;;  %s1356_s7 = inlined_call_operand.<no memory space> [shape: f32[1,1], index: 7, kind: input, shape index: {}]   ;;  %s1357_s8 = inlined_call_operand.vmem [shape: f32[2,16,128], index: 8, kind: output, shape index: {}]  }
   0x1   :  { %v13_v0 = vstv %s1356_s7 }
   0x2   :  { %14 = vst [vmem:[#allocation2] sm:$0x1] %v13_v0 }
   0x3 LB: > { %s1044_s30 = sadd.s32 4294967295, %s1200_s29   ;;  %p1048_p0 = scmp.ge.s32.totalorder %s1200_s29, 1  ;;  %s1200_s29 = sphi %s1258_s29, %s20_s29  }
   0x4   : > { %p292_p1 = scmp.lt.s32.totalorder %s1200_s29, 3 }
   0x6   : > { %p293_p2 = pnand %p1048_p0, %p292_p1 }
   0x7   : > { %p339_p3 = scmp.lt.s32.totalorder (!%p293_p2), %s1044_s30, 1  ;;  %v1202_v1 = vmov (!%p293_p2), 0.0|0.0   ;;  %vm1203_vm0 = vmmov (!%p293_p2), 0   ;;  %v1204_v2 = vmov (!%p293_p2), 0.0   ;;  %vm378_vm1 = vcmask (!%p293_p2), 261120   ;;  %s1207_s27 = smov (!%p293_p2), 32  }
   0x8   : > { %296 = sbr.rel (%p293_p2) target bundleno = 1113 (0x459), region = 52  ;;  %1136 = vmatprep.subr.bf16.mxu0 (!%p293_p2), %v1202_v1  ;;  %1105 = vmatprep.mubr.msk.f32.mxu0 (!%p293_p2), %vm1203_vm0, %v1204_v2  ;;  %v1205_v3 = vmov (!%p293_p2), 0   ;;  %v1061_v5 = vld [vmem:[%s1355_s6] ss:$0 sm:$0xff] (!%p293_p2)  ;;  %vm1138_vm2 = vmpackc.low (!%p293_p2), %vm378_vm1, %vm378_vm1  ;;  %v555_v19 = vlaneseq (!%p293_p2)  ;;  %vm593_vm3 = vcmask (!%p293_p2), 80896   ;;  %vm677_vm4 = vcmask (!%p293_p2), 1041408  }
   0x9   : > { %1178 = vset.pattern.permute.xlu1 (!%p293_p2), %v1205_v3  ;;  %v1066_v4 = vld [vmem:[#allocation2] ss:$0 sm:$0xff] (!%p293_p2)  ;;  %1179 = vset.pattern.permute.xlu0 (!%p293_p2), %v1205_v3  ;;  %vm1206_vm5 = vmmov (!%p293_p2), 1   ;;  %vm1153_vm7 = vmpackc.low (!%p293_p2), %vm593_vm3, %vm593_vm3  ;;  %vm836_vm8 = vcmask (!%p293_p2), 130048   ;;  %s1208_s28 = smov (!%p293_p2), 64   ;;  %vm948_vm9 = vcmask (!%p293_p2), 523264  }
   0xa   : > { %570 = vperm.xlu1 (!%p293_p2), %1178, %v1066_v4   ;;  %v1057_v6 = vld [vmem:[%s1353_s4] ss:$0 sm:$0xff] (!%p293_p2)  ;;  %v556_v20 = vshrl.u32 (!%p293_p2), %v555_v19, 7  ;;  %vm1147_vm6 = vmpackc.low (!%p293_p2), %vm677_vm4, %vm1206_vm5  ;;  %vm951_vm10 = vcmask (!%p293_p2), 785408  }
   0xb   : > { %v385_v17 = vld [vmem:[%s1354_s5] sm:$0x1] (!%p293_p2) }
   0xc   : > { %v557_v23 = vsub.s32 (!%p293_p2), 0, %v556_v20 }
   0xf   : > { %s1359_s30 = smov (!%p339_p3, %s1044_s30), 1 }
  0x10   : > { %s1269_s7 = sshll.u32 %s1359_s30, 4  ;;  %s356_s23 = scalar_lea.vmem %s1352_s3, %s1359_s30 }
  0x11   : > { %s348_s15 = scalar_lea.vmem %s1350_s1, %s1269_s7  ;;  %s343_s18 = scalar_lea.vmem %s1349_s0, %s1269_s7  ;;  %v368_v22 = vld [vmem:[%s356_s23] sm:$0x1] }
  0x12   : > { %v364_v7 = vld [vmem:[%s348_s15] sm:$0xff]  ;;  %v365_v8 = vld [vmem:[%s348_s15 + $0x8] sm:$0x3]  ;;  %v583_v24 = vsub.f32 1.0, %v368_v22  ;;  %v579_v37 = vrot.slane %v368_v22, %v557_v23  ;;  %s353_s26 = scalar_lea.vmem %s1351_s2, %s1269_s7  ;;  %s1209_s30 = smov 96  }
  0x13   : > { %v1287_v9 = vld [vmem:[%s343_s18] sm:$0xff]  ;;  %v1289_v10 = vpack.c.bf16 %v365_v8, %v364_v7  ;;  %v1291_v11 = vld [vmem:[%s343_s18 + $0x8] sm:$0xff]  ;;  %s361_s11 = scalar_lea.vmem %s1357_s8, %s1269_s7 }
  0x14   : > { %v472_v12 = vmul.f32 %v1061_v5, %v1287_v9  ;;  %v376_v13 = vmul.f32 %v1057_v6, %v1287_v9  ;;  %v377_v14 = vmul.f32 %v1057_v6, %v1291_v11  ;;  %v473_v18 = vmul.f32 %v1061_v5, %v1291_v11  ;;  %v367_v47 = vld [vmem:[%s353_s26 + $0x8] sm:$0xff]  ;;  %v366_v49 = vld [vmem:[%s353_s26] sm:$0xff] }
  0x15   : > { %1139 = vmatpush3.bf16.xpose.msk.msra.mxu0 %vm1138_vm2, %v1289_v10  ;;  %1142 = vmatprep.subr.msk.bf16.mxu1 %vm1138_vm2, %v1289_v10  ;;  %v584_v33 = vmul.f32 -1e+30, %v583_v24  ;;  %v629_v48 = vsub.f32 1.0, %v367_v47  ;;  %v628_v51 = vsub.f32 1.0, %v366_v49 }
  0x16   : > { %v379_v15 = vsel %vm378_vm1, %v376_v13, 0.0  ;;  %1145 = vmatpush3.bf16.xpose.msk.msra.mxu1 %vm1138_vm2, %v1289_v10  ;;  %1112 = vmatprep.mubr.msk.f32.mxu1 %vm378_vm1, %v472_v12  ;;  %v382_v16 = vsel %vm378_vm1, %v377_v14, 0.0 }
  0x17   : > { %380 = vadd.xlane.f32.xlu0 %v379_v15  ;;  %v589_v40 = vrot.slane %v584_v33, %v557_v23  ;;  %v631_v50 = vmul.f32 -1e+30, %v629_v48  ;;  %v630_v52 = vmul.f32 -1e+30, %v628_v51  ;;  %1148 = vmatprep.subr.msk.bf16.mxu0 %vm1147_vm6, %v1289_v10 }
  0x1b   : > { %383 = vadd.xlane.f32.xlu0 %v382_v16 }
  0x1c   : > { %1106 = vmatmul.mubr.msk.f32.vlgmr.msra.gmra.mrb[0].mxu0 %vm378_vm1, %v385_v17 }
  0x1d   : > { %1113 = vmatmul.mubr.msk.f32.vlgmr.msra.gmra.mrb[0].mxu1 %vm378_vm1, %v473_v18  ;;  %1151 = vmatpush3.bf16.msk.msra.mxu0 %vm1147_vm6, %v1289_v10 }
  0x89   : > { %v571_v34 = vpop.permute.xlu1 %570 }
  0xa4   : > { %v381_v21 = vpop.xlane.xlu0 %380 }
  0xa8   : > { %v384_v26 = vpop.xlane.xlu0 %383 }
  0xef   : > { %v461_v25 = vpop.f32.mrb[0].mxu0 }
  0xf0   : > { %v558_v27 = vrot.slane %v461_v25, %v557_v23  ;;  %v1107_v28 = vpop.f32.mrb[1].mxu0  ;;  %v1114_v29 = vpop.f32.mrb[0].mxu1 }
  0xf1   : > { %v546_v30 = vpop.f32.mrb[1].mxu1 }
  0xf2   : > { %v560_v31 = vadd.f32 %v558_v27, %v384_v26  ;;  %v559_v32 = vadd.f32 %v558_v27, %v381_v21  ;;  %v1158_v26 = vpack.c.bf16 %v1291_v11, %v1287_v9 }
  0xf4   : > { %v562_v35 = vadd.f32 %v1114_v29, %v560_v31  ;;  %v561_v36 = vadd.f32 %v559_v32, %v546_v30  ;;  %1159 = vmatprep.subr.bf16.mxu0 %v1158_v26 }
  0xf6   : > { %v573_v38 = vadd.f32 %v571_v34, %v561_v36  ;;  %v574_v39 = vadd.f32 %v571_v34, %v562_v35 }
  0xf8   : > { %v581_v41 = vmul.f32 %v579_v37, %v573_v38  ;;  %v582_v42 = vmul.f32 %v579_v37, %v574_v39 }
  0xfa   : > { %v591_v43 = vadd.f32 %v589_v40, %v581_v41  ;;  %v592_v44 = vadd.f32 %v589_v40, %v582_v42 }
  0xfc   : > { %v594_v45 = vsel %vm593_vm3, %v591_v43, -inf  ;;  %v597_v46 = vsel %vm593_vm3, %v592_v44, -inf }
  0xfd   : > { %595 = vmax.xlane.f32.xlu1 %v594_v45  ;;  %598 = vmax.xlane.f32.xlu0 %v597_v46 }
 0x10e   : > { %623 = vperm.xlu1 %1178, %v367_v47  }
 0x112   : > { %639 = vperm.xlu1 %1178, %v631_v50  }
 0x113   : > { %618 = vperm.xlu0 %1179, %v366_v49  }
 0x117   : > { %634 = vperm.xlu0 %1179, %v630_v52  }
 0x18a   : > { %v596_v53 = vpop.xlane.xlu1 %595  ;;  %v599_v54 = vpop.xlane.xlu0 %598 }
 0x18b   : > { %v600_v55 = vsub.f32 %v591_v43, %v596_v53  ;;  %v601_v56 = vsub.f32 %v592_v44, %v599_v54 }
 0x18d   : > { %v602_v57 = vmul.f32 1.442695, %v600_v55  ;;  %v604_v58 = vmul.f32 1.442695, %v601_v56 }
 0x18e   : > { %v624_v59 = vpop.permute.xlu1 %623 }
 0x18f   : > { %1180 = vpow2.f32 %v602_v57  ;;  %v627_v62 = vmul.f32 %v624_v59, %v574_v39 }
 0x190   : > { %1182 = vpow2.f32 %v604_v58 }
 0x192   : > { %v640_v60 = vpop.permute.xlu1 %639  ;;  %v619_v61 = vpop.permute.xlu0 %618 }
 0x193   : > { %v643_v63 = vadd.f32 %v640_v60, %v627_v62  ;;  %v626_v0 = vmul.f32 %v619_v61, %v573_v38 }
 0x195   : > { %v645_v4 = vsel %vm593_vm3, %v643_v63, -inf }
 0x196   : > { %v635_v1 = vpop.permute.xlu0 %634 }
 0x197   : > { %v642_v2 = vadd.f32 %v635_v1, %v626_v0 }
 0x199   : > { %v1181_v3 = vpop.eup %1180  ;;  %v644_v5 = vsel %vm593_vm3, %v642_v2, -inf }
 0x19a   : > { %v1183_v6 = vpop.eup %1182  ;;  %v646_v7 = vmax.f32 %v644_v5, %v645_v4  ;;  %v606_v8 = vsel %vm593_vm3, %v1181_v3, 0.0 }
 0x19b   : > { %607 = vadd.xlane.f32.xlu0 %v606_v8  ;;  %v609_v12 = vsel %vm593_vm3, %v1183_v6, 0.0 }
 0x19c   : > { %v647_v13 = vrot.slane %v646_v7, 4  ;;  %610 = vadd.xlane.f32.xlu1 %v609_v12 }
 0x19e   : > { %v648_v14 = vmax.f32 %v646_v7, %v647_v13 }
 0x1a0   : > { %v649_v15 = vrot.slane %v648_v14, 2 }
 0x1a2   : > { %v650_v16 = vmax.f32 %v648_v14, %v649_v15 }
 0x1a4   : > { %v651_v17 = vrot.slane %v650_v16, 1 }
 0x1a6   : > { %v652_v18 = vmax.f32 %v650_v16, %v651_v17 }
 0x1a8   : > { %v653_v19 = vsub.f32 %v642_v2, %v652_v18  ;;  %v654_v20 = vsub.f32 %v643_v63, %v652_v18 }
 0x1aa   : > { %v655_v21 = vmul.f32 1.442695, %v653_v19  ;;  %v657_v22 = vmul.f32 1.442695, %v654_v20 }
 0x1ac   : > { %1184 = vpow2.f32 %v655_v21 }
 0x1ad   : > { %1186 = vpow2.f32 %v657_v22 }
 0x1b6   : > { %v1185_v23 = vpop.eup %1184 }
 0x1b7   : > { %v1187_v24 = vpop.eup %1186  ;;  %v659_v25 = vsel %vm593_vm3, %v1185_v23, 0.0 }
 0x1b8   : > { %v660_v27 = vsel %vm593_vm3, %v1187_v24, 0.0 }
 0x1b9   : > { %v661_v28 = vadd.f32 %v660_v27, %v659_v25 }
 0x1bb   : > { %v662_v29 = vrot.slane %v661_v28, 4 }
 0x1bd   : > { %v663_v30 = vadd.f32 %v662_v29, %v661_v28 }
 0x1bf   : > { %v664_v31 = vrot.slane %v663_v30, 2 }
 0x1c1   : > { %v665_v32 = vadd.f32 %v664_v31, %v663_v30 }
 0x1c3   : > { %v666_v33 = vrot.slane %v665_v32, 1 }
 0x1c5   : > { %v667_v34 = vadd.f32 %v666_v33, %v665_v32 }
 0x1c7   : > { %1188 = vrcp.f32 %v667_v34 }
 0x1d1   : > { %v1189_v35 = vpop.eup %1188 }
 0x1d2   : > { %v669_v10 = vmul.f32 %v1189_v35, %v1185_v23  ;;  %v670_v36 = vmul.f32 %v1189_v35, %v1187_v24 }
 0x1d4   : > { %v1152_v37 = vpack.c.bf16 %v670_v36, %v669_v10 }
 0x1d6   : > { %1154 = vmatprep.subr.msk.bf16.mxu1 %vm1153_vm7, %v1152_v37 }
 0x1d7   : > { %1157 = vmatpush3.bf16.xpose.msk.msra.mxu1 %vm1153_vm7, %v1152_v37 }
 0x228   : > { %v608_v38 = vpop.xlane.xlu0 %607 }
 0x229   : > { %v611_v39 = vpop.xlane.xlu1 %610  ;;  %1190 = vrcp.f32 %v608_v38 }
 0x22a   : > { %1192 = vrcp.f32 %v611_v39 }
 0x233   : > { %v1191_v40 = vpop.eup %1190 }
 0x234   : > { %v1193_v41 = vpop.eup %1192  ;;  %v614_v42 = vmul.f32 %v1191_v40, %v1181_v3 }
 0x235   : > { %v615_v43 = vmul.f32 %v1193_v41, %v1183_v6 }
 0x236   : > { %1119 = vmatprep.mubr.msk.f32.mxu0 %vm593_vm3, %v614_v42  ;;  %1126 = vmatprep.mubr.msk.f32.mxu1 %vm593_vm3, %v614_v42 }
 0x237   : > { %1120 = vmatmul.mubr.msk.f32.vlgmr.msra.gmra.mrb[2].mxu0 %vm593_vm3, %v615_v43  ;;  %1127 = vmatmul.mubr.msk.f32.vlgmr.msra.gmra.mrb[2].mxu1 %vm593_vm3, %v615_v43 }
 0x238   : > { %1161 = vmatpush3.bf16.msra.mxu0 %v1158_v26 }
 0x30a   : > { %v1121_v44 = vpop.f32.mrb[2].mxu0  ;;  %v1128_v45 = vpop.f32.mrb[2].mxu1 }
 0x30b   : > { %v827_v46 = vpop.f32.mrb[3].mxu1  ;;  %926 = vrot.lane.b32.xlu1 %v1121_v44, %s1207_s27  ;;  %v746_v47 = vpop.f32.mrb[3].mxu0  ;;  %v919_v48 = vmul.f32 %v1121_v44, %v1291_v11 }
 0x30c   : > { %1133 = vmatprep.mubr.msk.f32.mxu0 %vm836_vm8, %v827_v46  ;;  %924 = vrot.lane.b32.xlu0 %v746_v47, %s1207_s27  ;;  %v918_v49 = vmul.f32 %v746_v47, %v1287_v9 }
 0x30d   : > { %1134 = vmatmul.mubr.msk.f32.vlgmr.msra.gmra.mrb[4].mxu0 %vm836_vm8, %v1128_v45 }
 0x30f   : > { %934 = vrot.lane.b32.xlu1 %v919_v48, %s1208_s28 }
 0x310   : > { %932 = vrot.lane.b32.xlu0 %v918_v49, %s1208_s28 }
 0x37d   : > { %v927_v54 = vpop.permute.xlu1 %926 }
 0x37e   : > { %v925_v55 = vpop.permute.xlu0 %924  ;;  %v947_v58 = vsel %vm378_vm1, %v1291_v11, %v927_v54 }
 0x37f   : > { %v946_v59 = vsel %vm378_vm1, %v1287_v9, %v925_v55 }
 0x381   : > { %v935_v56 = vpop.permute.xlu1 %934 }
 0x382   : > { %v933_v57 = vpop.permute.xlu0 %932  ;;  %v950_v60 = vsel %vm948_vm9, %v947_v58, %v935_v56 }
 0x383   : > { %v949_v62 = vsel %vm948_vm9, %v946_v59, %v933_v57 }
 0x3e0   : > { %v1135_v50 = vpop.f32.mrb[4].mxu0 }
 0x3e1   : > { %v921_v51 = vmul.f32 %v1135_v50, %v1291_v11  ;;  %v909_v52 = vpop.f32.mrb[5].mxu0 }
 0x3e2   : > { %v920_v53 = vmul.f32 %v909_v52, %v1287_v9 }
 0x3e3   : > { %942 = vrot.lane.b32.xlu1 %v921_v51, %s1209_s30 }
 0x3e4   : > { %940 = vrot.lane.b32.xlu0 %v920_v53, %s1209_s30 }
 0x455   : > { %v943_v61 = vpop.permute.xlu1 %942 }
 0x456   : > { %v953_v63 = vsel %vm951_vm10, %v950_v60, %v943_v61  ;;  %v941_v0 = vpop.permute.xlu0 %940 }
 0x457   : > { %955 = vst [vmem:[%s361_s11 + $0x8] sm:$0xff] %v953_v63  ;;  %v952_v1 = vsel %vm951_vm10, %v949_v62, %v941_v0 }
 0x458   : > { %954 = vst [vmem:[%s361_s11] sm:$0xff] %v952_v1 }
 0x459 PF: > { %s20_s29 = sadd.s32 1, %s1200_s29  }
 0x45a   : > { %p17_p4 = scmp.ge.s32.totalorder %s20_s29, 4  }
 0x45c   :  { %19 = sbr.rel (!%p17_p4) target bundleno = 3 (0x3), region = 91 }

// kernel: bidaf_forward.25
= control target key start
LH: loop header
LB: loop body
LE: loop exit
PB: predicated region body
PF: predicated region fallthrough
CT: control target
= control target key end

     0   :  { %s1008_s30 = smov 0   ;;  %s1074_s0 = inlined_call_operand.vmem [shape: f32[2,16,128], index: 0, kind: input, shape index: {}]   ;;  %s1075_s1 = inlined_call_operand.vmem [shape: f32[2,16,32], index: 1, kind: input, shape index: {}]   ;;  %s1076_s2 = inlined_call_operand.vmem [shape: f32[2,16,32], index: 2, kind: input, shape index: {}]   ;;  %s1077_s3 = inlined_call_operand.vmem [shape: f32[2,1,16], index: 3, kind: input, shape index: {}]   ;;  %s1078_s4 = inlined_call_operand.vmem [shape: f32[1,128], index: 4, kind: input, shape index: {}]   ;;  %s1079_s5 = inlined_call_operand.vmem [shape: f32[1,32], index: 5, kind: input, shape index: {}]   ;;  %s1080_s6 = inlined_call_operand.vmem [shape: f32[1,128], index: 6, kind: input, shape index: {}]   ;;  %s1081_s7 = inlined_call_operand.vmem [shape: f32[1,32], index: 7, kind: input, shape index: {}]   ;;  %s1082_s8 = inlined_call_operand.vmem [shape: f32[1,2], index: 8, kind: input, shape index: {}]   ;;  %s1083_s9 = inlined_call_operand.vmem [shape: f32[2,2,16], index: 9, kind: output, shape index: {}]  }
   0x1 LB: > { %s844_s10 = sadd.s32 4294967295, %s951_s30   ;;  %p848_p0 = scmp.ge.s32.totalorder %s951_s30, 1  ;;  %s951_s30 = sphi %s1008_s30, %s19_s30  }
   0x2   : > { %p315_p1 = scmp.lt.s32.totalorder %s951_s30, 3 }
   0x4   : > { %p316_p2 = pnand %p848_p0, %p315_p1 }
   0x5   : > { %p363_p3 = scmp.lt.s32.totalorder (!%p316_p2), %s844_s10, 1  ;;  %v953_v0 = vmov (!%p316_p2), 0.0|0.0   ;;  %vm954_vm0 = vmmov (!%p316_p2), 0   ;;  %v955_v1 = vmov (!%p316_p2), 0.0   ;;  %vm395_vm1 = vcmask (!%p316_p2), 261120  }
   0x6   : > { %319 = sbr.rel (%p316_p2) target bundleno = 579 (0x243), region = 56  ;;  %907 = vmatprep.subr.bf16.mxu0 (!%p316_p2), %v953_v0  ;;  %911 = vmatprep.subr.bf16.mxu1 (!%p316_p2), %v953_v0  ;;  %v956_v2 = vmov (!%p316_p2), 1   ;;  %v392_v3 = vld [vmem:[%s1082_s8] sm:$0x1] (!%p316_p2)  ;;  %vm1029_vm2 = vmpackc.low (!%p316_p2), %vm395_vm1, %vm395_vm1  ;;  %v957_v11 = vmov (!%p316_p2), 0   ;;  %v550_v19 = vlaneseq (!%p316_p2)  ;;  %vm719_vm3 = vcmask (!%p316_p2), 122880  }
   0x7   : > { %883 = vmatprep.mubr.msk.f32.mxu0 (!%p316_p2), %vm954_vm0, %v955_v1  ;;  %890 = vmatprep.mubr.msk.f32.mxu1 (!%p316_p2), %vm954_vm0, %v955_v1  ;;  %v394_v14 = vld [vmem:[%s1079_s5] sm:$0x1] (!%p316_p2)  ;;  %vm754_vm4 = vcmask (!%p316_p2), 1040384   ;;  %vm756_vm5 = vcmask (!%p316_p2), 123904  }
   0x8   : > { %934 = vset.pattern.permute.xlu0 (!%p316_p2), %v956_v2  ;;  %v393_v16 = vld [vmem:[%s1078_s4] sm:$0x1] (!%p316_p2)  ;;  %v551_v21 = vshrl.u32 (!%p316_p2), %v550_v19, 7 }
   0x9   : > { %707 = vperm.xlu0 (!%p316_p2), %934, %v392_v3   ;;  %v556_v17 = vld [vmem:[%s1081_s7] sm:$0x1] (!%p316_p2) }
   0xa   : > { %v555_v18 = vld [vmem:[%s1080_s6] sm:$0x1] (!%p316_p2)  ;;  %v552_v25 = vsub.s32 (!%p316_p2), 0, %v551_v21 }
   0xd   : > { %s1087_s10 = smov (!%p363_p3, %s844_s10), 1  ;;  %935 = vset.pattern.permute.xlu0 %v957_v11 }
   0xe   : > { %s864_s13 = sshll.u32 %s1087_s10, 4  ;;  %547 = vperm.xlu0 %935, %v392_v3   ;;  %s380_s14 = scalar_lea.vmem %s1077_s3, %s1087_s10 }
   0xf   : > { %s372_s16 = scalar_lea.vmem %s1075_s1, %s864_s13  ;;  %s367_s19 = scalar_lea.vmem %s1074_s0, %s864_s13  ;;  %v391_v30 = vld [vmem:[%s380_s14] sm:$0x1] }
  0x10   : > { %v387_v4 = vld [vmem:[%s372_s16] sm:$0xff]  ;;  %v388_v5 = vld [vmem:[%s372_s16 + $0x8] sm:$0xff]  ;;  %s377_s22 = scalar_lea.vmem %s1076_s2, %s864_s13  ;;  %v716_v38 = vsub.f32 1.0, %v391_v30  ;;  %s855_s15 = sshll.u32 %s1087_s10, 1 }
  0x11   : > { %v908_v7 = vpack.c.bf16 %v388_v5, %v387_v4  ;;  %v385_v8 = vld [vmem:[%s367_s19] sm:$0xff]  ;;  %v386_v9 = vld [vmem:[%s367_s19 + $0x8] sm:$0xff]  ;;  %s384_s18 = scalar_lea.vmem %s1083_s9, %s855_s15 }
  0x12   : > { %v912_v10 = vpack.c.bf16 %v386_v9, %v385_v8  ;;  %v389_v12 = vld [vmem:[%s377_s22] sm:$0xff]  ;;  %v390_v13 = vld [vmem:[%s377_s22 + $0x8] sm:$0xff]  ;;  %936 = vset.pattern.permute.xlu0 %v956_v2  ;;  %v717_v42 = vmul.f32 -1e+30, %v716_v38 }
  0x13   : > { %910 = vmatpush3.bf16.xpose.msk.msra.mxu0 %vm1029_vm2, %v908_v7  ;;  %v915_v15 = vpack.c.bf16 %v390_v13, %v389_v12 }
  0x14   : > { %913 = vmatpush3.bf16.xpose.msra.mxu1 %v912_v10  ;;  %914 = vmatprep.subr.bf16.mxu0 %v953_v0 }
  0x15   : > { %918 = vmatprep.subr.bf16.mxu1 %v953_v0 }
  0x1a   : > { %884 = vmatmul.mubr.msk.f32.vlgmr.msra.gmra.mrb[0].mxu0 %vm395_vm1, %v394_v14 }
  0x1b   : > { %891 = vmatmul.mubr.f32.vlgmr.msra.gmra.mrb[0].mxu1 %v393_v16  ;;  %917 = vmatpush3.bf16.xpose.msk.msra.mxu0 %vm1029_vm2, %v915_v15 }
  0x1c   : > { %920 = vmatpush3.bf16.xpose.msra.mxu1 %v912_v10  ;;  %897 = vmatprep.mubr.msk.f32.mxu0 %vm954_vm0, %v955_v1 }
  0x1d   : > { %904 = vmatprep.mubr.msk.f32.mxu1 %vm954_vm0, %v955_v1 }
  0x22   : > { %898 = vmatmul.mubr.msk.f32.vlgmr.msra.gmra.mrb[2].mxu0 %vm395_vm1, %v556_v17 }
  0x23   : > { %905 = vmatmul.mubr.f32.vlgmr.msra.gmra.mrb[2].mxu1 %v555_v18 }
  0x88   : > { %v708_v20 = vpop.permute.xlu0 %707 }
  0x89   : > { %v713_v31 = vrot.slane %v708_v20, %v552_v25 }
  0x8d   : > { %v548_v28 = vpop.permute.xlu0 %547 }
  0x8e   : > { %v553_v29 = vrot.slane %v548_v28, %v552_v25 }
  0xed   : > { %v471_v22 = vpop.f32.mrb[0].mxu0 }
  0xee   : > { %v541_v23 = vpop.f32.mrb[0].mxu1  ;;  %v885_v24 = vpop.f32.mrb[1].mxu0 }
  0xef   : > { %v542_v26 = vadd.f32 %v541_v23, %v471_v22  ;;  %v892_v27 = vpop.f32.mrb[1].mxu1 }
  0xf1   : > { %v554_v35 = vadd.f32 %v553_v29, %v542_v26 }
  0xf3   : > { %v715_v40 = vmul.f32 %v554_v35, %v391_v30 }
  0xf5   : > { %v632_v32 = vpop.f32.mrb[2].mxu0  ;;  %v718_v45 = vadd.f32 %v717_v42, %v715_v40 }
  0xf6   : > { %v702_v33 = vpop.f32.mrb[2].mxu1  ;;  %v899_v34 = vpop.f32.mrb[3].mxu0 }
  0xf7   : > { %v703_v36 = vadd.f32 %v702_v33, %v632_v32  ;;  %v906_v37 = vpop.f32.mrb[3].mxu1  ;;  %v720_v46 = vsel %vm719_vm3, %v718_v45, -inf }
  0xf9   : > { %v714_v39 = vadd.f32 %v713_v31, %v703_v36 }
  0xfb   : > { %v733_v41 = vmul.f32 %v714_v39, %v391_v30 }
  0xfd   : > { %v734_v43 = vadd.f32 %v733_v41, %v717_v42 }
  0xff   : > { %v735_v44 = vsel %vm719_vm3, %v734_v43, -inf }
 0x100   : > { %736 = vmax.xlane.f32.xlu1 %v735_v44 }
 0x104   : > { %721 = vmax.xlane.f32.xlu1 %v720_v46 }
 0x18d   : > { %v737_v47 = vpop.xlane.xlu1 %736 }
 0x18e   : > { %v738_v48 = vsub.f32 %v734_v43, %v737_v47 }
 0x190   : > { %v739_v49 = vmul.f32 1.442695, %v738_v48 }
 0x191   : > { %v722_v50 = vpop.xlane.xlu1 %721 }
 0x192   : > { %937 = vpow2.f32 %v739_v49  ;;  %v723_v51 = vsub.f32 %v718_v45, %v722_v50 }
 0x194   : > { %v724_v52 = vmul.f32 1.442695, %v723_v51 }
 0x196   : > { %939 = vpow2.f32 %v724_v52 }
 0x19c   : > { %v938_v53 = vpop.eup %937 }
 0x19d   : > { %v741_v54 = vsel %vm719_vm3, %v938_v53, 0.0 }
 0x19e   : > { %742 = vadd.xlane.f32.xlu1 %v741_v54 }
 0x1a0   : > { %v940_v55 = vpop.eup %939 }
 0x1a1   : > { %v726_v56 = vsel %vm719_vm3, %v940_v55, 0.0 }
 0x1a2   : > { %727 = vadd.xlane.f32.xlu0 %v726_v56 }
 0x22b   : > { %v743_v57 = vpop.xlane.xlu1 %742 }
 0x22c   : > { %941 = vlog2.f32 %v743_v57 }
 0x22f   : > { %v728_v58 = vpop.xlane.xlu0 %727 }
 0x230   : > { %943 = vlog2.f32 %v728_v58 }
 0x236   : > { %v942_v59 = vpop.eup %941 }
 0x237   : > { %v745_v60 = vmul.f32 0.6931472, %v942_v59 }
 0x239   : > { %v746_v61 = vadd.f32 %v745_v60, %v737_v47 }
 0x23a   : > { %v944_v62 = vpop.eup %943 }
 0x23b   : > { %v747_v63 = vsub.f32 %v734_v43, %v746_v61  ;;  %v730_v0 = vmul.f32 0.6931472, %v944_v62 }
 0x23d   : > { %v731_v1 = vadd.f32 %v730_v0, %v722_v50  ;;  %v752_v2 = vrot.slane %v747_v63, %v552_v25 }
 0x23f   : > { %v732_v3 = vsub.f32 %v718_v45, %v731_v1 }
 0x241   : > { %v755_v4 = vsel %vm754_vm4, %v732_v3, %v752_v2 }
 0x242   : > { %757 = vst.msk [vmem:[%s384_s18] sm:$0x3] %vm756_vm5, %v755_v4 }
 0x243 PF: > { %s19_s30 = sadd.s32 1, %s951_s30  }
 0x244   : > { %p16_p4 = scmp.ge.s32.totalorder %s19_s30, 4  }
 0x246   :  { %18 = sbr.rel (!%p16_p4) target bundleno = 1 (0x1), region = 95 }

</bundles_post_ra>
